<compile_context>
chip_gen: v5e
topology: v5e:2x2
jax: 0.10.0
libtpu: 0.0.40
codegen_flags: <defaults>
</compile_context>

<pallas_src>
import jax
import jax.numpy as jnp
from jax.experimental import pallas as pl
from jax.experimental.pallas import tpu as pltpu


def _round_up(x, m):
    return (x + m - 1) // m * m


def _fold_bn(gamma, beta, mean, var, eps=1e-5):
    scale = gamma / jnp.sqrt(var + eps)
    return scale, beta - mean * scale


# ---------------------------------------------------------------------------
# Kernel 1: fused   out = [relu](x @ w * scale + bias)     (1x1 conv + BN[+ReLU])
# ---------------------------------------------------------------------------
def _make_mm_affine_kernel(apply_relu):
    def kernel(x_ref, w_ref, s_ref, b_ref, o_ref):
        y = jnp.dot(x_ref[...], w_ref[...], preferred_element_type=jnp.float32)
        y = y * s_ref[...] + b_ref[...]
        if apply_relu:
            y = jnp.maximum(y, 0.0)
        o_ref[...] = y.astype(o_ref.dtype)
    return kernel


def matmul_affine(x2d, w, scale, bias, *, relu, block_rows=256):
    """x2d: (M, K), w: (K, N). Row-tiled so each step works on a lane-dense
    (block_rows, K) slab; tune block_rows up to the per-generation VMEM budget
    (trivially small at these test sizes)."""
    M, K = x2d.shape
    N = w.shape[1]
    tm = min(block_rows, _round_up(M, 8))
    Mp = _round_up(M, tm)
    if Mp != M:
        x2d = jnp.pad(x2d, ((0, Mp - M), (0, 0)))
    out = pl.pallas_call(
        _make_mm_affine_kernel(relu),
        out_shape=jax.ShapeDtypeStruct((Mp, N), x2d.dtype),
        grid_spec=pltpu.PrefetchScalarGridSpec(
            num_scalar_prefetch=0,
            grid=(Mp // tm,),
            in_specs=[
                pl.BlockSpec((tm, K), lambda i: (i, 0)),
                pl.BlockSpec((K, N), lambda i: (0, 0)),
                pl.BlockSpec((1, N), lambda i: (0, 0)),
                pl.BlockSpec((1, N), lambda i: (0, 0)),
            ],
            out_specs=pl.BlockSpec((tm, N), lambda i: (i, 0)),
        ),
        compiler_params=pltpu.CompilerParams(
            dimension_semantics=("parallel",)),
    )(x2d, w, scale.reshape(1, N), bias.reshape(1, N))
    return out[:M]


# ---------------------------------------------------------------------------
# Kernel 2: 3x3 conv, stride 1, pad 1 (NHWC, 9-tap shifted matmuls per image)
# ---------------------------------------------------------------------------
def _conv3x3_kernel(x_ref, w_ref, o_ref):
    _, HW, Cout = o_ref.shape            # (1, H*W, Cout)
    _, Hp, Wp, Cin = x_ref.shape         # (1, H+2, W+2, Cin)
    H, W = Hp - 2, Wp - 2
    xp = x_ref[0]
    acc = jnp.zeros((HW, Cout), jnp.float32)
    for ky in range(3):
        for kx in range(3):
            xs = xp[ky:ky + H, kx:kx + W, :].reshape(HW, Cin)
            acc = acc + jnp.dot(xs, w_ref[ky * 3 + kx],
                                preferred_element_type=jnp.float32)
    o_ref[0] = acc.astype(o_ref.dtype)


def conv3x3(x_nhwc, w_taps):
    """x_nhwc: (N, H, W, Cin), w_taps: (9, Cin, Cout) with tap index ky*3+kx."""
    N, H, W, Cin = x_nhwc.shape
    Cout = w_taps.shape[-1]
    xpad = jnp.pad(x_nhwc, ((0, 0), (1, 1), (1, 1), (0, 0)))
    out = pl.pallas_call(
        _conv3x3_kernel,
        out_shape=jax.ShapeDtypeStruct((N, H * W, Cout), x_nhwc.dtype),
        grid_spec=pltpu.PrefetchScalarGridSpec(
            num_scalar_prefetch=0,
            grid=(N,),
            in_specs=[
                pl.BlockSpec((1, H + 2, W + 2, Cin), lambda n: (n, 0, 0, 0)),
                pl.BlockSpec((9, Cin, Cout), lambda n: (0, 0, 0)),
            ],
            out_specs=pl.BlockSpec((1, H * W, Cout), lambda n: (n, 0, 0)),
        ),
        compiler_params=pltpu.CompilerParams(
            dimension_semantics=("parallel",)),
    )(xpad, w_taps)
    return out.reshape(N, H, W, Cout)


# ---------------------------------------------------------------------------
# Kernel 3: fused tail
#   space_to_depth -> BN -> ReLU -> 1x1 conv -> BN -> (+ shortcut) -> ReLU
# ---------------------------------------------------------------------------
def _s2d_tail_kernel(x_ref, s1_ref, b1_ref, w_ref, s2_ref, b2_ref, r_ref, o_ref):
    # x_ref: (1, H2, 2, W2, 2C) -- column parity already merged into lanes.
    _, HW, Cexp = o_ref.shape
    C2 = x_ref.shape[-1]                 # 2 * Cmid
    acc = jnp.zeros((HW, Cexp), jnp.float32)
    for a in (0, 1):                     # row parity (even / odd input rows)
        ya = x_ref[0, :, a, :, :].reshape(HW, C2).astype(jnp.float32)
        ya = jnp.maximum(ya * s1_ref[a:a + 1, :] + b1_ref[a:a + 1, :], 0.0)
        acc = acc + jnp.dot(ya.astype(w_ref.dtype), w_ref[a],
                            preferred_element_type=jnp.float32)
    z = acc * s2_ref[...] + b2_ref[...]
    z = z + r_ref[0].astype(jnp.float32)
    o_ref[0] = jnp.maximum(z, 0.0).astype(o_ref.dtype)


def s2d_conv3_residual(y_nhwc, s_bn2, b_bn2, w3_2d, s_bn3, b_bn3, res2d):
    """y_nhwc: conv2 output (N,H,W,C).  Applies space_to_depth + BN + ReLU +
    1x1 conv (w3_2d: (4C, Cexp)) + BN + residual add + ReLU in one kernel."""
    N, H, W, C = y_nhwc.shape
    H2, W2 = H // 2, W // 2
    HW = H2 * W2
    Cexp = w3_2d.shape[-1]
    C4 = 4 * C

    # torch s2d channel order  t = (2*colpar + rowpar)*C + c
    # kernel natural order     p = rowpar*2C + colpar*C + c
    p = jnp.arange(C4)
    row_par, rem = p // (2 * C), p % (2 * C)
    col_par, ch = rem // C, rem % C
    perm = (2 * col_par + row_par) * C + ch
    s1p = s_bn2[perm].reshape(2, 2 * C)
    b1p = b_bn2[perm].reshape(2, 2 * C)
    w3p = w3_2d[perm, :].reshape(2, 2 * C, Cexp)

    yr = y_nhwc.reshape(N, H2, 2, W2, 2 * C)      # free contiguous reshape
    res3 = res2d.reshape(N, HW, Cexp)             # free

    out = pl.pallas_call(
        _s2d_tail_kernel,
        out_shape=jax.ShapeDtypeStruct((N, HW, Cexp), y_nhwc.dtype),
        grid_spec=pltpu.PrefetchScalarGridSpec(
            num_scalar_prefetch=0,
            grid=(N,),
            in_specs=[
                pl.BlockSpec((1, H2, 2, W2, 2 * C), lambda n: (n, 0, 0, 0, 0)),
                pl.BlockSpec((2, 2 * C), lambda n: (0, 0)),
                pl.BlockSpec((2, 2 * C), lambda n: (0, 0)),
                pl.BlockSpec((2, 2 * C, Cexp), lambda n: (0, 0, 0)),
                pl.BlockSpec((1, Cexp), lambda n: (0, 0)),
                pl.BlockSpec((1, Cexp), lambda n: (0, 0)),
                pl.BlockSpec((1, HW, Cexp), lambda n: (n, 0, 0)),
            ],
            out_specs=pl.BlockSpec((1, HW, Cexp), lambda n: (n, 0, 0)),
        ),
        compiler_params=pltpu.CompilerParams(
            dimension_semantics=("parallel",)),
    )(yr, s1p, b1p, w3p, s_bn3.reshape(1, Cexp), b_bn3.reshape(1, Cexp), res3)
    return out.reshape(N, H2, W2, Cexp)


# ---------------------------------------------------------------------------
# Full BottleNeck forward (stride=2 / space_to_depth branch, eval-mode BN)
# ---------------------------------------------------------------------------
@jax.jit
def bottleneck_forward(x_nchw, params):
    N, Cin, H, W = x_nchw.shape
    Cmid = params["w1"].shape[0]
    Cexp = params["w3"].shape[0]

    x_nhwc = jnp.transpose(x_nchw, (0, 2, 3, 1))      # layout plumbing

    s1, b1 = _fold_bn(*params["bn1"])
    s2, b2 = _fold_bn(*params["bn2"])
    s3, b3 = _fold_bn(*params["bn3"])
    ss, bs = _fold_bn(*params["bns"])

    # residual branch: 1x1 conv + BN + ReLU
    w1_2d = jnp.transpose(params["w1"][:, :, 0, 0])    # (Cin, Cmid)
    y = matmul_affine(x_nhwc.reshape(-1, Cin), w1_2d, s1, b1, relu=True)
    y = y.reshape(N, H, W, Cmid)

    # 3x3 conv, stride 1, pad 1
    w2_taps = jnp.transpose(params["w2"], (2, 3, 1, 0)).reshape(9, Cmid, Cmid)
    y = conv3x3(y, w2_taps)                            # (N, H, W, Cmid)

    # shortcut branch: 1x1 conv stride 2 + BN
    ws_2d = jnp.transpose(params["ws"][:, :, 0, 0])    # (Cin, Cexp)
    x_sub = x_nhwc[:, ::2, ::2, :].reshape(-1, Cin)
    sc = matmul_affine(x_sub, ws_2d, ss, bs, relu=False)  # (N*H2*W2, Cexp)

    # fused tail: space_to_depth + BN + ReLU + 1x1 conv + BN + add + ReLU
    w3_2d = jnp.transpose(params["w3"][:, :, 0, 0])    # (4*Cmid, Cexp)
    out_nhwc = s2d_conv3_residual(y, s2, b2, w3_2d, s3, b3, sc)

    return jnp.transpose(out_nhwc, (0, 3, 1, 2))       # back to NCHW


# ---------------------------------------------------------------------------
# Pure-JAX reference (NCHW, mirrors the PyTorch module with eval-mode BN)
# ---------------------------------------------------------------------------
def _bn_nchw(y, bn, eps=1e-5):
    g, b, m, v = bn
    inv = (g / jnp.sqrt(v + eps))[None, :, None, None]
    return (y - m[None, :, None, None]) * inv + b[None, :, None, None]


def _reference_bottleneck(x, params):
    P = jax.lax.Precision.HIGHEST
    dn = ("NCHW", "OIHW", "NCHW")
    y = jax.lax.conv_general_dilated(x, params["w1"], (1, 1), "VALID",
                                     dimension_numbers=dn, precision=P)
    y = jnp.maximum(_bn_nchw(y, params["bn1"]), 0.0)
    y = jax.lax.conv_general_dilated(y, params["w2"], (1, 1), ((1, 1), (1, 1)),
                                     dimension_numbers=dn, precision=P)
    y = jnp.concatenate([y[..., ::2, ::2], y[..., 1::2, ::2],
                         y[..., ::2, 1::2], y[..., 1::2, 1::2]], axis=1)
    y = jnp.maximum(_bn_nchw(y, params["bn2"]), 0.0)
    y = jax.lax.conv_general_dilated(y, params["w3"], (1, 1), "VALID",
                                     dimension_numbers=dn, precision=P)
    y = _bn_nchw(y, params["bn3"])
    s = jax.lax.conv_general_dilated(x, params["ws"], (2, 2), "VALID",
                                     dimension_numbers=dn, precision=P)
    s = _bn_nchw(s, params["bns"])
    return jnp.maximum(y + s, 0.0)


def _rand_bn(key, c):
    k1, k2, k3, k4 = jax.random.split(key, 4)
    gamma = jax.random.uniform(k1, (c,), jnp.float32, 0.5, 1.5)
    beta = 0.1 * jax.random.normal(k2, (c,), jnp.float32)
    mean = 0.1 * jax.random.normal(k3, (c,), jnp.float32)
    var = jax.random.uniform(k4, (c,), jnp.float32, 0.5, 1.5)
    return gamma, beta, mean, var


if __name__ == "__main__":
    key = jax.random.PRNGKey(0)
    N, Cin, H, W = 2, 4, 16, 16            # BottleNeck(in=4, out=8, stride=2)
    Cmid = 8
    Cexp = 4 * Cmid                        # expansion = 4

    ks = jax.random.split(key, 9)

    def conv_w(k, shape, fan_in):
        return jax.random.normal(k, shape, jnp.float32) / jnp.sqrt(fan_in)

    params = {
        "w1": conv_w(ks[0], (Cmid, Cin, 1, 1), Cin),
        "bn1": _rand_bn(ks[1], Cmid),
        "w2": conv_w(ks[2], (Cmid, Cmid, 3, 3), 9 * Cmid),
        "bn2": _rand_bn(ks[3], 4 * Cmid),
        "w3": conv_w(ks[4], (Cexp, 4 * Cmid, 1, 1), 4 * Cmid),
        "bn3": _rand_bn(ks[5], Cexp),
        "ws": conv_w(ks[6], (Cexp, Cin, 1, 1), Cin),
        "bns": _rand_bn(ks[7], Cexp),
    }
    x = jax.random.normal(ks[8], (N, Cin, H, W), jnp.float32)

    out = bottleneck_forward(x, params)
    out = jax.block_until_ready(out)

    ref = _reference_bottleneck(x, params)
    assert out.shape == ref.shape == (N, Cexp, H // 2, W // 2), out.shape
    max_err = float(jnp.max(jnp.abs(out - ref)))
    assert jnp.allclose(out, ref, atol=2e-2, rtol=2e-2), f"max abs err {max_err}"
    print("KERNEL_OK")
</pallas_src>

<mosaic_0001>
module attributes {stable_mosaic.version = 11 : i64} {
  func.func @kernel(%arg0: i32, %arg1: memref<256x4xf32, #tpu.memory_space<vmem>>, %arg2: memref<4x8xf32, #tpu.memory_space<vmem>>, %arg3: memref<1x8xf32, #tpu.memory_space<vmem>>, %arg4: memref<1x8xf32, #tpu.memory_space<vmem>>, %arg5: memref<256x8xf32, #tpu.memory_space<vmem>>) attributes {dimension_semantics = [#tpu.dimension_semantics<parallel>], iteration_bounds = array<i64: 2>, scalar_prefetch = 0 : i64, scratch_operands = 0 : i64, tpu.core_type = #tpu.core_type<tc>, window_params = [{transform_indices = @transform_0, window_bounds = array<i64: 256, 4>}, {pipeline_mode = #tpu.pipeline_mode<synchronous>, transform_indices = @transform_1, window_bounds = array<i64: 4, 8>}, {pipeline_mode = #tpu.pipeline_mode<synchronous>, transform_indices = @transform_2, window_bounds = array<i64: 1, 8>}, {pipeline_mode = #tpu.pipeline_mode<synchronous>, transform_indices = @transform_3, window_bounds = array<i64: 1, 8>}, {transform_indices = @transform_4, window_bounds = array<i64: 256, 8>}]} {
    %c0 = arith.constant 0 : index
    %c0_0 = arith.constant 0 : index
    %0 = vector.load %arg1[%c0, %c0_0] : memref<256x4xf32, #tpu.memory_space<vmem>>, vector<256x4xf32>
    %c0_1 = arith.constant 0 : index
    %c0_2 = arith.constant 0 : index
    %1 = vector.load %arg2[%c0_1, %c0_2] : memref<4x8xf32, #tpu.memory_space<vmem>>, vector<4x8xf32>
    %cst = arith.constant dense<0.000000e+00> : vector<256x8xf32>
    %2 = tpu.matmul %0, %1, %cst {dimension_numbers = #tpu.dot_dimension_numbers<[1], [0], [0], [1], [0, 0, 1, 1], [], []>} : vector<256x4xf32>, vector<4x8xf32>, vector<256x8xf32> -> vector<256x8xf32>
    %c0_3 = arith.constant 0 : index
    %c0_4 = arith.constant 0 : index
    %3 = vector.load %arg3[%c0_3, %c0_4] : memref<1x8xf32, #tpu.memory_space<vmem>>, vector<1x8xf32>
    %4 = vector.broadcast %3 : vector<1x8xf32> to vector<256x8xf32>
    %5 = arith.mulf %2, %4 : vector<256x8xf32>
    %c0_5 = arith.constant 0 : index
    %c0_6 = arith.constant 0 : index
    %6 = vector.load %arg4[%c0_5, %c0_6] : memref<1x8xf32, #tpu.memory_space<vmem>>, vector<1x8xf32>
    %7 = vector.broadcast %6 : vector<1x8xf32> to vector<256x8xf32>
    %8 = arith.addf %5, %7 : vector<256x8xf32>
    %cst_7 = arith.constant 0.000000e+00 : f32
    %9 = vector.broadcast %cst_7 : f32 to vector<256x8xf32>
    %10 = arith.maximumf %8, %9 : vector<256x8xf32>
    %c0_8 = arith.constant 0 : index
    %c0_9 = arith.constant 0 : index
    %11 = vector.load %arg5[%c0_8, %c0_9] : memref<256x8xf32, #tpu.memory_space<vmem>>, vector<256x8xf32>
    tpu.vector_store %arg5[%c0_8, %c0_9], %10 {strides = array<i32>} : memref<256x8xf32, #tpu.memory_space<vmem>>, vector<256x8xf32>,
    return
  }
  func.func @transform_0(%arg0: i32) -> (i32, i32) {
    %c0_i32 = arith.constant 0 : i32
    %c0_i32_0 = arith.constant 0 : i32
    return %arg0, %c0_i32 : i32, i32
  }
  func.func @transform_1(%arg0: i32) -> (i32, i32) {
    %c0_i32 = arith.constant 0 : i32
    %c0_i32_0 = arith.constant 0 : i32
    %c0_i32_1 = arith.constant 0 : i32
    return %c0_i32, %c0_i32_0 : i32, i32
  }
  func.func @transform_2(%arg0: i32) -> (i32, i32) {
    %c0_i32 = arith.constant 0 : i32
    %c0_i32_0 = arith.constant 0 : i32
    %c0_i32_1 = arith.constant 0 : i32
    return %c0_i32, %c0_i32_0 : i32, i32
  }
  func.func @transform_3(%arg0: i32) -> (i32, i32) {
    %c0_i32 = arith.constant 0 : i32
    %c0_i32_0 = arith.constant 0 : i32
    %c0_i32_1 = arith.constant 0 : i32
    return %c0_i32, %c0_i32_0 : i32, i32
  }
  func.func @transform_4(%arg0: i32) -> (i32, i32) {
    %c0_i32 = arith.constant 0 : i32
    %c0_i32_0 = arith.constant 0 : i32
    return %arg0, %c0_i32 : i32, i32
  }
}

module attributes {stable_mosaic.version = 11 : i64} {
  func.func @_conv3x3_kernel(%arg0: i32, %arg1: memref<1x18x18x8xf32, #tpu.memory_space<vmem>>, %arg2: memref<9x8x8xf32, #tpu.memory_space<vmem>>, %arg3: memref<1x256x8xf32, #tpu.memory_space<vmem>>) attributes {dimension_semantics = [#tpu.dimension_semantics<parallel>], iteration_bounds = array<i64: 2>, scalar_prefetch = 0 : i64, scratch_operands = 0 : i64, tpu.core_type = #tpu.core_type<tc>, window_params = [{transform_indices = @transform_0, window_bounds = array<i64: 1, 18, 18, 8>}, {pipeline_mode = #tpu.pipeline_mode<synchronous>, transform_indices = @transform_1, window_bounds = array<i64: 9, 8, 8>}, {transform_indices = @transform_2, window_bounds = array<i64: 1, 256, 8>}]} {
    %c0 = arith.constant 0 : index
    %c0_0 = arith.constant 0 : index
    %c0_1 = arith.constant 0 : index
    %c0_2 = arith.constant 0 : index
    %0 = vector.load %arg1[%c0, %c0_0, %c0_1, %c0_2] : memref<1x18x18x8xf32, #tpu.memory_space<vmem>>, vector<1x18x18x8xf32>
    %1 = vector.shape_cast %0 : vector<1x18x18x8xf32> to vector<18x18x8xf32>
    %cst = arith.constant 0.000000e+00 : f32
    %2 = vector.broadcast %cst : f32 to vector<256x8xf32>
    %3 = vector.extract_strided_slice %1 {offsets = [0, 0, 0], sizes = [16, 16, 8], strides = [1, 1, 1]} : vector<18x18x8xf32> to vector<16x16x8xf32>
    %4 = vector.shape_cast %3 : vector<16x16x8xf32> to vector<256x8xf32>
    %c0_3 = arith.constant 0 : index
    %c0_4 = arith.constant 0 : index
    %c0_5 = arith.constant 0 : index
    %5 = vector.load %arg2[%c0_3, %c0_4, %c0_5] : memref<9x8x8xf32, #tpu.memory_space<vmem>>, vector<1x8x8xf32>
    %6 = vector.shape_cast %5 : vector<1x8x8xf32> to vector<8x8xf32>
    %cst_6 = arith.constant dense<0.000000e+00> : vector<256x8xf32>
    %7 = tpu.matmul %4, %6, %cst_6 {dimension_numbers = #tpu.dot_dimension_numbers<[1], [0], [0], [1], [0, 0, 1, 1], [], []>} : vector<256x8xf32>, vector<8x8xf32>, vector<256x8xf32> -> vector<256x8xf32>
    %8 = arith.addf %2, %7 : vector<256x8xf32>
    %9 = vector.extract_strided_slice %1 {offsets = [0, 1, 0], sizes = [16, 16, 8], strides = [1, 1, 1]} : vector<18x18x8xf32> to vector<16x16x8xf32>
    %10 = vector.shape_cast %9 : vector<16x16x8xf32> to vector<256x8xf32>
    %c1 = arith.constant 1 : index
    %c0_7 = arith.constant 0 : index
    %c0_8 = arith.constant 0 : index
    %11 = vector.load %arg2[%c1, %c0_7, %c0_8] : memref<9x8x8xf32, #tpu.memory_space<vmem>>, vector<1x8x8xf32>
    %12 = vector.shape_cast %11 : vector<1x8x8xf32> to vector<8x8xf32>
    %cst_9 = arith.constant dense<0.000000e+00> : vector<256x8xf32>
    %13 = tpu.matmul %10, %12, %cst_9 {dimension_numbers = #tpu.dot_dimension_numbers<[1], [0], [0], [1], [0, 0, 1, 1], [], []>} : vector<256x8xf32>, vector<8x8xf32>, vector<256x8xf32> -> vector<256x8xf32>
    %14 = arith.addf %8, %13 : vector<256x8xf32>
    %15 = vector.extract_strided_slice %1 {offsets = [0, 2, 0], sizes = [16, 16, 8], strides = [1, 1, 1]} : vector<18x18x8xf32> to vector<16x16x8xf32>
    %16 = vector.shape_cast %15 : vector<16x16x8xf32> to vector<256x8xf32>
    %c2 = arith.constant 2 : index
    %c0_10 = arith.constant 0 : index
    %c0_11 = arith.constant 0 : index
    %17 = vector.load %arg2[%c2, %c0_10, %c0_11] : memref<9x8x8xf32, #tpu.memory_space<vmem>>, vector<1x8x8xf32>
    %18 = vector.shape_cast %17 : vector<1x8x8xf32> to vector<8x8xf32>
    %cst_12 = arith.constant dense<0.000000e+00> : vector<256x8xf32>
    %19 = tpu.matmul %16, %18, %cst_12 {dimension_numbers = #tpu.dot_dimension_numbers<[1], [0], [0], [1], [0, 0, 1, 1], [], []>} : vector<256x8xf32>, vector<8x8xf32>, vector<256x8xf32> -> vector<256x8xf32>
    %20 = arith.addf %14, %19 : vector<256x8xf32>
    %21 = vector.extract_strided_slice %1 {offsets = [1, 0, 0], sizes = [16, 16, 8], strides = [1, 1, 1]} : vector<18x18x8xf32> to vector<16x16x8xf32>
    %22 = vector.shape_cast %21 : vector<16x16x8xf32> to vector<256x8xf32>
    %c3 = arith.constant 3 : index
    %c0_13 = arith.constant 0 : index
    %c0_14 = arith.constant 0 : index
    %23 = vector.load %arg2[%c3, %c0_13, %c0_14] : memref<9x8x8xf32, #tpu.memory_space<vmem>>, vector<1x8x8xf32>
    %24 = vector.shape_cast %23 : vector<1x8x8xf32> to vector<8x8xf32>
    %cst_15 = arith.constant dense<0.000000e+00> : vector<256x8xf32>
    %25 = tpu.matmul %22, %24, %cst_15 {dimension_numbers = #tpu.dot_dimension_numbers<[1], [0], [0], [1], [0, 0, 1, 1], [], []>} : vector<256x8xf32>, vector<8x8xf32>, vector<256x8xf32> -> vector<256x8xf32>
    %26 = arith.addf %20, %25 : vector<256x8xf32>
    %27 = vector.extract_strided_slice %1 {offsets = [1, 1, 0], sizes = [16, 16, 8], strides = [1, 1, 1]} : vector<18x18x8xf32> to vector<16x16x8xf32>
    %28 = vector.shape_cast %27 : vector<16x16x8xf32> to vector<256x8xf32>
    %c4 = arith.constant 4 : index
    %c0_16 = arith.constant 0 : index
    %c0_17 = arith.constant 0 : index
    %29 = vector.load %arg2[%c4, %c0_16, %c0_17] : memref<9x8x8xf32, #tpu.memory_space<vmem>>, vector<1x8x8xf32>
    %30 = vector.shape_cast %29 : vector<1x8x8xf32> to vector<8x8xf32>
    %cst_18 = arith.constant dense<0.000000e+00> : vector<256x8xf32>
    %31 = tpu.matmul %28, %30, %cst_18 {dimension_numbers = #tpu.dot_dimension_numbers<[1], [0], [0], [1], [0, 0, 1, 1], [], []>} : vector<256x8xf32>, vector<8x8xf32>, vector<256x8xf32> -> vector<256x8xf32>
    %32 = arith.addf %26, %31 : vector<256x8xf32>
    %33 = vector.extract_strided_slice %1 {offsets = [1, 2, 0], sizes = [16, 16, 8], strides = [1, 1, 1]} : vector<18x18x8xf32> to vector<16x16x8xf32>
    %34 = vector.shape_cast %33 : vector<16x16x8xf32> to vector<256x8xf32>
    %c5 = arith.constant 5 : index
    %c0_19 = arith.constant 0 : index
    %c0_20 = arith.constant 0 : index
    %35 = vector.load %arg2[%c5, %c0_19, %c0_20] : memref<9x8x8xf32, #tpu.memory_space<vmem>>, vector<1x8x8xf32>
    %36 = vector.shape_cast %35 : vector<1x8x8xf32> to vector<8x8xf32>
    %cst_21 = arith.constant dense<0.000000e+00> : vector<256x8xf32>
    %37 = tpu.matmul %34, %36, %cst_21 {dimension_numbers = #tpu.dot_dimension_numbers<[1], [0], [0], [1], [0, 0, 1, 1], [], []>} : vector<256x8xf32>, vector<8x8xf32>, vector<256x8xf32> -> vector<256x8xf32>
    %38 = arith.addf %32, %37 : vector<256x8xf32>
    %39 = vector.extract_strided_slice %1 {offsets = [2, 0, 0], sizes = [16, 16, 8], strides = [1, 1, 1]} : vector<18x18x8xf32> to vector<16x16x8xf32>
    %40 = vector.shape_cast %39 : vector<16x16x8xf32> to vector<256x8xf32>
    %c6 = arith.constant 6 : index
    %c0_22 = arith.constant 0 : index
    %c0_23 = arith.constant 0 : index
    %41 = vector.load %arg2[%c6, %c0_22, %c0_23] : memref<9x8x8xf32, #tpu.memory_space<vmem>>, vector<1x8x8xf32>
    %42 = vector.shape_cast %41 : vector<1x8x8xf32> to vector<8x8xf32>
    %cst_24 = arith.constant dense<0.000000e+00> : vector<256x8xf32>
    %43 = tpu.matmul %40, %42, %cst_24 {dimension_numbers = #tpu.dot_dimension_numbers<[1], [0], [0], [1], [0, 0, 1, 1], [], []>} : vector<256x8xf32>, vector<8x8xf32>, vector<256x8xf32> -> vector<256x8xf32>
    %44 = arith.addf %38, %43 : vector<256x8xf32>
    %45 = vector.extract_strided_slice %1 {offsets = [2, 1, 0], sizes = [16, 16, 8], strides = [1, 1, 1]} : vector<18x18x8xf32> to vector<16x16x8xf32>
    %46 = vector.shape_cast %45 : vector<16x16x8xf32> to vector<256x8xf32>
    %c7 = arith.constant 7 : index
    %c0_25 = arith.constant 0 : index
    %c0_26 = arith.constant 0 : index
    %47 = vector.load %arg2[%c7, %c0_25, %c0_26] : memref<9x8x8xf32, #tpu.memory_space<vmem>>, vector<1x8x8xf32>
    %48 = vector.shape_cast %47 : vector<1x8x8xf32> to vector<8x8xf32>
    %cst_27 = arith.constant dense<0.000000e+00> : vector<256x8xf32>
    %49 = tpu.matmul %46, %48, %cst_27 {dimension_numbers = #tpu.dot_dimension_numbers<[1], [0], [0], [1], [0, 0, 1, 1], [], []>} : vector<256x8xf32>, vector<8x8xf32>, vector<256x8xf32> -> vector<256x8xf32>
    %50 = arith.addf %44, %49 : vector<256x8xf32>
    %51 = vector.extract_strided_slice %1 {offsets = [2, 2, 0], sizes = [16, 16, 8], strides = [1, 1, 1]} : vector<18x18x8xf32> to vector<16x16x8xf32>
    %52 = vector.shape_cast %51 : vector<16x16x8xf32> to vector<256x8xf32>
    %c8 = arith.constant 8 : index
    %c0_28 = arith.constant 0 : index
    %c0_29 = arith.constant 0 : index
    %53 = vector.load %arg2[%c8, %c0_28, %c0_29] : memref<9x8x8xf32, #tpu.memory_space<vmem>>, vector<1x8x8xf32>
    %54 = vector.shape_cast %53 : vector<1x8x8xf32> to vector<8x8xf32>
    %cst_30 = arith.constant dense<0.000000e+00> : vector<256x8xf32>
    %55 = tpu.matmul %52, %54, %cst_30 {dimension_numbers = #tpu.dot_dimension_numbers<[1], [0], [0], [1], [0, 0, 1, 1], [], []>} : vector<256x8xf32>, vector<8x8xf32>, vector<256x8xf32> -> vector<256x8xf32>
    %56 = arith.addf %50, %55 : vector<256x8xf32>
    %c0_31 = arith.constant 0 : index
    %c0_32 = arith.constant 0 : index
    %c0_33 = arith.constant 0 : index
    %57 = vector.load %arg3[%c0_31, %c0_32, %c0_33] : memref<1x256x8xf32, #tpu.memory_space<vmem>>, vector<1x256x8xf32>
    %58 = vector.shape_cast %57 : vector<1x256x8xf32> to vector<256x8xf32>
    %59 = vector.shape_cast %56 : vector<256x8xf32> to vector<1x256x8xf32>
    tpu.vector_store %arg3[%c0_31, %c0_32, %c0_33], %59 {strides = array<i32>} : memref<1x256x8xf32, #tpu.memory_space<vmem>>, vector<1x256x8xf32>,
    return
  }
  func.func @transform_0(%arg0: i32) -> (i32, i32, i32, i32) {
    %c0_i32 = arith.constant 0 : i32
    %c0_i32_0 = arith.constant 0 : i32
    %c0_i32_1 = arith.constant 0 : i32
    %c0_i32_2 = arith.constant 0 : i32
    return %arg0, %c0_i32, %c0_i32_0, %c0_i32_1 : i32, i32, i32, i32
  }
  func.func @transform_1(%arg0: i32) -> (i32, i32, i32) {
    %c0_i32 = arith.constant 0 : i32
    %c0_i32_0 = arith.constant 0 : i32
    %c0_i32_1 = arith.constant 0 : i32
    %c0_i32_2 = arith.constant 0 : i32
    return %c0_i32, %c0_i32_0, %c0_i32_1 : i32, i32, i32
  }
  func.func @transform_2(%arg0: i32) -> (i32, i32, i32) {
    %c0_i32 = arith.constant 0 : i32
    %c0_i32_0 = arith.constant 0 : i32
    %c0_i32_1 = arith.constant 0 : i32
    return %arg0, %c0_i32, %c0_i32_0 : i32, i32, i32
  }
}

module attributes {stable_mosaic.version = 11 : i64} {
  func.func @kernel(%arg0: i32, %arg1: memref<128x4xf32, #tpu.memory_space<vmem>>, %arg2: memref<4x32xf32, #tpu.memory_space<vmem>>, %arg3: memref<1x32xf32, #tpu.memory_space<vmem>>, %arg4: memref<1x32xf32, #tpu.memory_space<vmem>>, %arg5: memref<128x32xf32, #tpu.memory_space<vmem>>) attributes {dimension_semantics = [#tpu.dimension_semantics<parallel>], iteration_bounds = array<i64: 1>, scalar_prefetch = 0 : i64, scratch_operands = 0 : i64, tpu.core_type = #tpu.core_type<tc>, window_params = [{transform_indices = @transform_0, window_bounds = array<i64: 128, 4>}, {pipeline_mode = #tpu.pipeline_mode<synchronous>, transform_indices = @transform_1, window_bounds = array<i64: 4, 32>}, {pipeline_mode = #tpu.pipeline_mode<synchronous>, transform_indices = @transform_2, window_bounds = array<i64: 1, 32>}, {pipeline_mode = #tpu.pipeline_mode<synchronous>, transform_indices = @transform_3, window_bounds = array<i64: 1, 32>}, {transform_indices = @transform_4, window_bounds = array<i64: 128, 32>}]} {
    %c0 = arith.constant 0 : index
    %c0_0 = arith.constant 0 : index
    %0 = vector.load %arg1[%c0, %c0_0] : memref<128x4xf32, #tpu.memory_space<vmem>>, vector<128x4xf32>
    %c0_1 = arith.constant 0 : index
    %c0_2 = arith.constant 0 : index
    %1 = vector.load %arg2[%c0_1, %c0_2] : memref<4x32xf32, #tpu.memory_space<vmem>>, vector<4x32xf32>
    %cst = arith.constant dense<0.000000e+00> : vector<128x32xf32>
    %2 = tpu.matmul %0, %1, %cst {dimension_numbers = #tpu.dot_dimension_numbers<[1], [0], [0], [1], [0, 0, 1, 1], [], []>} : vector<128x4xf32>, vector<4x32xf32>, vector<128x32xf32> -> vector<128x32xf32>
    %c0_3 = arith.constant 0 : index
    %c0_4 = arith.constant 0 : index
    %3 = vector.load %arg3[%c0_3, %c0_4] : memref<1x32xf32, #tpu.memory_space<vmem>>, vector<1x32xf32>
    %4 = vector.broadcast %3 : vector<1x32xf32> to vector<128x32xf32>
    %5 = arith.mulf %2, %4 : vector<128x32xf32>
    %c0_5 = arith.constant 0 : index
    %c0_6 = arith.constant 0 : index
    %6 = vector.load %arg4[%c0_5, %c0_6] : memref<1x32xf32, #tpu.memory_space<vmem>>, vector<1x32xf32>
    %7 = vector.broadcast %6 : vector<1x32xf32> to vector<128x32xf32>
    %8 = arith.addf %5, %7 : vector<128x32xf32>
    %c0_7 = arith.constant 0 : index
    %c0_8 = arith.constant 0 : index
    %9 = vector.load %arg5[%c0_7, %c0_8] : memref<128x32xf32, #tpu.memory_space<vmem>>, vector<128x32xf32>
    tpu.vector_store %arg5[%c0_7, %c0_8], %8 {strides = array<i32>} : memref<128x32xf32, #tpu.memory_space<vmem>>, vector<128x32xf32>,
    return
  }
  func.func @transform_0(%arg0: i32) -> (i32, i32) {
    %c0_i32 = arith.constant 0 : i32
    %c0_i32_0 = arith.constant 0 : i32
    return %arg0, %c0_i32 : i32, i32
  }
  func.func @transform_1(%arg0: i32) -> (i32, i32) {
    %c0_i32 = arith.constant 0 : i32
    %c0_i32_0 = arith.constant 0 : i32
    %c0_i32_1 = arith.constant 0 : i32
    return %c0_i32, %c0_i32_0 : i32, i32
  }
  func.func @transform_2(%arg0: i32) -> (i32, i32) {
    %c0_i32 = arith.constant 0 : i32
    %c0_i32_0 = arith.constant 0 : i32
    %c0_i32_1 = arith.constant 0 : i32
    return %c0_i32, %c0_i32_0 : i32, i32
  }
  func.func @transform_3(%arg0: i32) -> (i32, i32) {
    %c0_i32 = arith.constant 0 : i32
    %c0_i32_0 = arith.constant 0 : i32
    %c0_i32_1 = arith.constant 0 : i32
    return %c0_i32, %c0_i32_0 : i32, i32
  }
  func.func @transform_4(%arg0: i32) -> (i32, i32) {
    %c0_i32 = arith.constant 0 : i32
    %c0_i32_0 = arith.constant 0 : i32
    return %arg0, %c0_i32 : i32, i32
  }
}

module attributes {stable_mosaic.version = 11 : i64} {
  func.func @_s2d_tail_kernel(%arg0: i32, %arg1: memref<1x8x2x8x16xf32, #tpu.memory_space<vmem>>, %arg2: memref<2x16xf32, #tpu.memory_space<vmem>>, %arg3: memref<2x16xf32, #tpu.memory_space<vmem>>, %arg4: memref<2x16x32xf32, #tpu.memory_space<vmem>>, %arg5: memref<1x32xf32, #tpu.memory_space<vmem>>, %arg6: memref<1x32xf32, #tpu.memory_space<vmem>>, %arg7: memref<1x64x32xf32, #tpu.memory_space<vmem>>, %arg8: memref<1x64x32xf32, #tpu.memory_space<vmem>>) attributes {dimension_semantics = [#tpu.dimension_semantics<parallel>], iteration_bounds = array<i64: 2>, scalar_prefetch = 0 : i64, scratch_operands = 0 : i64, tpu.core_type = #tpu.core_type<tc>, window_params = [{transform_indices = @transform_0, window_bounds = array<i64: 1, 8, 2, 8, 16>}, {pipeline_mode = #tpu.pipeline_mode<synchronous>, transform_indices = @transform_1, window_bounds = array<i64: 2, 16>}, {pipeline_mode = #tpu.pipeline_mode<synchronous>, transform_indices = @transform_2, window_bounds = array<i64: 2, 16>}, {pipeline_mode = #tpu.pipeline_mode<synchronous>, transform_indices = @transform_3, window_bounds = array<i64: 2, 16, 32>}, {pipeline_mode = #tpu.pipeline_mode<synchronous>, transform_indices = @transform_4, window_bounds = array<i64: 1, 32>}, {pipeline_mode = #tpu.pipeline_mode<synchronous>, transform_indices = @transform_5, window_bounds = array<i64: 1, 32>}, {transform_indices = @transform_6, window_bounds = array<i64: 1, 64, 32>}, {transform_indices = @transform_7, window_bounds = array<i64: 1, 64, 32>}]} {
    %cst = arith.constant 0.000000e+00 : f32
    %0 = vector.broadcast %cst : f32 to vector<64x32xf32>
    %c0 = arith.constant 0 : index
    %c0_0 = arith.constant 0 : index
    %c0_1 = arith.constant 0 : index
    %c0_2 = arith.constant 0 : index
    %c0_3 = arith.constant 0 : index
    %1 = vector.load %arg1[%c0, %c0_0, %c0_1, %c0_2, %c0_3] : memref<1x8x2x8x16xf32, #tpu.memory_space<vmem>>, vector<1x8x1x8x16xf32>
    %2 = vector.shape_cast %1 : vector<1x8x1x8x16xf32> to vector<8x8x16xf32>
    %3 = vector.shape_cast %2 : vector<8x8x16xf32> to vector<64x16xf32>
    %c0_4 = arith.constant 0 : index
    %c0_5 = arith.constant 0 : index
    %4 = vector.load %arg2[%c0_4, %c0_5] : memref<2x16xf32, #tpu.memory_space<vmem>>, vector<1x16xf32>
    %5 = vector.broadcast %4 : vector<1x16xf32> to vector<64x16xf32>
    %6 = arith.mulf %3, %5 : vector<64x16xf32>
    %c0_6 = arith.constant 0 : index
    %c0_7 = arith.constant 0 : index
    %7 = vector.load %arg3[%c0_6, %c0_7] : memref<2x16xf32, #tpu.memory_space<vmem>>, vector<1x16xf32>
    %8 = vector.broadcast %7 : vector<1x16xf32> to vector<64x16xf32>
    %9 = arith.addf %6, %8 : vector<64x16xf32>
    %cst_8 = arith.constant 0.000000e+00 : f32
    %10 = vector.broadcast %cst_8 : f32 to vector<64x16xf32>
    %11 = arith.maximumf %9, %10 : vector<64x16xf32>
    %c0_9 = arith.constant 0 : index
    %c0_10 = arith.constant 0 : index
    %c0_11 = arith.constant 0 : index
    %12 = vector.load %arg4[%c0_9, %c0_10, %c0_11] : memref<2x16x32xf32, #tpu.memory_space<vmem>>, vector<1x16x32xf32>
    %13 = vector.shape_cast %12 : vector<1x16x32xf32> to vector<16x32xf32>
    %cst_12 = arith.constant dense<0.000000e+00> : vector<64x32xf32>
    %14 = tpu.matmul %11, %13, %cst_12 {dimension_numbers = #tpu.dot_dimension_numbers<[1], [0], [0], [1], [0, 0, 1, 1], [], []>} : vector<64x16xf32>, vector<16x32xf32>, vector<64x32xf32> -> vector<64x32xf32>
    %15 = arith.addf %0, %14 : vector<64x32xf32>
    %c0_13 = arith.constant 0 : index
    %c0_14 = arith.constant 0 : index
    %c1 = arith.constant 1 : index
    %c0_15 = arith.constant 0 : index
    %c0_16 = arith.constant 0 : index
    %16 = vector.load %arg1[%c0_13, %c0_14, %c1, %c0_15, %c0_16] : memref<1x8x2x8x16xf32, #tpu.memory_space<vmem>>, vector<1x8x1x8x16xf32>
    %17 = vector.shape_cast %16 : vector<1x8x1x8x16xf32> to vector<8x8x16xf32>
    %18 = vector.shape_cast %17 : vector<8x8x16xf32> to vector<64x16xf32>
    %c1_17 = arith.constant 1 : index
    %c0_18 = arith.constant 0 : index
    %19 = vector.load %arg2[%c1_17, %c0_18] : memref<2x16xf32, #tpu.memory_space<vmem>>, vector<1x16xf32>
    %20 = vector.broadcast %19 : vector<1x16xf32> to vector<64x16xf32>
    %21 = arith.mulf %18, %20 : vector<64x16xf32>
    %c1_19 = arith.constant 1 : index
    %c0_20 = arith.constant 0 : index
    %22 = vector.load %arg3[%c1_19, %c0_20] : memref<2x16xf32, #tpu.memory_space<vmem>>, vector<1x16xf32>
    %23 = vector.broadcast %22 : vector<1x16xf32> to vector<64x16xf32>
    %24 = arith.addf %21, %23 : vector<64x16xf32>
    %cst_21 = arith.constant 0.000000e+00 : f32
    %25 = vector.broadcast %cst_21 : f32 to vector<64x16xf32>
    %26 = arith.maximumf %24, %25 : vector<64x16xf32>
    %c1_22 = arith.constant 1 : index
    %c0_23 = arith.constant 0 : index
    %c0_24 = arith.constant 0 : index
    %27 = vector.load %arg4[%c1_22, %c0_23, %c0_24] : memref<2x16x32xf32, #tpu.memory_space<vmem>>, vector<1x16x32xf32>
    %28 = vector.shape_cast %27 : vector<1x16x32xf32> to vector<16x32xf32>
    %cst_25 = arith.constant dense<0.000000e+00> : vector<64x32xf32>
    %29 = tpu.matmul %26, %28, %cst_25 {dimension_numbers = #tpu.dot_dimension_numbers<[1], [0], [0], [1], [0, 0, 1, 1], [], []>} : vector<64x16xf32>, vector<16x32xf32>, vector<64x32xf32> -> vector<64x32xf32>
    %30 = arith.addf %15, %29 : vector<64x32xf32>
    %c0_26 = arith.constant 0 : index
    %c0_27 = arith.constant 0 : index
    %31 = vector.load %arg5[%c0_26, %c0_27] : memref<1x32xf32, #tpu.memory_space<vmem>>, vector<1x32xf32>
    %32 = vector.broadcast %31 : vector<1x32xf32> to vector<64x32xf32>
    %33 = arith.mulf %30, %32 : vector<64x32xf32>
    %c0_28 = arith.constant 0 : index
    %c0_29 = arith.constant 0 : index
    %34 = vector.load %arg6[%c0_28, %c0_29] : memref<1x32xf32, #tpu.memory_space<vmem>>, vector<1x32xf32>
    %35 = vector.broadcast %34 : vector<1x32xf32> to vector<64x32xf32>
    %36 = arith.addf %33, %35 : vector<64x32xf32>
    %c0_30 = arith.constant 0 : index
    %c0_31 = arith.constant 0 : index
    %c0_32 = arith.constant 0 : index
    %37 = vector.load %arg7[%c0_30, %c0_31, %c0_32] : memref<1x64x32xf32, #tpu.memory_space<vmem>>, vector<1x64x32xf32>
    %38 = vector.shape_cast %37 : vector<1x64x32xf32> to vector<64x32xf32>
    %39 = arith.addf %36, %38 : vector<64x32xf32>
    %cst_33 = arith.constant 0.000000e+00 : f32
    %40 = vector.broadcast %cst_33 : f32 to vector<64x32xf32>
    %41 = arith.maximumf %39, %40 : vector<64x32xf32>
    %c0_34 = arith.constant 0 : index
    %c0_35 = arith.constant 0 : index
    %c0_36 = arith.constant 0 : index
    %42 = vector.load %arg8[%c0_34, %c0_35, %c0_36] : memref<1x64x32xf32, #tpu.memory_space<vmem>>, vector<1x64x32xf32>
    %43 = vector.shape_cast %42 : vector<1x64x32xf32> to vector<64x32xf32>
    %44 = vector.shape_cast %41 : vector<64x32xf32> to vector<1x64x32xf32>
    tpu.vector_store %arg8[%c0_34, %c0_35, %c0_36], %44 {strides = array<i32>} : memref<1x64x32xf32, #tpu.memory_space<vmem>>, vector<1x64x32xf32>,
    return
  }
  func.func @transform_0(%arg0: i32) -> (i32, i32, i32, i32, i32) {
    %c0_i32 = arith.constant 0 : i32
    %c0_i32_0 = arith.constant 0 : i32
    %c0_i32_1 = arith.constant 0 : i32
    %c0_i32_2 = arith.constant 0 : i32
    %c0_i32_3 = arith.constant 0 : i32
    return %arg0, %c0_i32, %c0_i32_0, %c0_i32_1, %c0_i32_2 : i32, i32, i32, i32, i32
  }
  func.func @transform_1(%arg0: i32) -> (i32, i32) {
    %c0_i32 = arith.constant 0 : i32
    %c0_i32_0 = arith.constant 0 : i32
    %c0_i32_1 = arith.constant 0 : i32
    return %c0_i32, %c0_i32_0 : i32, i32
  }
  func.func @transform_2(%arg0: i32) -> (i32, i32) {
    %c0_i32 = arith.constant 0 : i32
    %c0_i32_0 = arith.constant 0 : i32
    %c0_i32_1 = arith.constant 0 : i32
    return %c0_i32, %c0_i32_0 : i32, i32
  }
  func.func @transform_3(%arg0: i32) -> (i32, i32, i32) {
    %c0_i32 = arith.constant 0 : i32
    %c0_i32_0 = arith.constant 0 : i32
    %c0_i32_1 = arith.constant 0 : i32
    %c0_i32_2 = arith.constant 0 : i32
    return %c0_i32, %c0_i32_0, %c0_i32_1 : i32, i32, i32
  }
  func.func @transform_4(%arg0: i32) -> (i32, i32) {
    %c0_i32 = arith.constant 0 : i32
    %c0_i32_0 = arith.constant 0 : i32
    %c0_i32_1 = arith.constant 0 : i32
    return %c0_i32, %c0_i32_0 : i32, i32
  }
  func.func @transform_5(%arg0: i32) -> (i32, i32) {
    %c0_i32 = arith.constant 0 : i32
    %c0_i32_0 = arith.constant 0 : i32
    %c0_i32_1 = arith.constant 0 : i32
    return %c0_i32, %c0_i32_0 : i32, i32
  }
  func.func @transform_6(%arg0: i32) -> (i32, i32, i32) {
    %c0_i32 = arith.constant 0 : i32
    %c0_i32_0 = arith.constant 0 : i32
    %c0_i32_1 = arith.constant 0 : i32
    return %arg0, %c0_i32, %c0_i32_0 : i32, i32, i32
  }
  func.func @transform_7(%arg0: i32) -> (i32, i32, i32) {
    %c0_i32 = arith.constant 0 : i32
    %c0_i32_0 = arith.constant 0 : i32
    %c0_i32_1 = arith.constant 0 : i32
    return %arg0, %c0_i32, %c0_i32_0 : i32, i32, i32
  }
}

</mosaic_0001>

<bundles_post_ra>
// kernel: bottleneck_forward.4
= control target key start
LH: loop header
LB: loop body
LE: loop exit
PB: predicated region body
PF: predicated region fallthrough
CT: control target
= control target key end

     0   :  { %s731_s15 = smov 0   ;;  %s964_s0 = inlined_call_operand.vmem [shape: f32[512,4], index: 0, kind: input, shape index: {}]   ;;  %s965_s1 = inlined_call_operand.vmem [shape: f32[4,8], index: 1, kind: input, shape index: {}]   ;;  %s966_s2 = inlined_call_operand.vmem [shape: f32[1,8], index: 2, kind: input, shape index: {}]   ;;  %s967_s3 = inlined_call_operand.vmem [shape: f32[1,8], index: 3, kind: input, shape index: {}]   ;;  %s968_s4 = inlined_call_operand.vmem [shape: f32[512,8], index: 4, kind: output, shape index: {}]  }
   0x1 LB: > { %s641_s16 = sadd.s32 4294967295, %s704_s15   ;;  %p645_p0 = scmp.ge.s32.totalorder %s704_s15, 1  ;;  %s704_s15 = sphi %s731_s15, %s14_s15  }
   0x2   : > { %p163_p1 = scmp.lt.s32.totalorder %s704_s15, 3 }
   0x4   : > { %p164_p2 = pnand %p645_p0, %p163_p1 }
   0x5   : > { %s646_s19 = sshll.u32 (!%p164_p2), %s641_s16, 5 }
   0x6   : > { %167 = sbr.rel (%p164_p2) target bundleno = 211 (0xd3), region = 36  ;;  %p190_p3 = scmp.lt.s32.totalorder (!%p164_p2), %s646_s19, 63 }
   0xb   : > { %v233_v0 = vld [vmem:[%s965_s1] sm:$0xf]  ;;  %vm331_vm0 = vcmask 1043456   ;;  %s970_s19 = smov (!%p190_p3, %s646_s19), 63  ;;  %vm234_vm1 = vcmask 31744   ;;  %vm552_vm2 = vcmask 64512  }
   0xc   : > { %686 = vmatpush.msk.msra.mxu2 %vm331_vm0, %v233_v0  ;;  %687 = vmatpush.msk.msra.mxu3 %vm331_vm0, %v233_v0  ;;  %s647_s20 = sshll.u32 %s970_s19, 3  ;;  %v819_v33 = vld [vmem:[%s966_s2] ss:$0 sm:$0xff] }
   0xd   : > { %650 = vmatpush.msk.msra.mxu0 %vm331_vm0, %v233_v0  ;;  %685 = vmatpush.msk.msra.mxu1 %vm331_vm0, %v233_v0  ;;  %s750_s23 = scalar_lea.vmem %s964_s0, %s647_s20  ;;  %v824_v34 = vld [vmem:[%s967_s3] ss:$0 sm:$0xff]  ;;  %s835_s30 = scalar_lea.vmem %s968_s4, %s647_s20 }
   0xe   : > { %v217_v1 = vld [vmem:[%s750_s23 + $0x80] sm:$0xff]  ;;  %v218_v5 = vld [vmem:[%s750_s23 + $0x88] sm:$0xff]  ;;  %v219_v9 = vld [vmem:[%s750_s23 + $0x90] sm:$0xff] }
   0xf   : > { %v225_v2 = vld [vmem:[%s750_s23 + $0xc0] sm:$0xff]  ;;  %667 = vmatmul.msk.f32.vlgmr.msra.gmra.mxu2 %vm234_vm1, %v217_v1  ;;  %v226_v6 = vld [vmem:[%s750_s23 + $0xc8] sm:$0xff]  ;;  %v227_v10 = vld [vmem:[%s750_s23 + $0xd0] sm:$0xff] }
  0x10   : > { %v201_v3 = vld [vmem:[%s750_s23] sm:$0xff]  ;;  %675 = vmatmul.msk.f32.vlgmr.msra.gmra.mxu3 %vm234_vm1, %v225_v2  ;;  %v202_v7 = vld [vmem:[%s750_s23 + $0x8] sm:$0xff]  ;;  %v203_v11 = vld [vmem:[%s750_s23 + $0x10] sm:$0xff] }
  0x11   : > { %v209_v4 = vld [vmem:[%s750_s23 + $0x40] sm:$0xff]  ;;  %651 = vmatmul.msk.f32.vlgmr.msra.gmra.mxu0 %vm234_vm1, %v201_v3  ;;  %v210_v8 = vld [vmem:[%s750_s23 + $0x48] sm:$0xff]  ;;  %v211_v12 = vld [vmem:[%s750_s23 + $0x50] sm:$0xff] }
  0x12   : > { %659 = vmatmul.msk.f32.vlgmr.msra.gmra.mxu1 %vm234_vm1, %v209_v4  ;;  %v220_v13 = vld [vmem:[%s750_s23 + $0x98] sm:$0xff]  ;;  %v221_v17 = vld [vmem:[%s750_s23 + $0xa0] sm:$0xff]  ;;  %v222_v21 = vld [vmem:[%s750_s23 + $0xa8] sm:$0xff] }
  0x13   : > { %v228_v14 = vld [vmem:[%s750_s23 + $0xd8] sm:$0xff]  ;;  %v229_v18 = vld [vmem:[%s750_s23 + $0xe0] sm:$0xff]  ;;  %v230_v22 = vld [vmem:[%s750_s23 + $0xe8] sm:$0xff] }
  0x14   : > { %v204_v15 = vld [vmem:[%s750_s23 + $0x18] sm:$0xff]  ;;  %v205_v19 = vld [vmem:[%s750_s23 + $0x20] sm:$0xff]  ;;  %v206_v23 = vld [vmem:[%s750_s23 + $0x28] sm:$0xff] }
  0x15   : > { %v212_v16 = vld [vmem:[%s750_s23 + $0x58] sm:$0xff]  ;;  %v213_v20 = vld [vmem:[%s750_s23 + $0x60] sm:$0xff]  ;;  %v214_v24 = vld [vmem:[%s750_s23 + $0x68] sm:$0xff] }
  0x16   : > { %v223_v25 = vld [vmem:[%s750_s23 + $0xb0] sm:$0xff]  ;;  %v224_v29 = vld [vmem:[%s750_s23 + $0xb8] sm:$0xff] }
  0x17   : > { %668 = vmatmul.msk.f32.gmra.mxu2 %vm234_vm1, %v218_v5  ;;  %v231_v26 = vld [vmem:[%s750_s23 + $0xf0] sm:$0xff]  ;;  %v232_v30 = vld [vmem:[%s750_s23 + $0xf8] sm:$0xff] }
  0x18   : > { %676 = vmatmul.msk.f32.gmra.mxu3 %vm234_vm1, %v226_v6  ;;  %v207_v27 = vld [vmem:[%s750_s23 + $0x30] sm:$0xff]  ;;  %v208_v31 = vld [vmem:[%s750_s23 + $0x38] sm:$0xff] }
  0x19   : > { %652 = vmatmul.msk.f32.gmra.mxu0 %vm234_vm1, %v202_v7  ;;  %v215_v28 = vld [vmem:[%s750_s23 + $0x70] sm:$0xff]  ;;  %v216_v32 = vld [vmem:[%s750_s23 + $0x78] sm:$0xff] }
  0x1a   : > { %660 = vmatmul.msk.f32.gmra.mxu1 %vm234_vm1, %v210_v8 }
  0x1f   : > { %669 = vmatmul.msk.f32.gmra.mxu2 %vm234_vm1, %v219_v9 }
  0x20   : > { %677 = vmatmul.msk.f32.gmra.mxu3 %vm234_vm1, %v227_v10 }
  0x21   : > { %653 = vmatmul.msk.f32.gmra.mxu0 %vm234_vm1, %v203_v11 }
  0x22   : > { %661 = vmatmul.msk.f32.gmra.mxu1 %vm234_vm1, %v211_v12 }
  0x27   : > { %670 = vmatmul.msk.f32.gmra.mxu2 %vm234_vm1, %v220_v13 }
  0x28   : > { %678 = vmatmul.msk.f32.gmra.mxu3 %vm234_vm1, %v228_v14 }
  0x29   : > { %654 = vmatmul.msk.f32.gmra.mxu0 %vm234_vm1, %v204_v15 }
  0x2a   : > { %662 = vmatmul.msk.f32.gmra.mxu1 %vm234_vm1, %v212_v16 }
  0x2f   : > { %671 = vmatmul.msk.f32.gmra.mxu2 %vm234_vm1, %v221_v17 }
  0x30   : > { %679 = vmatmul.msk.f32.gmra.mxu3 %vm234_vm1, %v229_v18 }
  0x31   : > { %655 = vmatmul.msk.f32.gmra.mxu0 %vm234_vm1, %v205_v19 }
  0x32   : > { %663 = vmatmul.msk.f32.gmra.mxu1 %vm234_vm1, %v213_v20 }
  0x37   : > { %672 = vmatmul.msk.f32.gmra.mxu2 %vm234_vm1, %v222_v21 }
  0x38   : > { %680 = vmatmul.msk.f32.gmra.mxu3 %vm234_vm1, %v230_v22 }
  0x39   : > { %656 = vmatmul.msk.f32.gmra.mxu0 %vm234_vm1, %v206_v23 }
  0x3a   : > { %664 = vmatmul.msk.f32.gmra.mxu1 %vm234_vm1, %v214_v24 }
  0x3f   : > { %673 = vmatmul.msk.f32.gmra.mxu2 %vm234_vm1, %v223_v25 }
  0x40   : > { %681 = vmatmul.msk.f32.gmra.mxu3 %vm234_vm1, %v231_v26 }
  0x41   : > { %657 = vmatmul.msk.f32.gmra.mxu0 %vm234_vm1, %v207_v27 }
  0x42   : > { %665 = vmatmul.msk.f32.gmra.mxu1 %vm234_vm1, %v215_v28 }
  0x47   : > { %674 = vmatmul.msk.f32.gmra.mxu2 %vm234_vm1, %v224_v29 }
  0x48   : > { %682 = vmatmul.msk.f32.gmra.mxu3 %vm234_vm1, %v232_v30 }
  0x49   : > { %658 = vmatmul.msk.f32.gmra.mxu0 %vm234_vm1, %v208_v31 }
  0x4a   : > { %666 = vmatmul.msk.f32.gmra.mxu1 %vm234_vm1, %v216_v32 }
  0x8e   : > { %v352_v35 = vpop.f32.mrf.mxu0 }
  0x8f   : > { %v376_v36 = vpop.f32.mrf.mxu1  ;;  %v452_v37 = vmul.f32 %v819_v33, %v352_v35 }
  0x90   : > { %v460_v38 = vmul.f32 %v819_v33, %v376_v36 }
  0x91   : > { %v488_v39 = vadd.f32 %v824_v34, %v452_v37 }
  0x92   : > { %v496_v40 = vadd.f32 %v824_v34, %v460_v38  ;;  %v400_v43 = vpop.f32.mrf.mxu2 }
  0x93   : > { %v520_v41 = vmax.f32 %v488_v39, 0.0  ;;  %v424_v44 = vpop.f32.mrf.mxu3  ;;  %v468_v45 = vmul.f32 %v819_v33, %v400_v43 }
  0x94   : > { %v528_v42 = vmax.f32 %v496_v40, 0.0  ;;  %v476_v46 = vmul.f32 %v819_v33, %v424_v44 }
  0x95   : > { %553 = vst.msk [vmem:[%s835_s30] sm:$0xff] %vm552_vm2, %v520_v41  ;;  %v504_v47 = vadd.f32 %v824_v34, %v468_v45 }
  0x96   : > { %561 = vst.msk [vmem:[%s835_s30 + $0x40] sm:$0xff] %vm552_vm2, %v528_v42  ;;  %v512_v48 = vadd.f32 %v824_v34, %v476_v46  ;;  %v355_v49 = vpop.f32.mrf.mxu0 }
  0x97   : > { %v379_v50 = vpop.f32.mrf.mxu1  ;;  %v453_v51 = vmul.f32 %v819_v33, %v355_v49  ;;  %v536_v53 = vmax.f32 %v504_v47, 0.0 }
  0x98   : > { %v461_v52 = vmul.f32 %v819_v33, %v379_v50  ;;  %v544_v54 = vmax.f32 %v512_v48, 0.0 }
  0x99   : > { %v489_v55 = vadd.f32 %v824_v34, %v453_v51  ;;  %569 = vst.msk [vmem:[%s835_s30 + $0x80] sm:$0xff] %vm552_vm2, %v536_v53 }
  0x9a   : > { %v497_v56 = vadd.f32 %v824_v34, %v461_v52  ;;  %577 = vst.msk [vmem:[%s835_s30 + $0xc0] sm:$0xff] %vm552_vm2, %v544_v54  ;;  %v403_v59 = vpop.f32.mrf.mxu2 }
  0x9b   : > { %v521_v57 = vmax.f32 %v489_v55, 0.0  ;;  %v427_v60 = vpop.f32.mrf.mxu3  ;;  %v469_v61 = vmul.f32 %v819_v33, %v403_v59 }
  0x9c   : > { %v529_v58 = vmax.f32 %v497_v56, 0.0  ;;  %v477_v62 = vmul.f32 %v819_v33, %v427_v60 }
  0x9d   : > { %554 = vst.msk [vmem:[%s835_s30 + $0x8] sm:$0xff] %vm552_vm2, %v521_v57  ;;  %v505_v63 = vadd.f32 %v824_v34, %v469_v61 }
  0x9e   : > { %562 = vst.msk [vmem:[%s835_s30 + $0x48] sm:$0xff] %vm552_vm2, %v529_v58  ;;  %v513_v0 = vadd.f32 %v824_v34, %v477_v62  ;;  %v358_v1 = vpop.f32.mrf.mxu0 }
  0x9f   : > { %v382_v2 = vpop.f32.mrf.mxu1  ;;  %v454_v3 = vmul.f32 %v819_v33, %v358_v1  ;;  %v537_v5 = vmax.f32 %v505_v63, 0.0 }
  0xa0   : > { %v462_v4 = vmul.f32 %v819_v33, %v382_v2  ;;  %v545_v6 = vmax.f32 %v513_v0, 0.0 }
  0xa1   : > { %v490_v7 = vadd.f32 %v824_v34, %v454_v3  ;;  %570 = vst.msk [vmem:[%s835_s30 + $0x88] sm:$0xff] %vm552_vm2, %v537_v5 }
  0xa2   : > { %v498_v8 = vadd.f32 %v824_v34, %v462_v4  ;;  %578 = vst.msk [vmem:[%s835_s30 + $0xc8] sm:$0xff] %vm552_vm2, %v545_v6  ;;  %v406_v11 = vpop.f32.mrf.mxu2 }
  0xa3   : > { %v522_v9 = vmax.f32 %v490_v7, 0.0  ;;  %v430_v12 = vpop.f32.mrf.mxu3  ;;  %v470_v13 = vmul.f32 %v819_v33, %v406_v11 }
  0xa4   : > { %v530_v10 = vmax.f32 %v498_v8, 0.0  ;;  %v478_v14 = vmul.f32 %v819_v33, %v430_v12 }
  0xa5   : > { %555 = vst.msk [vmem:[%s835_s30 + $0x10] sm:$0xff] %vm552_vm2, %v522_v9  ;;  %v506_v15 = vadd.f32 %v824_v34, %v470_v13 }
  0xa6   : > { %563 = vst.msk [vmem:[%s835_s30 + $0x50] sm:$0xff] %vm552_vm2, %v530_v10  ;;  %v514_v16 = vadd.f32 %v824_v34, %v478_v14  ;;  %v361_v17 = vpop.f32.mrf.mxu0 }
  0xa7   : > { %v385_v18 = vpop.f32.mrf.mxu1  ;;  %v455_v19 = vmul.f32 %v819_v33, %v361_v17  ;;  %v538_v21 = vmax.f32 %v506_v15, 0.0 }
  0xa8   : > { %v463_v20 = vmul.f32 %v819_v33, %v385_v18  ;;  %v546_v22 = vmax.f32 %v514_v16, 0.0 }
  0xa9   : > { %v491_v23 = vadd.f32 %v824_v34, %v455_v19  ;;  %571 = vst.msk [vmem:[%s835_s30 + $0x90] sm:$0xff] %vm552_vm2, %v538_v21 }
  0xaa   : > { %v499_v24 = vadd.f32 %v824_v34, %v463_v20  ;;  %579 = vst.msk [vmem:[%s835_s30 + $0xd0] sm:$0xff] %vm552_vm2, %v546_v22  ;;  %v409_v27 = vpop.f32.mrf.mxu2 }
  0xab   : > { %v523_v25 = vmax.f32 %v491_v23, 0.0  ;;  %v433_v28 = vpop.f32.mrf.mxu3  ;;  %v471_v29 = vmul.f32 %v819_v33, %v409_v27 }
  0xac   : > { %v531_v26 = vmax.f32 %v499_v24, 0.0  ;;  %v479_v30 = vmul.f32 %v819_v33, %v433_v28 }
  0xad   : > { %556 = vst.msk [vmem:[%s835_s30 + $0x18] sm:$0xff] %vm552_vm2, %v523_v25  ;;  %v507_v31 = vadd.f32 %v824_v34, %v471_v29 }
  0xae   : > { %564 = vst.msk [vmem:[%s835_s30 + $0x58] sm:$0xff] %vm552_vm2, %v531_v26  ;;  %v515_v32 = vadd.f32 %v824_v34, %v479_v30  ;;  %v364_v35 = vpop.f32.mrf.mxu0 }
  0xaf   : > { %v388_v36 = vpop.f32.mrf.mxu1  ;;  %v456_v37 = vmul.f32 %v819_v33, %v364_v35  ;;  %v539_v39 = vmax.f32 %v507_v31, 0.0 }
  0xb0   : > { %v464_v38 = vmul.f32 %v819_v33, %v388_v36  ;;  %v547_v40 = vmax.f32 %v515_v32, 0.0 }
  0xb1   : > { %v492_v41 = vadd.f32 %v824_v34, %v456_v37  ;;  %572 = vst.msk [vmem:[%s835_s30 + $0x98] sm:$0xff] %vm552_vm2, %v539_v39 }
  0xb2   : > { %v500_v42 = vadd.f32 %v824_v34, %v464_v38  ;;  %580 = vst.msk [vmem:[%s835_s30 + $0xd8] sm:$0xff] %vm552_vm2, %v547_v40  ;;  %v412_v45 = vpop.f32.mrf.mxu2 }
  0xb3   : > { %v524_v43 = vmax.f32 %v492_v41, 0.0  ;;  %v436_v46 = vpop.f32.mrf.mxu3  ;;  %v472_v47 = vmul.f32 %v819_v33, %v412_v45 }
  0xb4   : > { %v532_v44 = vmax.f32 %v500_v42, 0.0  ;;  %v480_v48 = vmul.f32 %v819_v33, %v436_v46 }
  0xb5   : > { %557 = vst.msk [vmem:[%s835_s30 + $0x20] sm:$0xff] %vm552_vm2, %v524_v43  ;;  %v508_v49 = vadd.f32 %v824_v34, %v472_v47 }
  0xb6   : > { %565 = vst.msk [vmem:[%s835_s30 + $0x60] sm:$0xff] %vm552_vm2, %v532_v44  ;;  %v516_v50 = vadd.f32 %v824_v34, %v480_v48  ;;  %v367_v51 = vpop.f32.mrf.mxu0 }
  0xb7   : > { %v391_v52 = vpop.f32.mrf.mxu1  ;;  %v457_v53 = vmul.f32 %v819_v33, %v367_v51  ;;  %v540_v55 = vmax.f32 %v508_v49, 0.0 }
  0xb8   : > { %v465_v54 = vmul.f32 %v819_v33, %v391_v52  ;;  %v548_v56 = vmax.f32 %v516_v50, 0.0 }
  0xb9   : > { %v493_v57 = vadd.f32 %v824_v34, %v457_v53  ;;  %573 = vst.msk [vmem:[%s835_s30 + $0xa0] sm:$0xff] %vm552_vm2, %v540_v55 }
  0xba   : > { %v501_v58 = vadd.f32 %v824_v34, %v465_v54  ;;  %581 = vst.msk [vmem:[%s835_s30 + $0xe0] sm:$0xff] %vm552_vm2, %v548_v56  ;;  %v415_v61 = vpop.f32.mrf.mxu2 }
  0xbb   : > { %v525_v59 = vmax.f32 %v493_v57, 0.0  ;;  %v439_v62 = vpop.f32.mrf.mxu3  ;;  %v473_v63 = vmul.f32 %v819_v33, %v415_v61 }
  0xbc   : > { %v533_v60 = vmax.f32 %v501_v58, 0.0  ;;  %v481_v0 = vmul.f32 %v819_v33, %v439_v62 }
  0xbd   : > { %558 = vst.msk [vmem:[%s835_s30 + $0x28] sm:$0xff] %vm552_vm2, %v525_v59  ;;  %v509_v1 = vadd.f32 %v824_v34, %v473_v63 }
  0xbe   : > { %566 = vst.msk [vmem:[%s835_s30 + $0x68] sm:$0xff] %vm552_vm2, %v533_v60  ;;  %v517_v2 = vadd.f32 %v824_v34, %v481_v0  ;;  %v370_v3 = vpop.f32.mrf.mxu0 }
  0xbf   : > { %v394_v4 = vpop.f32.mrf.mxu1  ;;  %v458_v5 = vmul.f32 %v819_v33, %v370_v3  ;;  %v541_v7 = vmax.f32 %v509_v1, 0.0 }
  0xc0   : > { %v466_v6 = vmul.f32 %v819_v33, %v394_v4  ;;  %v549_v8 = vmax.f32 %v517_v2, 0.0 }
  0xc1   : > { %v494_v9 = vadd.f32 %v824_v34, %v458_v5  ;;  %574 = vst.msk [vmem:[%s835_s30 + $0xa8] sm:$0xff] %vm552_vm2, %v541_v7 }
  0xc2   : > { %v502_v10 = vadd.f32 %v824_v34, %v466_v6  ;;  %582 = vst.msk [vmem:[%s835_s30 + $0xe8] sm:$0xff] %vm552_vm2, %v549_v8  ;;  %v418_v13 = vpop.f32.mrf.mxu2 }
  0xc3   : > { %v526_v11 = vmax.f32 %v494_v9, 0.0  ;;  %v442_v14 = vpop.f32.mrf.mxu3  ;;  %v474_v15 = vmul.f32 %v819_v33, %v418_v13 }
  0xc4   : > { %v534_v12 = vmax.f32 %v502_v10, 0.0  ;;  %v482_v16 = vmul.f32 %v819_v33, %v442_v14 }
  0xc5   : > { %559 = vst.msk [vmem:[%s835_s30 + $0x30] sm:$0xff] %vm552_vm2, %v526_v11  ;;  %v510_v17 = vadd.f32 %v824_v34, %v474_v15 }
  0xc6   : > { %567 = vst.msk [vmem:[%s835_s30 + $0x70] sm:$0xff] %vm552_vm2, %v534_v12  ;;  %v518_v18 = vadd.f32 %v824_v34, %v482_v16  ;;  %v373_v19 = vpop.f32.mrf.mxu0 }
  0xc7   : > { %v397_v20 = vpop.f32.mrf.mxu1  ;;  %v459_v21 = vmul.f32 %v819_v33, %v373_v19  ;;  %v542_v23 = vmax.f32 %v510_v17, 0.0 }
  0xc8   : > { %v467_v22 = vmul.f32 %v819_v33, %v397_v20  ;;  %v550_v24 = vmax.f32 %v518_v18, 0.0 }
  0xc9   : > { %v495_v25 = vadd.f32 %v824_v34, %v459_v21  ;;  %575 = vst.msk [vmem:[%s835_s30 + $0xb0] sm:$0xff] %vm552_vm2, %v542_v23 }
  0xca   : > { %v503_v26 = vadd.f32 %v824_v34, %v467_v22  ;;  %583 = vst.msk [vmem:[%s835_s30 + $0xf0] sm:$0xff] %vm552_vm2, %v550_v24  ;;  %v421_v29 = vpop.f32.mrf.mxu2 }
  0xcb   : > { %v527_v27 = vmax.f32 %v495_v25, 0.0  ;;  %v445_v30 = vpop.f32.mrf.mxu3  ;;  %v475_v31 = vmul.f32 %v819_v33, %v421_v29 }
  0xcc   : > { %v535_v28 = vmax.f32 %v503_v26, 0.0  ;;  %v483_v32 = vmul.f32 %v819_v33, %v445_v30 }
  0xcd   : > { %560 = vst.msk [vmem:[%s835_s30 + $0x38] sm:$0xff] %vm552_vm2, %v527_v27  ;;  %v511_v35 = vadd.f32 %v824_v34, %v475_v31 }
  0xce   : > { %568 = vst.msk [vmem:[%s835_s30 + $0x78] sm:$0xff] %vm552_vm2, %v535_v28  ;;  %v519_v36 = vadd.f32 %v824_v34, %v483_v32 }
  0xcf   : > { %v543_v37 = vmax.f32 %v511_v35, 0.0 }
  0xd0   : > { %v551_v38 = vmax.f32 %v519_v36, 0.0 }
  0xd1   : > { %576 = vst.msk [vmem:[%s835_s30 + $0xb8] sm:$0xff] %vm552_vm2, %v543_v37 }
  0xd2   : > { %584 = vst.msk [vmem:[%s835_s30 + $0xf8] sm:$0xff] %vm552_vm2, %v551_v38 }
  0xd3 PF: > { %s14_s15 = sadd.s32 1, %s704_s15  }
  0xd4   : > { %p11_p4 = scmp.ge.s32.totalorder %s14_s15, 4  }
  0xd6   :  { %13 = sbr.rel (!%p11_p4) target bundleno = 1 (0x1), region = 66 }

// kernel: bottleneck_forward.5
= control target key start
LH: loop header
LB: loop body
LE: loop exit
PB: predicated region body
PF: predicated region fallthrough
CT: control target
= control target key end

     0   :  { %s2362_s9 = smov 0   ;;  %s3686_s0 = inlined_call_operand.vmem [shape: f32[2,18,18,8], index: 0, kind: input, shape index: {}]   ;;  %s3687_s1 = inlined_call_operand.vmem [shape: f32[9,8,8], index: 1, kind: input, shape index: {}]   ;;  %s3688_s2 = inlined_call_operand.vmem [shape: f32[2,256,8], index: 2, kind: output, shape index: {}]  }
   0x1 LB: > { %s1996_s10 = sadd.s32 4294967295, %s2345_s9   ;;  %p2000_p0 = scmp.ge.s32.totalorder %s2345_s9, 1  ;;  %s2345_s9 = sphi %s2362_s9, %s12_s9  }
   0x2   : > { %p112_p1 = scmp.lt.s32.totalorder %s2345_s9, 3 }
   0x4   : > { %p113_p2 = pnand %p2000_p0, %p112_p1 }
   0x6   : > { %116 = sbr.rel (%p113_p2) target bundleno = 729 (0x2d9), region = 28 }
   0xb   : > { %v2004_v0 = vld [vmem:[%s3687_s1 + $0x8] sm:$0xff]  ;;  %p134_p3 = scmp.lt.s32.totalorder %s1996_s10, 1  ;;  %v2069_v1 = vld [vmem:[%s3687_s1 + $0x10] sm:$0xff]  ;;  %v2102_v2 = vld [vmem:[%s3687_s1 + $0x18] sm:$0xff]  ;;  %vm247_vm0 = vcmask 1046528   ;;  %vm330_vm1 = vcmask 64512  }
   0xc   : > { %2303 = vmatpush.msra.mxu1 %v2004_v0  ;;  %2304 = vmatpush.msra.mxu2 %v2004_v0  ;;  %v198_v3 = vld [vmem:[%s3687_s1] sm:$0xff]  ;;  %vm685_vm2 = vcmask 1045504  }
   0xd   : > { %s3903_s10 = smov (!%p134_p3, %s1996_s10), 1  ;;  %2305 = vmatpush.msra.mxu3 %v2004_v0  ;;  %v2135_v4 = vld [vmem:[%s3687_s1 + $0x20] sm:$0xff]  ;;  %410 = vmatpush.msra.mxu0 %v2004_v0 }
   0xe   : > { %847 = vmatpush.msrb.mxu2 %v2069_v1  ;;  %587 = vmatpush.msrb.mxu1 %v198_v3  ;;  %s2306_s21 = smul.u32 432, %s3903_s10  ;;  %s2302_s5 = sshll.u32 %s3903_s10, 8 }
   0xf   : > { %1000 = vmatpush.msrb.mxu3 %v2102_v2  ;;  %1157 = vmatpush.msrb.mxu0 %v2135_v4  ;;  %s3464_s8 = scalar_lea.vmem %s3688_s2, %s2302_s5 }
  0x10   : > { %s2391_s24 = scalar_lea.vmem %s3686_s0, %s2306_s21 }
  0x11   : > { %v2394_v5 = vld [vmem:[%s2391_s24 + $0x60] sm:$0xff]  ;;  %v2397_v6 = vld [vmem:[%s2391_s24 + $0x68] sm:$0xff]  ;;  %v2418_v17 = vld [vmem:[%s2391_s24 + $0x70] sm:$0x3] }
  0x12   : > { %v2400_v7 = vld [vmem:[%s2391_s24 + $0xc0] sm:$0xff]  ;;  %v268_v8 = vrot.slane %v2394_v5, 1  ;;  %v269_v9 = vrot.slane %v2397_v6, 1  ;;  %v2405_v10 = vld [vmem:[%s2391_s24 + $0xc8] sm:$0xff]  ;;  %v2427_v20 = vld [vmem:[%s2391_s24 + $0xd0] sm:$0x3] }
  0x13   : > { %v288_v11 = vrot.slane %v2400_v7, 1  ;;  %v2409_v12 = vld [vmem:[%s2391_s24 + $0x120] sm:$0xff]  ;;  %v2412_v13 = vld [vmem:[%s2391_s24 + $0x128] sm:$0xff]  ;;  %v289_v14 = vrot.slane %v2405_v10, 1  ;;  %v2443_v26 = vld [vmem:[%s2391_s24 + $0x130] sm:$0x3] }
  0x14   : > { %3764 = vst [vmem:[#allocation2_spill] sm:$0xff] %v2409_v12  ;;  %v308_v15 = vrot.slane %v2409_v12, 1  ;;  %v309_v16 = vrot.slane %v2412_v13, 1  ;;  %v2421_v18 = vld [vmem:[%s2391_s24] sm:$0xff]  ;;  %v2424_v19 = vsel %vm247_vm0, %v268_v8, %v269_v9  ;;  %v2430_v21 = vld [vmem:[%s2391_s24 + $0x8] sm:$0xff]  ;;  %v271_v27 = vrot.slane %v2418_v17, 1 }
  0x15   : > { %3765 = vst [vmem:[#allocation3_spill] sm:$0xff] %v2412_v13  ;;  %v248_v22 = vrot.slane %v2421_v18, 1  ;;  %2013 = vmatmul.msk.f32.vlgmr.msra.gmra.mxu1 %vm330_vm1, %v2424_v19  ;;  %v2436_v23 = vsel %vm247_vm0, %v288_v11, %v289_v14  ;;  %v249_v25 = vrot.slane %v2430_v21, 1  ;;  %v2451_v28 = vld [vmem:[%s2391_s24 + $0x10] sm:$0x3]  ;;  %v291_v29 = vrot.slane %v2427_v20, 1 }
  0x16   : > { %3766 = vst [vmem:[#allocation4_spill] sm:$0xff] %v2436_v23  ;;  %v2439_v24 = vsel %vm247_vm0, %v308_v15, %v309_v16  ;;  %2021 = vmatmul.msk.f32.vlgmr.msra.gmra.mxu2 %vm330_vm1, %v2436_v23  ;;  %v311_v31 = vrot.slane %v2443_v26, 1  ;;  %v251_v32 = vrot.slane %v2451_v28, 1  ;;  %v2459_v33 = vsel %vm247_vm0, %v269_v9, %v271_v27  ;;  %v2468_v36 = vld [vmem:[%s2391_s24 + $0x78] sm:$0xff]  ;;  %v2471_v37 = vld [vmem:[%s2391_s24 + $0x80] sm:$0xff]  ;;  %v2553_v4 = vld [vmem:[%s2391_s24 + $0x90] sm:$0xff] }
  0x17   : > { %3767 = vst [vmem:[#allocation5_spill] sm:$0xff] %v2439_v24  ;;  %2029 = vmatmul.msk.f32.vlgmr.msra.gmra.mxu3 %vm330_vm1, %v2439_v24  ;;  %v250_v30 = vsel %vm247_vm0, %v248_v22, %v249_v25  ;;  %v2462_v34 = vsel %vm247_vm0, %v289_v14, %v291_v29  ;;  %v2474_v38 = vld [vmem:[%s2391_s24 + $0xd8] sm:$0xff]  ;;  %v2477_v39 = vld [vmem:[%s2391_s24 + $0xe0] sm:$0xff]  ;;  %v273_v43 = vrot.slane %v2468_v36, 1  ;;  %v274_v44 = vrot.slane %v2471_v37, 1  ;;  %v2559_v9 = vld [vmem:[%s2391_s24 + $0xf0] sm:$0xff] }
  0x18   : > { %3768 = vst [vmem:[#allocation6_spill] sm:$0xff] %v2443_v26  ;;  %2005 = vmatmul.msk.f32.vlgmr.msra.gmra.mxu0 %vm330_vm1, %v250_v30  ;;  %v2465_v35 = vsel %vm247_vm0, %v309_v16, %v311_v31  ;;  %v2480_v40 = vld [vmem:[%s2391_s24 + $0x138] sm:$0xff]  ;;  %v2483_v41 = vld [vmem:[%s2391_s24 + $0x140] sm:$0xff]  ;;  %v252_v42 = vsel %vm247_vm0, %v249_v25, %v251_v32  ;;  %v293_v47 = vrot.slane %v2474_v38, 1  ;;  %v294_v48 = vrot.slane %v2477_v39, 1  ;;  %v2565_v14 = vld [vmem:[%s2391_s24 + $0x150] sm:$0xff] }
  0x19   : > { %3769 = vst [vmem:[#allocation7_spill] sm:$0xff] %v2459_v33  ;;  %v2495_v45 = vld [vmem:[%s2391_s24 + $0x18] sm:$0xff]  ;;  %v2498_v46 = vld [vmem:[%s2391_s24 + $0x20] sm:$0xff]  ;;  %v313_v49 = vrot.slane %v2480_v40, 1  ;;  %v314_v50 = vrot.slane %v2483_v41, 1  ;;  %v2508_v53 = vsel %vm247_vm0, %v273_v43, %v274_v44  ;;  %v278_v22 = vrot.slane %v2553_v4, 1 }
  0x1a   : > { %3770 = vst [vmem:[#allocation8_spill] sm:$0xff] %v2462_v34  ;;  %v253_v51 = vrot.slane %v2495_v45, 1  ;;  %v254_v52 = vrot.slane %v2498_v46, 1  ;;  %v2511_v54 = vsel %vm247_vm0, %v293_v47, %v294_v48  ;;  %v2517_v56 = vld [vmem:[%s2391_s24 + $0x88] sm:$0x3]  ;;  %v2556_v8 = vld [vmem:[%s2391_s24 + $0x98] sm:$0xff] }
  0x1b   : > { %3771 = vst [vmem:[#allocation9_spill] sm:$0xff] %v2465_v35  ;;  %v2514_v55 = vsel %vm247_vm0, %v313_v49, %v314_v50  ;;  %v2520_v57 = vld [vmem:[%s2391_s24 + $0xe8] sm:$0x3]  ;;  %v276_v60 = vrot.slane %v2517_v56, 1  ;;  %v2562_v11 = vld [vmem:[%s2391_s24 + $0xf8] sm:$0xff]  ;;  %v279_v25 = vrot.slane %v2556_v8, 1 }
  0x1c   : > { %3772 = vst [vmem:[#allocation10_spill] sm:$0xff] %v2480_v40  ;;  %v2523_v58 = vld [vmem:[%s2391_s24 + $0x148] sm:$0x3]  ;;  %v2528_v59 = vsel %vm247_vm0, %v253_v51, %v254_v52  ;;  %v296_v62 = vrot.slane %v2520_v57, 1  ;;  %v2568_v15 = vld [vmem:[%s2391_s24 + $0x158] sm:$0xff]  ;;  %v2582_v27 = vld [vmem:[%s2391_s24 + $0x30] sm:$0xff] }
  0x1d   : > { %3773 = vst [vmem:[#allocation11_spill] sm:$0xff] %v2483_v41  ;;  %2014 = vmatmul.msk.f32.gmra.mxu1 %vm330_vm1, %v2459_v33  ;;  %v2536_v61 = vld [vmem:[%s2391_s24 + $0x28] sm:$0x3]  ;;  %v316_v63 = vrot.slane %v2523_v58, 1  ;;  %v2544_v1 = vsel %vm247_vm0, %v274_v44, %v276_v60  ;;  %v2585_v29 = vld [vmem:[%s2391_s24 + $0x38] sm:$0xff]  ;;  %v298_v30 = vrot.slane %v2559_v9, 1  ;;  %v2596_v47 = vsel %vm247_vm0, %v278_v22, %v279_v25 }
  0x1e   : > { %2022 = vmatmul.msk.f32.gmra.mxu2 %vm330_vm1, %v2462_v34  ;;  %3774 = vst [vmem:[#allocation12_spill] sm:$0xff] %v2508_v53  ;;  %v256_v0 = vrot.slane %v2536_v61, 1  ;;  %v2547_v2 = vsel %vm247_vm0, %v294_v48, %v296_v62  ;;  %v299_v31 = vrot.slane %v2562_v11, 1  ;;  %v318_v32 = vrot.slane %v2565_v14, 1  ;;  %v2608_v51 = vld [vmem:[%s2391_s24 + $0x100] sm:$0x3] }
  0x1f   : > { %2030 = vmatmul.msk.f32.gmra.mxu3 %vm330_vm1, %v2465_v35  ;;  %3775 = vst [vmem:[#allocation13_spill] sm:$0xff] %v2514_v55  ;;  %v2550_v3 = vsel %vm247_vm0, %v314_v50, %v316_v63  ;;  %v258_v43 = vrot.slane %v2582_v27, 1  ;;  %v259_v44 = vrot.slane %v2585_v29, 1  ;;  %v2605_v50 = vld [vmem:[%s2391_s24 + $0xa0] sm:$0x3]  ;;  %v2234_v22 = vld [vmem:[%s3687_s1 + $0x38] sm:$0xff] }
  0x20   : > { %2006 = vmatmul.msk.f32.gmra.mxu0 %vm330_vm1, %v252_v42  ;;  %3776 = vst [vmem:[#allocation14_spill] sm:$0xff] %v2523_v58  ;;  %v2573_v16 = vsel %vm247_vm0, %v254_v52, %v256_v0  ;;  %v319_v42 = vrot.slane %v2568_v15, 1  ;;  %v2599_v48 = vsel %vm247_vm0, %v298_v30, %v299_v31  ;;  %v2611_v52 = vld [vmem:[%s2391_s24 + $0x160] sm:$0x3]  ;;  %v281_v63 = vrot.slane %v2605_v50, 1  ;;  %v2201_v0 = vld [vmem:[%s3687_s1 + $0x30] sm:$0xff]  ;;  %1623 = vmatpush.msra.mxu3 %v2234_v22 }
  0x21   : > { %3777 = vst [vmem:[#allocation15_spill] sm:$0xff] %v2544_v1  ;;  %v2616_v60 = vsel %vm247_vm0, %v258_v43, %v259_v44  ;;  %v2619_v62 = vld [vmem:[%s2391_s24 + $0x40] sm:$0x3]  ;;  %v2168_v30 = vld [vmem:[%s3687_s1 + $0x28] sm:$0xff]  ;;  %v321_v43 = vrot.slane %v2611_v52, 1  ;;  %1466 = vmatpush.msra.mxu2 %v2201_v0  ;;  %v2653_v0 = vld [vmem:[%s2391_s24 + $0xb0] sm:$0xff] }
  0x22   : > { %3778 = vst [vmem:[#allocation16_spill] sm:$0xff] %v2550_v3  ;;  %v2602_v49 = vsel %vm247_vm0, %v318_v32, %v319_v42  ;;  %v301_v32 = vrot.slane %v2608_v51, 1  ;;  %1313 = vmatpush.msra.mxu1 %v2168_v30  ;;  %v2656_v22 = vld [vmem:[%s2391_s24 + $0x108] sm:$0xff]  ;;  %v2659_v30 = vld [vmem:[%s2391_s24 + $0x110] sm:$0xff] }
  0x23   : > { %3779 = vst [vmem:[#allocation17_spill] sm:$0xff] %v2565_v14  ;;  %v2647_v14 = vsel %vm247_vm0, %v319_v42, %v321_v43  ;;  %v2665_v41 = vld [vmem:[%s2391_s24 + $0x170] sm:$0xff]  ;;  %v284_v42 = vrot.slane %v2653_v0, 1  ;;  %v304_v43 = vrot.slane %v2659_v30, 1 }
  0x24   : > { %3780 = vst [vmem:[#allocation18_spill] sm:$0xff] %v2568_v15  ;;  %v261_v15 = vrot.slane %v2619_v62, 1  ;;  %v2644_v58 = vsel %vm247_vm0, %v299_v31, %v301_v32  ;;  %v2682_v32 = vld [vmem:[%s2391_s24 + $0x50] sm:$0xff] }
  0x25   : > { %2015 = vmatmul.msk.f32.gmra.mxu1 %vm330_vm1, %v2508_v53  ;;  %3781 = vst [vmem:[#allocation19_spill] sm:$0xff] %v2596_v47  ;;  %v264_v40 = vrot.slane %v2682_v32, 1 }
  0x26   : > { %2023 = vmatmul.msk.f32.gmra.mxu2 %vm330_vm1, %v2511_v54  ;;  %3782 = vst [vmem:[#allocation20_spill] sm:$0xff] %v2602_v49 }
  0x27   : > { %2031 = vmatmul.msk.f32.gmra.mxu3 %vm330_vm1, %v2514_v55  ;;  %3783 = vst [vmem:[#allocation21_spill] sm:$0xff] %v2608_v51  ;;  %v324_v55 = vrot.slane %v2665_v41, 1 }
  0x28   : > { %2007 = vmatmul.msk.f32.gmra.mxu0 %vm330_vm1, %v2528_v59  ;;  %3784 = vst [vmem:[#allocation22_spill] sm:$0xff] %v2611_v52  ;;  %v2650_v52 = vld [vmem:[%s2391_s24 + $0xa8] sm:$0xff] }
  0x29   : > { %3786 = vst [vmem:[#allocation24_spill] sm:$0xff] %v2647_v14  ;;  %v283_v31 = vrot.slane %v2650_v52, 1 }
  0x2a   : > { %3787 = vst [vmem:[#allocation25_spill] sm:$0xff] %v2659_v30 }
  0x2b   : > { %3789 = vst [vmem:[#allocation27_spill] sm:$0xff] %v2665_v41  ;;  %v2696_v35 = vsel %vm247_vm0, %v283_v31, %v284_v42  ;;  %v2708_v41 = vld [vmem:[%s2391_s24 + $0x118] sm:$0x3] }
  0x2c   : > { %3790 = vst [vmem:[#allocation28_spill] sm:$0xff] %v2696_v35  ;;  %v2724_v31 = vld [vmem:[%s2391_s24 + $0x58] sm:$0x3] }
  0x2d   : > { %2016 = vmatmul.msk.f32.gmra.mxu1 %vm330_vm1, %v2544_v1  ;;  %3793 = vst [vmem:[#allocation31_spill] sm:$0xff] %v2708_v41 }
  0x2e   : > { %2024 = vmatmul.msk.f32.gmra.mxu2 %vm330_vm1, %v2547_v2 }
  0x2f   : > { %2032 = vmatmul.msk.f32.gmra.mxu3 %vm330_vm1, %v2550_v3  ;;  %v2662_v3 = vld [vmem:[%s2391_s24 + $0x168] sm:$0xff] }
  0x30   : > { %2008 = vmatmul.msk.f32.gmra.mxu0 %vm330_vm1, %v2573_v16  ;;  %3788 = vst [vmem:[#allocation26_spill] sm:$0xff] %v2662_v3 }
  0x35   : > { %2017 = vmatmul.msk.f32.gmra.mxu1 %vm330_vm1, %v2596_v47 }
  0x36   : > { %2025 = vmatmul.msk.f32.gmra.mxu2 %vm330_vm1, %v2599_v48 }
  0x37   : > { %2033 = vmatmul.msk.f32.gmra.mxu3 %vm330_vm1, %v2602_v49  ;;  %v2641_v49 = vsel %vm247_vm0, %v279_v25, %v281_v63  ;;  %v2670_v25 = vsel %vm247_vm0, %v259_v44, %v261_v15  ;;  %v2679_v63 = vld [vmem:[%s2391_s24 + $0x48] sm:$0xff]  ;;  %v2267_v15 = vld [vmem:[%s3687_s1 + $0x40] sm:$0xff]  ;;  %v303_v44 = vrot.slane %v2656_v22, 1 }
  0x38   : > { %2009 = vmatmul.msk.f32.gmra.mxu0 %vm330_vm1, %v2616_v60  ;;  %3785 = vst [vmem:[#allocation23_spill] sm:$0xff] %v2641_v49  ;;  %v263_v26 = vrot.slane %v2679_v63, 1 }
  0x39   : > { %1779 = vmatpush.msra.mxu0 %v2267_v15  ;;  %v2699_v13 = vsel %vm247_vm0, %v303_v44, %v304_v43  ;;  %v2711_v15 = vld [vmem:[%s2391_s24 + $0x178] sm:$0x3]  ;;  %v306_v44 = vrot.slane %v2708_v41, 1 }
  0x3a   : > { %3791 = vst [vmem:[#allocation29_spill] sm:$0xff] %v2699_v13  ;;  %v2716_v12 = vsel %vm247_vm0, %v263_v26, %v264_v40  ;;  %v326_v30 = vrot.slane %v2711_v15, 1  ;;  %v266_v26 = vrot.slane %v2724_v31, 1 }
  0x3c   : > { %v2743_v41 = vsel %vm247_vm0, %v264_v40, %v266_v26  ;;  %v689_v40 = vrot.slane %v2451_v28, 2  ;;  %v701_v26 = vrot.slane %v2679_v63, 2 }
  0x3d   : > { %2018 = vmatmul.msk.f32.gmra.mxu1 %vm330_vm1, %v2641_v49 }
  0x3e   : > { %2026 = vmatmul.msk.f32.gmra.mxu2 %vm330_vm1, %v2644_v58 }
  0x3f   : > { %2034 = vmatmul.msk.f32.gmra.mxu3 %vm330_vm1, %v2647_v14  ;;  %v323_v14 = vrot.slane %v2662_v3, 1  ;;  %v2705_v3 = vld [vmem:[%s2391_s24 + $0xb8] sm:$0x3] }
  0x40   : > { %2010 = vmatmul.msk.f32.gmra.mxu0 %vm330_vm1, %v2670_v25 }
  0x41   : > { %v2702_v24 = vsel %vm247_vm0, %v323_v14, %v324_v55  ;;  %v286_v14 = vrot.slane %v2705_v3, 1 }
  0x42   : > { %3792 = vst [vmem:[#allocation30_spill] sm:$0xff] %v2702_v24 }
  0x43   : > { %v2732_v51 = vsel %vm247_vm0, %v284_v42, %v286_v14  ;;  %v686_v42 = vrot.slane %v2421_v18, 2  ;;  %v692_v14 = vrot.slane %v2498_v46, 2 }
  0x44   : > { %3794 = vst [vmem:[#allocation32_spill] sm:$0xff] %v2732_v51 }
  0x45   : > { %2019 = vmatmul.msk.f32.gmra.mxu1 %vm330_vm1, %v2696_v35 }
  0x46   : > { %2027 = vmatmul.msk.f32.gmra.mxu2 %vm330_vm1, %v2699_v13  ;;  %v2735_v13 = vsel %vm247_vm0, %v304_v43, %v306_v44  ;;  %v687_v43 = vrot.slane %v2430_v21, 2 }
  0x47   : > { %2035 = vmatmul.msk.f32.gmra.mxu3 %vm330_vm1, %v2702_v24  ;;  %v2738_v24 = vsel %vm247_vm0, %v324_v55, %v326_v30 }
  0x48   : > { %2011 = vmatmul.msk.f32.gmra.mxu0 %vm330_vm1, %v2716_v12  ;;  %3795 = vst [vmem:[#allocation33_spill] sm:$0xff] %v2738_v24  ;;  %v688_v55 = vsel %vm685_vm2, %v686_v42, %v687_v43  ;;  %v690_v30 = vsel %vm685_vm2, %v687_v43, %v689_v40  ;;  %v702_v42 = vrot.slane %v2682_v32, 2  ;;  %v704_v43 = vrot.slane %v2724_v31, 2 }
  0x49   : > { %v706_v40 = vrot.slane %v2394_v5, 2 }
  0x4d   : > { %2020 = vmatmul.msk.f32.gmra.mxu1 %vm330_vm1, %v2732_v51 }
  0x4e   : > { %2028 = vmatmul.msk.f32.gmra.mxu2 %vm330_vm1, %v2735_v13 }
  0x4f   : > { %2036 = vmatmul.msk.f32.gmra.mxu3 %vm330_vm1, %v2738_v24 }
  0x50   : > { %2012 = vmatmul.msk.f32.gmra.mxu0 %vm330_vm1, %v2743_v41 }
  0x55   : > { %2037 = vmatmul.msk.f32.vlgmr.msrb.gmra.mxu1 %vm330_vm1, %v2421_v18  ;;  %v691_v18 = vrot.slane %v2495_v45, 2 }
  0x56   : > { %2070 = vmatmul.msk.f32.vlgmr.msrb.gmra.mxu2 %vm330_vm1, %v688_v55  ;;  %v2835_v55 = vsel %vm685_vm2, %v702_v42, %v704_v43 }
  0x57   : > { %2103 = vmatmul.msk.f32.vlgmr.msrb.gmra.mxu3 %vm330_vm1, %v2495_v45  ;;  %v2773_v28 = vsel %vm685_vm2, %v691_v18, %v692_v14 }
  0x58   : > { %2136 = vmatmul.msk.f32.vlgmr.msrb.gmra.mxu0 %vm330_vm1, %v2528_v59 }
  0x5d   : > { %2038 = vmatmul.msk.f32.gmra.mxu1 %vm330_vm1, %v2430_v21  ;;  %v694_v21 = vrot.slane %v2536_v61, 2 }
  0x5e   : > { %2071 = vmatmul.msk.f32.gmra.mxu2 %vm330_vm1, %v690_v30  ;;  %v707_v30 = vrot.slane %v2397_v6, 2 }
  0x5f   : > { %2104 = vmatmul.msk.f32.gmra.mxu3 %vm330_vm1, %v2498_v46  ;;  %v2785_v59 = vsel %vm685_vm2, %v692_v14, %v694_v21  ;;  %v709_v21 = vrot.slane %v2418_v17, 2  ;;  %v711_v17 = vrot.slane %v2468_v36, 2 }
  0x60   : > { %2137 = vmatmul.msk.f32.gmra.mxu0 %vm330_vm1, %v2573_v16  ;;  %v697_v16 = vrot.slane %v2585_v29, 2  ;;  %v2850_v18 = vsel %vm685_vm2, %v706_v40, %v707_v30 }
  0x61   : > { %3796 = vst [vmem:[#allocation34_spill] sm:$0xff] %v2850_v18 }
  0x65   : > { %2039 = vmatmul.msk.f32.gmra.mxu1 %vm330_vm1, %v2495_v45  ;;  %v696_v45 = vrot.slane %v2582_v27, 2 }
  0x66   : > { %2072 = vmatmul.msk.f32.gmra.mxu2 %vm330_vm1, %v2773_v28 }
  0x67   : > { %2105 = vmatmul.msk.f32.gmra.mxu3 %vm330_vm1, %v2582_v27  ;;  %v2798_v61 = vsel %vm685_vm2, %v696_v45, %v697_v16 }
  0x68   : > { %2138 = vmatmul.msk.f32.gmra.mxu0 %vm330_vm1, %v2616_v60 }
  0x6d   : > { %2040 = vmatmul.msk.f32.gmra.mxu1 %vm330_vm1, %v2498_v46  ;;  %v699_v46 = vrot.slane %v2619_v62, 2  ;;  %v2823_v62 = vsel %vm685_vm2, %v701_v26, %v702_v42  ;;  %v712_v42 = vrot.slane %v2471_v37, 2 }
  0x6e   : > { %2073 = vmatmul.msk.f32.gmra.mxu2 %vm330_vm1, %v2785_v59 }
  0x6f   : > { %2106 = vmatmul.msk.f32.gmra.mxu3 %vm330_vm1, %v2585_v29  ;;  %v2810_v44 = vsel %vm685_vm2, %v697_v16, %v699_v46 }
  0x70   : > { %2139 = vmatmul.msk.f32.gmra.mxu0 %vm330_vm1, %v2670_v25 }
  0x75   : > { %2041 = vmatmul.msk.f32.gmra.mxu1 %vm330_vm1, %v2582_v27 }
  0x76   : > { %2074 = vmatmul.msk.f32.gmra.mxu2 %vm330_vm1, %v2798_v61 }
  0x77   : > { %2107 = vmatmul.msk.f32.gmra.mxu3 %vm330_vm1, %v2679_v63 }
  0x78   : > { %2140 = vmatmul.msk.f32.gmra.mxu0 %vm330_vm1, %v2716_v12 }
  0x7d   : > { %2042 = vmatmul.msk.f32.gmra.mxu1 %vm330_vm1, %v2585_v29 }
  0x7e   : > { %2075 = vmatmul.msk.f32.gmra.mxu2 %vm330_vm1, %v2810_v44 }
  0x7f   : > { %2108 = vmatmul.msk.f32.gmra.mxu3 %vm330_vm1, %v2682_v32 }
  0x80   : > { %2141 = vmatmul.msk.f32.gmra.mxu0 %vm330_vm1, %v2743_v41 }
  0x85   : > { %2043 = vmatmul.msk.f32.gmra.mxu1 %vm330_vm1, %v2679_v63 }
  0x86   : > { %2076 = vmatmul.msk.f32.gmra.mxu2 %vm330_vm1, %v2823_v62 }
  0x87   : > { %2109 = vmatmul.msk.f32.gmra.mxu3 %vm330_vm1, %v2394_v5 }
  0x88   : > { %2142 = vmatmul.msk.f32.gmra.mxu0 %vm330_vm1, %v2424_v19 }
  0x8d   : > { %2044 = vmatmul.msk.f32.gmra.mxu1 %vm330_vm1, %v2682_v32 }
  0x8e   : > { %2077 = vmatmul.msk.f32.gmra.mxu2 %vm330_vm1, %v2835_v55 }
  0x8f   : > { %2110 = vmatmul.msk.f32.gmra.mxu3 %vm330_vm1, %v2397_v6 }
  0x90   : > { %2143 = vmatmul.msk.f32.gmra.mxu0 %vm330_vm1, %v2459_v33 }
  0x92   : > { %v2847_v31 = vpop.f32.mrf.mxu1 }
  0x95   : > { %2045 = vmatmul.msk.f32.gmra.mxu1 %vm330_vm1, %v2394_v5  ;;  %v2854_v14 = vpop.f32.mrf.mxu0  ;;  %v2870_v5 = vsel %vm685_vm2, %v707_v30, %v709_v21  ;;  %v2891_v30 = vsel %vm685_vm2, %v711_v17, %v712_v42 }
  0x96   : > { %2078 = vmatmul.msk.f32.gmra.mxu2 %vm330_vm1, %v2850_v18  ;;  %3798 = vst [vmem:[#allocation36_spill] sm:$0xff] %v2870_v5 }
  0x97   : > { %2111 = vmatmul.msk.f32.gmra.mxu3 %vm330_vm1, %v2468_v36  ;;  %3800 = vst [vmem:[#allocation38_spill] sm:$0xff] %v2891_v30 }
  0x98   : > { %2144 = vmatmul.msk.f32.gmra.mxu0 %vm330_vm1, %v2508_v53 }
  0x99   : > { %v2863_v45 = vpop.f32.mrf.mxu2 }
  0x9a   : > { %v2865_v16 = vpop.f32.mrf.mxu3  ;;  %v2867_v46 = vpop.f32.mrf.mxu1 }
  0x9b   : > { %3797 = vst [vmem:[#allocation35_spill] sm:$0xff] %v2865_v16  ;;  %v714_v16 = vrot.slane %v2517_v56, 2  ;;  %v716_v56 = vrot.slane %v2553_v4, 2 }
  0x9d   : > { %2046 = vmatmul.msk.f32.gmra.mxu1 %vm330_vm1, %v2397_v6  ;;  %v2874_v26 = vpop.f32.mrf.mxu0 }
  0x9e   : > { %2079 = vmatmul.msk.f32.gmra.mxu2 %vm330_vm1, %v2870_v5 }
  0x9f   : > { %2112 = vmatmul.msk.f32.gmra.mxu3 %vm330_vm1, %v2471_v37 }
  0xa0   : > { %2145 = vmatmul.msk.f32.gmra.mxu0 %vm330_vm1, %v2544_v1 }
  0xa1   : > { %v2884_v43 = vpop.f32.mrf.mxu2 }
  0xa2   : > { %v2886_v40 = vpop.f32.mrf.mxu3  ;;  %v2888_v6 = vpop.f32.mrf.mxu1 }
  0xa3   : > { %3799 = vst [vmem:[#allocation37_spill] sm:$0xff] %v2886_v40 }
  0xa5   : > { %2047 = vmatmul.msk.f32.gmra.mxu1 %vm330_vm1, %v2468_v36  ;;  %v2895_v21 = vpop.f32.mrf.mxu0  ;;  %v2911_v36 = vsel %vm685_vm2, %v712_v42, %v714_v16 }
  0xa6   : > { %2080 = vmatmul.msk.f32.gmra.mxu2 %vm330_vm1, %v2891_v30  ;;  %3802 = vst [vmem:[#allocation40_spill] sm:$0xff] %v2911_v36 }
  0xa7   : > { %2113 = vmatmul.msk.f32.gmra.mxu3 %vm330_vm1, %v2553_v4 }
  0xa8   : > { %2146 = vmatmul.msk.f32.gmra.mxu0 %vm330_vm1, %v2596_v47 }
  0xa9   : > { %v2904_v40 = vpop.f32.mrf.mxu2 }
  0xaa   : > { %v2906_v17 = vpop.f32.mrf.mxu3  ;;  %v2908_v1 = vpop.f32.mrf.mxu1 }
  0xab   : > { %3801 = vst [vmem:[#allocation39_spill] sm:$0xff] %v2906_v17  ;;  %v717_v17 = vrot.slane %v2556_v8, 2 }
  0xad   : > { %2048 = vmatmul.msk.f32.gmra.mxu1 %vm330_vm1, %v2471_v37  ;;  %v2915_v30 = vpop.f32.mrf.mxu0  ;;  %v2932_v47 = vsel %vm685_vm2, %v716_v56, %v717_v17 }
  0xae   : > { %2081 = vmatmul.msk.f32.gmra.mxu2 %vm330_vm1, %v2911_v36  ;;  %3804 = vst [vmem:[#allocation42_spill] sm:$0xff] %v2932_v47 }
  0xaf   : > { %2114 = vmatmul.msk.f32.gmra.mxu3 %vm330_vm1, %v2556_v8 }
  0xb0   : > { %2147 = vmatmul.msk.f32.gmra.mxu0 %vm330_vm1, %v2641_v49  ;;  %v719_v49 = vrot.slane %v2605_v50, 2  ;;  %v721_v50 = vrot.slane %v2650_v52, 2 }
  0xb1   : > { %v2925_v16 = vpop.f32.mrf.mxu2 }
  0xb2   : > { %v2927_v42 = vpop.f32.mrf.mxu3  ;;  %v2929_v37 = vpop.f32.mrf.mxu1 }
  0xb3   : > { %3803 = vst [vmem:[#allocation41_spill] sm:$0xff] %v2927_v42 }
  0xb5   : > { %2049 = vmatmul.msk.f32.gmra.mxu1 %vm330_vm1, %v2553_v4  ;;  %v2936_v36 = vpop.f32.mrf.mxu0  ;;  %v2952_v4 = vsel %vm685_vm2, %v717_v17, %v719_v49 }
  0xb6   : > { %2082 = vmatmul.msk.f32.gmra.mxu2 %vm330_vm1, %v2932_v47  ;;  %3806 = vst [vmem:[#allocation44_spill] sm:$0xff] %v2952_v4 }
  0xb7   : > { %2115 = vmatmul.msk.f32.gmra.mxu3 %vm330_vm1, %v2650_v52 }
  0xb8   : > { %2148 = vmatmul.msk.f32.gmra.mxu0 %vm330_vm1, %v2696_v35 }
  0xb9   : > { %v2945_v42 = vpop.f32.mrf.mxu2 }
  0xba   : > { %v2947_v56 = vpop.f32.mrf.mxu3  ;;  %v2949_v53 = vpop.f32.mrf.mxu1 }
  0xbb   : > { %3805 = vst [vmem:[#allocation43_spill] sm:$0xff] %v2947_v56  ;;  %v722_v56 = vrot.slane %v2653_v0, 2 }
  0xbd   : > { %2050 = vmatmul.msk.f32.gmra.mxu1 %vm330_vm1, %v2556_v8  ;;  %v2956_v47 = vpop.f32.mrf.mxu0  ;;  %v2973_v35 = vsel %vm685_vm2, %v721_v50, %v722_v56 }
  0xbe   : > { %2083 = vmatmul.msk.f32.gmra.mxu2 %vm330_vm1, %v2952_v4  ;;  %3809 = vst [vmem:[#allocation47_spill] sm:$0xff] %v2973_v35 }
  0xbf   : > { %2116 = vmatmul.msk.f32.gmra.mxu3 %vm330_vm1, %v2653_v0 }
  0xc0   : > { %2149 = vmatmul.msk.f32.gmra.mxu0 %vm330_vm1, %v2732_v51  ;;  %v724_v51 = vrot.slane %v2705_v3, 2  ;;  %v726_v3 = vrot.slane %v2400_v7, 2 }
  0xc1   : > { %v2966_v49 = vpop.f32.mrf.mxu2 }
  0xc2   : > { %3807 = vst [vmem:[#allocation45_spill] sm:$0xff] %v2966_v49  ;;  %v2968_v17 = vpop.f32.mrf.mxu3  ;;  %v2970_v8 = vpop.f32.mrf.mxu1 }
  0xc3   : > { %3808 = vst [vmem:[#allocation46_spill] sm:$0xff] %v2968_v17 }
  0xc5   : > { %2051 = vmatmul.msk.f32.gmra.mxu1 %vm330_vm1, %v2650_v52  ;;  %v2977_v4 = vpop.f32.mrf.mxu0  ;;  %v2993_v52 = vsel %vm685_vm2, %v722_v56, %v724_v51 }
  0xc6   : > { %2084 = vmatmul.msk.f32.gmra.mxu2 %vm330_vm1, %v2973_v35  ;;  %3812 = vst [vmem:[#allocation50_spill] sm:$0xff] %v2993_v52 }
  0xc7   : > { %2117 = vmatmul.msk.f32.gmra.mxu3 %vm330_vm1, %v2400_v7 }
  0xc8   : > { %2150 = vmatmul.msk.f32.gmra.mxu0 %vm330_vm1, %v2436_v23 }
  0xc9   : > { %v2986_v17 = vpop.f32.mrf.mxu2 }
  0xca   : > { %3810 = vst [vmem:[#allocation48_spill] sm:$0xff] %v2986_v17  ;;  %v2988_v50 = vpop.f32.mrf.mxu3  ;;  %v2990_v5 = vpop.f32.mrf.mxu1 }
  0xcb   : > { %3811 = vst [vmem:[#allocation49_spill] sm:$0xff] %v2988_v50  ;;  %v727_v50 = vrot.slane %v2405_v10, 2 }
  0xcd   : > { %2052 = vmatmul.msk.f32.gmra.mxu1 %vm330_vm1, %v2653_v0  ;;  %v2997_v35 = vpop.f32.mrf.mxu0  ;;  %v3012_v23 = vsel %vm685_vm2, %v726_v3, %v727_v50 }
  0xce   : > { %2085 = vmatmul.msk.f32.gmra.mxu2 %vm330_vm1, %v2993_v52  ;;  %3815 = vst [vmem:[#allocation53_spill] sm:$0xff] %v3012_v23 }
  0xcf   : > { %2118 = vmatmul.msk.f32.gmra.mxu3 %vm330_vm1, %v2405_v10 }
  0xd0   : > { %2151 = vmatmul.msk.f32.gmra.mxu0 %vm330_vm1, %v2462_v34  ;;  %v729_v34 = vrot.slane %v2427_v20, 2  ;;  %v731_v20 = vrot.slane %v2474_v38, 2 }
  0xd1   : > { %v3007_v51 = vpop.f32.mrf.mxu2 }
  0xd2   : > { %3813 = vst [vmem:[#allocation51_spill] sm:$0xff] %v3007_v51  ;;  %v3009_v56 = vpop.f32.mrf.mxu3  ;;  %v589_v0 = vpop.f32.mrf.mxu1 }
  0xd3   : > { %3814 = vst [vmem:[#allocation52_spill] sm:$0xff] %v3009_v56  ;;  %v590_v51 = vadd.f32 %v589_v0, %v2854_v14  ;;  %v732_v14 = vrot.slane %v2477_v39, 2 }
  0xd5   : > { %2053 = vmatmul.msk.f32.gmra.mxu1 %vm330_vm1, %v2400_v7  ;;  %v1159_v52 = vpop.f32.mrf.mxu0  ;;  %v3025_v7 = vsel %vm685_vm2, %v727_v50, %v729_v34 }
  0xd6   : > { %2086 = vmatmul.msk.f32.gmra.mxu2 %vm330_vm1, %v3012_v23 }
  0xd7   : > { %2119 = vmatmul.msk.f32.gmra.mxu3 %vm330_vm1, %v2474_v38 }
  0xd8   : > { %2152 = vmatmul.msk.f32.gmra.mxu0 %vm330_vm1, %v2511_v54 }
  0xd9   : > { %v849_v56 = vpop.f32.mrf.mxu2 }
  0xda   : > { %v1002_v3 = vpop.f32.mrf.mxu3  ;;  %v945_v17 = vadd.f32 %v849_v56, %v590_v51  ;;  %v592_v49 = vpop.f32.mrf.mxu1 }
  0xdb   : > { %v593_v34 = vadd.f32 %v592_v49, %v2874_v26  ;;  %v734_v26 = vrot.slane %v2520_v57, 2  ;;  %v736_v57 = vrot.slane %v2559_v9, 2 }
  0xdc   : > { %v1098_v33 = vadd.f32 %v1002_v3, %v945_v17 }
  0xdd   : > { %2054 = vmatmul.msk.f32.gmra.mxu1 %vm330_vm1, %v2405_v10  ;;  %v1162_v23 = vpop.f32.mrf.mxu0 }
  0xde   : > { %v3029_v18 = vadd.f32 %v1159_v52, %v1098_v33  ;;  %2087 = vmatmul.msk.f32.gmra.mxu2 %vm330_vm1, %v3025_v7  ;;  %v3041_v52 = vsel %vm685_vm2, %v731_v20, %v732_v14 }
  0xdf   : > { %2120 = vmatmul.msk.f32.gmra.mxu3 %vm330_vm1, %v2477_v39 }
  0xe0   : > { %2153 = vmatmul.msk.f32.gmra.mxu0 %vm330_vm1, %v2547_v2 }
  0xe1   : > { %v852_v17 = vpop.f32.mrf.mxu2 }
  0xe2   : > { %v1005_v10 = vpop.f32.mrf.mxu3  ;;  %v946_v50 = vadd.f32 %v852_v17, %v593_v34  ;;  %v595_v33 = vpop.f32.mrf.mxu1 }
  0xe3   : > { %v596_v49 = vadd.f32 %v595_v33, %v2895_v21  ;;  %v737_v21 = vrot.slane %v2562_v11, 2 }
  0xe4   : > { %v1099_v51 = vadd.f32 %v1005_v10, %v946_v50 }
  0xe5   : > { %2055 = vmatmul.msk.f32.gmra.mxu1 %vm330_vm1, %v2474_v38  ;;  %v1165_v56 = vpop.f32.mrf.mxu0 }
  0xe6   : > { %v3045_v0 = vadd.f32 %v1162_v23, %v1099_v51  ;;  %2088 = vmatmul.msk.f32.gmra.mxu2 %vm330_vm1, %v3041_v52  ;;  %v3056_v23 = vsel %vm685_vm2, %v732_v14, %v734_v26  ;;  %v3072_v26 = vsel %vm685_vm2, %v736_v57, %v737_v21 }
  0xe7   : > { %2121 = vmatmul.msk.f32.gmra.mxu3 %vm330_vm1, %v2559_v9 }
  0xe8   : > { %2154 = vmatmul.msk.f32.gmra.mxu0 %vm330_vm1, %v2599_v48 }
  0xe9   : > { %v855_v3 = vpop.f32.mrf.mxu2 }
  0xea   : > { %v1008_v20 = vpop.f32.mrf.mxu3  ;;  %v947_v34 = vadd.f32 %v855_v3, %v596_v49  ;;  %v598_v38 = vpop.f32.mrf.mxu1 }
  0xeb   : > { %v599_v14 = vadd.f32 %v598_v38, %v2915_v30  ;;  %v3817_v30 = vld [vmem:[#allocation21_spill] sm:$0xff] }
  0xec   : > { %v1100_v17 = vadd.f32 %v1008_v20, %v947_v34  ;;  %v739_v34 = vrot.slane %v3817_v30, 2 }
  0xed   : > { %2056 = vmatmul.msk.f32.gmra.mxu1 %vm330_vm1, %v2477_v39  ;;  %v1168_v10 = vpop.f32.mrf.mxu0 }
  0xee   : > { %v3060_v50 = vadd.f32 %v1165_v56, %v1100_v17  ;;  %2089 = vmatmul.msk.f32.gmra.mxu2 %vm330_vm1, %v3056_v23  ;;  %v3818_v17 = vld [vmem:[#allocation29_spill] sm:$0xff] }
  0xef   : > { %2122 = vmatmul.msk.f32.gmra.mxu3 %vm330_vm1, %v2562_v11 }
  0xf0   : > { %2155 = vmatmul.msk.f32.gmra.mxu0 %vm330_vm1, %v2644_v58 }
  0xf1   : > { %v858_v33 = vpop.f32.mrf.mxu2 }
  0xf2   : > { %v1011_v39 = vpop.f32.mrf.mxu3  ;;  %v948_v51 = vadd.f32 %v858_v33, %v599_v14  ;;  %v601_v56 = vpop.f32.mrf.mxu1 }
  0xf3   : > { %v602_v38 = vadd.f32 %v601_v56, %v2936_v36  ;;  %v3820_v36 = vld [vmem:[#allocation25_spill] sm:$0xff]  ;;  %v741_v56 = vrot.slane %v2656_v22, 2 }
  0xf4   : > { %v1101_v49 = vadd.f32 %v1011_v39, %v948_v51  ;;  %v742_v30 = vrot.slane %v3820_v36, 2 }
  0xf5   : > { %2057 = vmatmul.msk.f32.gmra.mxu1 %vm330_vm1, %v2559_v9  ;;  %v1171_v3 = vpop.f32.mrf.mxu0 }
  0xf6   : > { %v3076_v20 = vadd.f32 %v1168_v10, %v1101_v49  ;;  %2090 = vmatmul.msk.f32.gmra.mxu2 %vm330_vm1, %v3072_v26  ;;  %v3087_v10 = vsel %vm685_vm2, %v737_v21, %v739_v34 }
  0xf7   : > { %2123 = vmatmul.msk.f32.gmra.mxu3 %vm330_vm1, %v2656_v22 }
  0xf8   : > { %3816 = vst [vmem:[#allocation54_spill] sm:$0xff] %v3076_v20  ;;  %2156 = vmatmul.msk.f32.gmra.mxu0 %vm330_vm1, %v3818_v17 }
  0xf9   : > { %v861_v57 = vpop.f32.mrf.mxu2 }
  0xfa   : > { %v1014_v14 = vpop.f32.mrf.mxu3  ;;  %v949_v33 = vadd.f32 %v861_v57, %v602_v38  ;;  %v604_v9 = vpop.f32.mrf.mxu1  ;;  %v3103_v57 = vsel %vm685_vm2, %v741_v56, %v742_v30 }
  0xfb   : > { %v605_v21 = vadd.f32 %v604_v9, %v2956_v47  ;;  %v3822_v47 = vld [vmem:[#allocation2_spill] sm:$0xff]  ;;  %v3823_v9 = vld [vmem:[#allocation31_spill] sm:$0xff] }
  0xfc   : > { %v1102_v39 = vadd.f32 %v1014_v14, %v949_v33 }
  0xfd   : > { %2058 = vmatmul.msk.f32.gmra.mxu1 %vm330_vm1, %v2562_v11  ;;  %v1174_v51 = vpop.f32.mrf.mxu0 }
  0xfe   : > { %v3091_v49 = vadd.f32 %v1171_v3, %v1102_v39  ;;  %2091 = vmatmul.msk.f32.gmra.mxu2 %vm330_vm1, %v3087_v10 }
  0xff   : > { %2124 = vmatmul.msk.f32.gmra.mxu3 %vm330_vm1, %v3820_v36 }
 0x100   : > { %3819 = vst [vmem:[#allocation21_spill] sm:$0xff] %v3091_v49  ;;  %2157 = vmatmul.msk.f32.gmra.mxu0 %vm330_vm1, %v2735_v13  ;;  %v744_v49 = vrot.slane %v3823_v9, 2 }
 0x101   : > { %v864_v34 = vpop.f32.mrf.mxu2 }
 0x102   : > { %v1017_v11 = vpop.f32.mrf.mxu3  ;;  %v950_v38 = vadd.f32 %v864_v34, %v605_v21  ;;  %v607_v3 = vpop.f32.mrf.mxu1  ;;  %v3824_v34 = vld [vmem:[#allocation5_spill] sm:$0xff] }
 0x103   : > { %v608_v21 = vadd.f32 %v607_v3, %v2977_v4  ;;  %v3826_v4 = vld [vmem:[#allocation3_spill] sm:$0xff]  ;;  %v746_v3 = vrot.slane %v3822_v47, 2 }
 0x104   : > { %v1103_v14 = vadd.f32 %v1017_v11, %v950_v38  ;;  %v747_v9 = vrot.slane %v3826_v4, 2 }
 0x105   : > { %2059 = vmatmul.msk.f32.gmra.mxu1 %vm330_vm1, %v2656_v22  ;;  %v1177_v33 = vpop.f32.mrf.mxu0 }
 0x106   : > { %v3107_v39 = vadd.f32 %v1174_v51, %v1103_v14  ;;  %2092 = vmatmul.msk.f32.gmra.mxu2 %vm330_vm1, %v3103_v57  ;;  %v3118_v51 = vsel %vm685_vm2, %v742_v30, %v744_v49  ;;  %v3827_v30 = vld [vmem:[#allocation9_spill] sm:$0xff] }
 0x107   : > { %2125 = vmatmul.msk.f32.gmra.mxu3 %vm330_vm1, %v3822_v47 }
 0x108   : > { %3821 = vst [vmem:[#allocation29_spill] sm:$0xff] %v3107_v39  ;;  %2158 = vmatmul.msk.f32.gmra.mxu0 %vm330_vm1, %v3824_v34 }
 0x109   : > { %v867_v56 = vpop.f32.mrf.mxu2 }
 0x10a   : > { %v1020_v11 = vpop.f32.mrf.mxu3  ;;  %v951_v38 = vadd.f32 %v867_v56, %v608_v21  ;;  %v610_v22 = vpop.f32.mrf.mxu1 }
 0x10b   : > { %v611_v49 = vadd.f32 %v610_v22, %v2997_v35  ;;  %v3830_v35 = vld [vmem:[#allocation10_spill] sm:$0xff] }
 0x10c   : > { %v1104_v14 = vadd.f32 %v1020_v11, %v951_v38  ;;  %v3134_v11 = vsel %vm685_vm2, %v746_v3, %v747_v9  ;;  %v3831_v22 = vld [vmem:[#allocation6_spill] sm:$0xff] }
 0x10d   : > { %2060 = vmatmul.msk.f32.gmra.mxu1 %vm330_vm1, %v3820_v36  ;;  %v1180_v39 = vpop.f32.mrf.mxu0  ;;  %3828 = vst [vmem:[#allocation2_spill] sm:$0xff] %v3134_v11 }
 0x10e   : > { %v3122_v20 = vadd.f32 %v1177_v33, %v1104_v14  ;;  %2093 = vmatmul.msk.f32.gmra.mxu2 %vm330_vm1, %v3118_v51 }
 0x10f   : > { %2126 = vmatmul.msk.f32.gmra.mxu3 %vm330_vm1, %v3826_v4 }
 0x110   : > { %3825 = vst [vmem:[#allocation25_spill] sm:$0xff] %v3122_v20  ;;  %2159 = vmatmul.msk.f32.gmra.mxu0 %vm330_vm1, %v3827_v30  ;;  %v749_v30 = vrot.slane %v3831_v22, 2 }
 0x111   : > { %v870_v21 = vpop.f32.mrf.mxu2 }
 0x112   : > { %v1023_v36 = vpop.f32.mrf.mxu3  ;;  %v952_v56 = vadd.f32 %v870_v21, %v611_v49  ;;  %v613_v33 = vpop.f32.mrf.mxu1  ;;  %v3832_v21 = vld [vmem:[#allocation13_spill] sm:$0xff] }
 0x113   : > { %v614_v49 = vadd.f32 %v613_v33, %v2847_v31  ;;  %v3834_v31 = vld [vmem:[#allocation11_spill] sm:$0xff]  ;;  %v751_v33 = vrot.slane %v3830_v35, 2 }
 0x114   : > { %v1105_v38 = vadd.f32 %v1023_v36, %v952_v56  ;;  %v752_v22 = vrot.slane %v3834_v31, 2 }
 0x115   : > { %2061 = vmatmul.msk.f32.gmra.mxu1 %vm330_vm1, %v3822_v47  ;;  %v1183_v14 = vpop.f32.mrf.mxu0 }
 0x116   : > { %v3138_v20 = vadd.f32 %v1180_v39, %v1105_v38  ;;  %2094 = vmatmul.msk.f32.gmra.mxu2 %vm330_vm1, %v3134_v11  ;;  %v3149_v39 = vsel %vm685_vm2, %v747_v9, %v749_v30  ;;  %v3835_v30 = vld [vmem:[#allocation16_spill] sm:$0xff] }
 0x117   : > { %2127 = vmatmul.msk.f32.gmra.mxu3 %vm330_vm1, %v3830_v35 }
 0x118   : > { %3829 = vst [vmem:[#allocation31_spill] sm:$0xff] %v3138_v20  ;;  %2160 = vmatmul.msk.f32.gmra.mxu0 %vm330_vm1, %v3832_v21 }
 0x119   : > { %v873_v3 = vpop.f32.mrf.mxu2 }
 0x11a   : > { %v1026_v36 = vpop.f32.mrf.mxu3  ;;  %v953_v56 = vadd.f32 %v873_v3, %v614_v49  ;;  %v616_v47 = vpop.f32.mrf.mxu1 }
 0x11b   : > { %v617_v9 = vadd.f32 %v616_v47, %v2867_v46  ;;  %v3838_v46 = vld [vmem:[#allocation17_spill] sm:$0xff]  ;;  %v3839_v47 = vld [vmem:[#allocation14_spill] sm:$0xff] }
 0x11c   : > { %v1106_v38 = vadd.f32 %v1026_v36, %v953_v56  ;;  %v3165_v36 = vsel %vm685_vm2, %v751_v33, %v752_v22 }
 0x11d   : > { %2062 = vmatmul.msk.f32.gmra.mxu1 %vm330_vm1, %v3826_v4  ;;  %v1186_v20 = vpop.f32.mrf.mxu0  ;;  %3836 = vst [vmem:[#allocation3_spill] sm:$0xff] %v3165_v36 }
 0x11e   : > { %v3153_v11 = vadd.f32 %v1183_v14, %v1106_v38  ;;  %2095 = vmatmul.msk.f32.gmra.mxu2 %vm330_vm1, %v3149_v39 }
 0x11f   : > { %2128 = vmatmul.msk.f32.gmra.mxu3 %vm330_vm1, %v3834_v31 }
 0x120   : > { %3833 = vst [vmem:[#allocation5_spill] sm:$0xff] %v3153_v11  ;;  %2161 = vmatmul.msk.f32.gmra.mxu0 %vm330_vm1, %v3835_v30  ;;  %v754_v30 = vrot.slane %v3839_v47, 2 }
 0x121   : > { %v876_v49 = vpop.f32.mrf.mxu2 }
 0x122   : > { %v1029_v4 = vpop.f32.mrf.mxu3  ;;  %v954_v3 = vadd.f32 %v876_v49, %v617_v9  ;;  %v619_v14 = vpop.f32.mrf.mxu1  ;;  %v3840_v49 = vld [vmem:[#allocation20_spill] sm:$0xff] }
 0x123   : > { %v620_v9 = vadd.f32 %v619_v14, %v2888_v6  ;;  %v3842_v6 = vld [vmem:[#allocation18_spill] sm:$0xff]  ;;  %v756_v14 = vrot.slane %v3838_v46, 2 }
 0x124   : > { %v1107_v56 = vadd.f32 %v1029_v4, %v954_v3  ;;  %v757_v47 = vrot.slane %v3842_v6, 2 }
 0x125   : > { %2063 = vmatmul.msk.f32.gmra.mxu1 %vm330_vm1, %v3830_v35  ;;  %v1189_v38 = vpop.f32.mrf.mxu0 }
 0x126   : > { %v3169_v11 = vadd.f32 %v1186_v20, %v1107_v56  ;;  %2096 = vmatmul.msk.f32.gmra.mxu2 %vm330_vm1, %v3165_v36  ;;  %v3180_v20 = vsel %vm685_vm2, %v752_v22, %v754_v30  ;;  %v3843_v30 = vld [vmem:[#allocation24_spill] sm:$0xff] }
 0x127   : > { %2129 = vmatmul.msk.f32.gmra.mxu3 %vm330_vm1, %v3838_v46 }
 0x128   : > { %3837 = vst [vmem:[#allocation10_spill] sm:$0xff] %v3169_v11  ;;  %2162 = vmatmul.msk.f32.gmra.mxu0 %vm330_vm1, %v3840_v49 }
 0x129   : > { %v879_v33 = vpop.f32.mrf.mxu2 }
 0x12a   : > { %v1032_v4 = vpop.f32.mrf.mxu3  ;;  %v955_v3 = vadd.f32 %v879_v33, %v620_v9  ;;  %v622_v35 = vpop.f32.mrf.mxu1 }
 0x12b   : > { %v623_v22 = vadd.f32 %v622_v35, %v2908_v1  ;;  %v3846_v1 = vld [vmem:[#allocation26_spill] sm:$0xff] }
 0x12c   : > { %v1108_v56 = vadd.f32 %v1032_v4, %v955_v3  ;;  %v3196_v4 = vsel %vm685_vm2, %v756_v14, %v757_v47  ;;  %v3847_v35 = vld [vmem:[#allocation22_spill] sm:$0xff] }
 0x12d   : > { %2064 = vmatmul.msk.f32.gmra.mxu1 %vm330_vm1, %v3834_v31  ;;  %v1192_v11 = vpop.f32.mrf.mxu0  ;;  %3844 = vst [vmem:[#allocation13_spill] sm:$0xff] %v3196_v4  ;;  %v3848_v14 = vld [vmem:[#allocation30_spill] sm:$0xff] }
 0x12e   : > { %v3184_v36 = vadd.f32 %v1189_v38, %v1108_v56  ;;  %2097 = vmatmul.msk.f32.gmra.mxu2 %vm330_vm1, %v3180_v20 }
 0x12f   : > { %2130 = vmatmul.msk.f32.gmra.mxu3 %vm330_vm1, %v3842_v6 }
 0x130   : > { %3841 = vst [vmem:[#allocation6_spill] sm:$0xff] %v3184_v36  ;;  %2163 = vmatmul.msk.f32.gmra.mxu0 %vm330_vm1, %v3843_v30 }
 0x131   : > { %v882_v9 = vpop.f32.mrf.mxu2 }
 0x132   : > { %v1035_v31 = vpop.f32.mrf.mxu3  ;;  %v956_v33 = vadd.f32 %v882_v9, %v623_v22  ;;  %v625_v38 = vpop.f32.mrf.mxu1  ;;  %v759_v22 = vrot.slane %v3847_v35, 2  ;;  %v761_v35 = vrot.slane %v3846_v1, 2 }
 0x133   : > { %v626_v9 = vadd.f32 %v625_v38, %v2929_v37  ;;  %v3850_v37 = vld [vmem:[#allocation27_spill] sm:$0xff] }
 0x134   : > { %v1109_v3 = vadd.f32 %v1035_v31, %v956_v33  ;;  %v3222_v38 = vld [vmem:[%s2391_s24 + $0x188] sm:$0xff] }
 0x135   : > { %2065 = vmatmul.msk.f32.gmra.mxu1 %vm330_vm1, %v3838_v46  ;;  %v1195_v56 = vpop.f32.mrf.mxu0 }
 0x136   : > { %v3200_v36 = vadd.f32 %v1192_v11, %v1109_v3  ;;  %2098 = vmatmul.msk.f32.gmra.mxu2 %vm330_vm1, %v3196_v4  ;;  %v3211_v3 = vsel %vm685_vm2, %v757_v47, %v759_v22  ;;  %v762_v47 = vrot.slane %v3850_v37, 2 }
 0x137   : > { %2131 = vmatmul.msk.f32.gmra.mxu3 %vm330_vm1, %v3846_v1 }
 0x138   : > { %3845 = vst [vmem:[#allocation11_spill] sm:$0xff] %v3200_v36  ;;  %2164 = vmatmul.msk.f32.gmra.mxu0 %vm330_vm1, %v3848_v14 }
 0x139   : > { %v885_v31 = vpop.f32.mrf.mxu2 }
 0x13a   : > { %v1038_v46 = vpop.f32.mrf.mxu3  ;;  %v957_v33 = vadd.f32 %v885_v31, %v626_v9  ;;  %v628_v11 = vpop.f32.mrf.mxu1  ;;  %v3228_v9 = vld [vmem:[%s2391_s24 + $0x180] sm:$0xff]  ;;  %v1132_v31 = vrot.slane %v3222_v38, 1 }
 0x13b   : > { %v629_v22 = vadd.f32 %v628_v11, %v2949_v53  ;;  %3851 = vst [vmem:[#allocation14_spill] sm:$0xff] %v3228_v9 }
 0x13c   : > { %v1110_v36 = vadd.f32 %v1038_v46, %v957_v33 }
 0x13d   : > { %2066 = vmatmul.msk.f32.gmra.mxu1 %vm330_vm1, %v3842_v6  ;;  %v1198_v30 = vpop.f32.mrf.mxu0 }
 0x13e   : > { %v3215_v4 = vadd.f32 %v1195_v56, %v1110_v36  ;;  %2099 = vmatmul.msk.f32.gmra.mxu2 %vm330_vm1, %v3211_v3  ;;  %v1131_v56 = vrot.slane %v3228_v9, 1 }
 0x13f   : > { %2132 = vmatmul.msk.f32.gmra.mxu3 %vm330_vm1, %v3850_v37 }
 0x140   : > { %3849 = vst [vmem:[#allocation17_spill] sm:$0xff] %v3215_v4  ;;  %2165 = vmatmul.msk.f32.gmra.mxu0 %vm330_vm1, %v2738_v24  ;;  %v3235_v4 = vsel %vm685_vm2, %v761_v35, %v762_v47  ;;  %v3240_v11 = vsel %vm247_vm0, %v1131_v56, %v1132_v31  ;;  %v764_v35 = vrot.slane %v2711_v15, 2 }
 0x141   : > { %v888_v36 = vpop.f32.mrf.mxu2 }
 0x142   : > { %v1041_v6 = vpop.f32.mrf.mxu3  ;;  %v958_v46 = vadd.f32 %v888_v36, %v629_v22  ;;  %v631_v33 = vpop.f32.mrf.mxu1  ;;  %v3249_v22 = vld [vmem:[%s2391_s24 + $0x190] sm:$0x3] }
 0x143   : > { %v632_v36 = vadd.f32 %v631_v33, %v2970_v8 }
 0x144   : > { %v1111_v14 = vadd.f32 %v1041_v6, %v958_v46  ;;  %v3257_v46 = vsel %vm685_vm2, %v762_v47, %v764_v35 }
 0x145   : > { %2067 = vmatmul.msk.f32.gmra.mxu1 %vm330_vm1, %v3846_v1  ;;  %v1201_v53 = vpop.f32.mrf.mxu0 }
 0x146   : > { %v3242_v24 = vadd.f32 %v1198_v30, %v1111_v14  ;;  %2100 = vmatmul.msk.f32.gmra.mxu2 %vm330_vm1, %v3235_v4  ;;  %v1134_v30 = vrot.slane %v3249_v22, 1 }
 0x147   : > { %2133 = vmatmul.msk.f32.gmra.mxu3 %vm330_vm1, %v3228_v9 }
 0x148   : > { %3852 = vst [vmem:[#allocation20_spill] sm:$0xff] %v3242_v24  ;;  %2166 = vmatmul.msk.f32.gmra.mxu0 %vm330_vm1, %v3240_v11  ;;  %v3262_v15 = vsel %vm247_vm0, %v1132_v31, %v1134_v30 }
 0x149   : > { %v891_v1 = vpop.f32.mrf.mxu2 }
 0x14a   : > { %v1044_v6 = vpop.f32.mrf.mxu3  ;;  %v959_v14 = vadd.f32 %v891_v1, %v632_v36  ;;  %v634_v56 = vpop.f32.mrf.mxu1 }
 0x14b   : > { %v635_v33 = vadd.f32 %v634_v56, %v2990_v5 }
 0x14c   : > { %v1112_v24 = vadd.f32 %v1044_v6, %v959_v14 }
 0x14d   : > { %2068 = vmatmul.msk.f32.gmra.mxu1 %vm330_vm1, %v3850_v37  ;;  %v1204_v9 = vpop.f32.mrf.mxu0 }
 0x14e   : > { %v3264_v8 = vadd.f32 %v1201_v53, %v1112_v24  ;;  %2101 = vmatmul.msk.f32.gmra.mxu2 %vm330_vm1, %v3257_v46 }
 0x14f   : > { %2134 = vmatmul.msk.f32.gmra.mxu3 %vm330_vm1, %v3222_v38 }
 0x150   : > { %2167 = vmatmul.msk.f32.gmra.mxu0 %vm330_vm1, %v3262_v15 }
 0x151   : > { %v894_v47 = vpop.f32.mrf.mxu2 }
 0x152   : > { %v1047_v35 = vpop.f32.mrf.mxu3  ;;  %v960_v37 = vadd.f32 %v894_v47, %v635_v33  ;;  %v637_v36 = vpop.f32.mrf.mxu1 }
 0x153   : > { %v638_v5 = vadd.f32 %v637_v36, %v2863_v45 }
 0x154   : > { %v1113_v1 = vadd.f32 %v1047_v35, %v960_v37 }
 0x155   : > { %2169 = vmatmul.msk.f32.vlgmr.msra.gmra.mxu1 %vm330_vm1, %v2773_v28  ;;  %v1207_v24 = vpop.f32.mrf.mxu0 }
 0x156   : > { %v3275_v31 = vadd.f32 %v1204_v9, %v1113_v1  ;;  %2202 = vmatmul.msk.f32.vlgmr.msra.gmra.mxu2 %vm330_vm1, %v2582_v27 }
 0x157   : > { %2235 = vmatmul.msk.f32.vlgmr.msra.gmra.mxu3 %vm330_vm1, %v2616_v60 }
 0x158   : > { %2268 = vmatmul.msk.f32.vlgmr.msra.gmra.mxu0 %vm330_vm1, %v2798_v61 }
 0x159   : > { %v897_v53 = vpop.f32.mrf.mxu2 }
 0x15a   : > { %v1050_v6 = vpop.f32.mrf.mxu3  ;;  %v961_v30 = vadd.f32 %v897_v53, %v638_v5  ;;  %v640_v14 = vpop.f32.mrf.mxu1 }
 0x15b   : > { %v641_v27 = vadd.f32 %v640_v14, %v2884_v43 }
 0x15c   : > { %v1114_v56 = vadd.f32 %v1050_v6, %v961_v30 }
 0x15d   : > { %2170 = vmatmul.msk.f32.gmra.mxu1 %vm330_vm1, %v2785_v59  ;;  %v1210_v28 = vpop.f32.mrf.mxu0 }
 0x15e   : > { %v3286_v9 = vadd.f32 %v1207_v24, %v1114_v56  ;;  %2203 = vmatmul.msk.f32.gmra.mxu2 %vm330_vm1, %v2585_v29 }
 0x15f   : > { %2236 = vmatmul.msk.f32.gmra.mxu3 %vm330_vm1, %v2670_v25 }
 0x160   : > { %2269 = vmatmul.msk.f32.gmra.mxu0 %vm330_vm1, %v2810_v44 }
 0x161   : > { %v900_v60 = vpop.f32.mrf.mxu2 }
 0x162   : > { %v1053_v45 = vpop.f32.mrf.mxu3  ;;  %v962_v33 = vadd.f32 %v900_v60, %v641_v27  ;;  %v643_v47 = vpop.f32.mrf.mxu1 }
 0x163   : > { %v644_v29 = vadd.f32 %v643_v47, %v2904_v40  ;;  %v2316_v47 = vld [vmem:[%s2391_s24 + $0x68] sm:$0xff] }
 0x164   : > { %v1115_v35 = vadd.f32 %v1053_v45, %v962_v33 }
 0x165   : > { %2171 = vmatmul.msk.f32.gmra.mxu1 %vm330_vm1, %v2798_v61  ;;  %v1213_v59 = vpop.f32.mrf.mxu0 }
 0x166   : > { %v3297_v37 = vadd.f32 %v1210_v28, %v1115_v35  ;;  %2204 = vmatmul.msk.f32.gmra.mxu2 %vm330_vm1, %v2679_v63 }
 0x167   : > { %2237 = vmatmul.msk.f32.gmra.mxu3 %vm330_vm1, %v2716_v12 }
 0x168   : > { %2270 = vmatmul.msk.f32.gmra.mxu0 %vm330_vm1, %v2823_v62 }
 0x169   : > { %v903_v25 = vpop.f32.mrf.mxu2 }
 0x16a   : > { %v1056_v43 = vpop.f32.mrf.mxu3  ;;  %v963_v36 = vadd.f32 %v903_v25, %v644_v29  ;;  %v646_v1 = vpop.f32.mrf.mxu1 }
 0x16b   : > { %v647_v12 = vadd.f32 %v646_v1, %v2925_v16  ;;  %v3853_v16 = vld [vmem:[#allocation34_spill] sm:$0xff] }
 0x16c   : > { %v1116_v24 = vadd.f32 %v1056_v43, %v963_v36 }
 0x16d   : > { %2172 = vmatmul.msk.f32.gmra.mxu1 %vm330_vm1, %v2810_v44  ;;  %v1216_v61 = vpop.f32.mrf.mxu0 }
 0x16e   : > { %v3308_v5 = vadd.f32 %v1213_v59, %v1116_v24  ;;  %2205 = vmatmul.msk.f32.gmra.mxu2 %vm330_vm1, %v2682_v32  ;;  %v2315_v32 = vld [vmem:[%s2391_s24 + $0x60] sm:$0xff]  ;;  %v3856_v59 = vld [vmem:[#allocation36_spill] sm:$0xff] }
 0x16f   : > { %2238 = vmatmul.msk.f32.gmra.mxu3 %vm330_vm1, %v2743_v41 }
 0x170   : > { %2271 = vmatmul.msk.f32.gmra.mxu0 %vm330_vm1, %v2835_v55 }
 0x171   : > { %v906_v63 = vpop.f32.mrf.mxu2 }
 0x172   : > { %v1059_v40 = vpop.f32.mrf.mxu3  ;;  %v964_v53 = vadd.f32 %v906_v63, %v647_v12  ;;  %v649_v6 = vpop.f32.mrf.mxu1  ;;  %v3857_v12 = vld [vmem:[#allocation12_spill] sm:$0xff] }
 0x173   : > { %v650_v41 = vadd.f32 %v649_v6, %v2945_v42  ;;  %v3855_v42 = vld [vmem:[#allocation45_spill] sm:$0xff]  ;;  %v3858_v63 = vld [vmem:[#allocation48_spill] sm:$0xff] }
 0x174   : > { %v1117_v30 = vadd.f32 %v1059_v40, %v964_v53  ;;  %v3859_v53 = vld [vmem:[#allocation38_spill] sm:$0xff] }
 0x175   : > { %2173 = vmatmul.msk.f32.gmra.mxu1 %vm330_vm1, %v2823_v62  ;;  %v1219_v44 = vpop.f32.mrf.mxu0 }
 0x176   : > { %v3319_v14 = vadd.f32 %v1216_v61, %v1117_v30  ;;  %2206 = vmatmul.msk.f32.gmra.mxu2 %vm330_vm1, %v2315_v32  ;;  %v2317_v61 = vld [vmem:[%s2391_s24 + $0x78] sm:$0xff] }
 0x177   : > { %2239 = vmatmul.msk.f32.gmra.mxu3 %vm330_vm1, %v2424_v19  ;;  %v3854_v19 = vld [vmem:[#allocation7_spill] sm:$0xff] }
 0x178   : > { %2272 = vmatmul.msk.f32.gmra.mxu0 %vm330_vm1, %v3853_v16 }
 0x179   : > { %v909_v56 = vpop.f32.mrf.mxu2 }
 0x17a   : > { %v1062_v28 = vpop.f32.mrf.mxu3  ;;  %v965_v27 = vadd.f32 %v909_v56, %v650_v41  ;;  %v652_v60 = vpop.f32.mrf.mxu1 }
 0x17b   : > { %v653_v35 = vadd.f32 %v652_v60, %v3855_v42  ;;  %v3861_v60 = vld [vmem:[#allocation51_spill] sm:$0xff] }
 0x17c   : > { %v1118_v62 = vadd.f32 %v1062_v28, %v965_v27  ;;  %v2318_v28 = vld [vmem:[%s2391_s24 + $0x80] sm:$0xff]  ;;  %v3860_v27 = vld [vmem:[#allocation15_spill] sm:$0xff] }
 0x17d   : > { %2174 = vmatmul.msk.f32.gmra.mxu1 %vm330_vm1, %v2835_v55  ;;  %v1222_v45 = vpop.f32.mrf.mxu0 }
 0x17e   : > { %v3330_v33 = vadd.f32 %v1219_v44, %v1118_v62  ;;  %2207 = vmatmul.msk.f32.gmra.mxu2 %vm330_vm1, %v2316_v47 }
 0x17f   : > { %2240 = vmatmul.msk.f32.gmra.mxu3 %vm330_vm1, %v3854_v19 }
 0x180   : > { %2273 = vmatmul.msk.f32.gmra.mxu0 %vm330_vm1, %v3856_v59 }
 0x181   : > { %v912_v29 = vpop.f32.mrf.mxu2 }
 0x182   : > { %v1065_v25 = vpop.f32.mrf.mxu3  ;;  %v966_v43 = vadd.f32 %v912_v29, %v653_v35  ;;  %v655_v36 = vpop.f32.mrf.mxu1 }
 0x183   : > { %v656_v40 = vadd.f32 %v655_v36, %v3858_v63  ;;  %v3863_v36 = vld [vmem:[#allocation19_spill] sm:$0xff] }
 0x184   : > { %v1119_v55 = vadd.f32 %v1065_v25, %v966_v43  ;;  %v2319_v43 = vld [vmem:[%s2391_s24 + $0x90] sm:$0xff] }
 0x185   : > { %2175 = vmatmul.msk.f32.gmra.mxu1 %vm330_vm1, %v3853_v16  ;;  %v1225_v1 = vpop.f32.mrf.mxu0 }
 0x186   : > { %v3341_v24 = vadd.f32 %v1222_v45, %v1119_v55  ;;  %2208 = vmatmul.msk.f32.gmra.mxu2 %vm330_vm1, %v2317_v61  ;;  %v3862_v45 = vld [vmem:[#allocation40_spill] sm:$0xff]  ;;  %v3864_v55 = vld [vmem:[#allocation35_spill] sm:$0xff]  ;;  %v3865_v61 = vld [vmem:[#allocation42_spill] sm:$0xff] }
 0x187   : > { %2241 = vmatmul.msk.f32.gmra.mxu3 %vm330_vm1, %v3857_v12 }
 0x188   : > { %2274 = vmatmul.msk.f32.gmra.mxu0 %vm330_vm1, %v3859_v53 }
 0x189   : > { %v915_v6 = vpop.f32.mrf.mxu2 }
 0x18a   : > { %v1068_v30 = vpop.f32.mrf.mxu3  ;;  %v967_v44 = vadd.f32 %v915_v6, %v656_v40  ;;  %v658_v32 = vpop.f32.mrf.mxu1 }
 0x18b   : > { %v659_v62 = vadd.f32 %v658_v32, %v3861_v60  ;;  %v2320_v32 = vld [vmem:[%s2391_s24 + $0x98] sm:$0xff] }
 0x18c   : > { %v1120_v41 = vadd.f32 %v1068_v30, %v967_v44 }
 0x18d   : > { %2176 = vmatmul.msk.f32.gmra.mxu1 %vm330_vm1, %v3856_v59  ;;  %v1228_v16 = vpop.f32.mrf.mxu0 }
 0x18e   : > { %v3352_v56 = vadd.f32 %v1225_v1, %v1120_v41  ;;  %2209 = vmatmul.msk.f32.gmra.mxu2 %vm330_vm1, %v2318_v28  ;;  %v3866_v41 = vld [vmem:[#allocation23_spill] sm:$0xff] }
 0x18f   : > { %2242 = vmatmul.msk.f32.gmra.mxu3 %vm330_vm1, %v3860_v27  ;;  %v3868_v27 = vld [vmem:[#allocation44_spill] sm:$0xff] }
 0x190   : > { %2275 = vmatmul.msk.f32.gmra.mxu0 %vm330_vm1, %v3862_v45 }
 0x191   : > { %v918_v47 = vpop.f32.mrf.mxu2 }
 0x192   : > { %v1071_v19 = vpop.f32.mrf.mxu3  ;;  %v968_v42 = vadd.f32 %v918_v47, %v659_v62  ;;  %v661_v35 = vpop.f32.mrf.mxu1 }
 0x193   : > { %v662_v1 = vadd.f32 %v661_v35, %v3864_v55  ;;  %v3871_v55 = vld [vmem:[#allocation47_spill] sm:$0xff] }
 0x194   : > { %v1121_v59 = vadd.f32 %v1071_v19, %v968_v42 }
 0x195   : > { %2177 = vmatmul.msk.f32.gmra.mxu1 %vm330_vm1, %v3859_v53  ;;  %v1231_v29 = vpop.f32.mrf.mxu0 }
 0x196   : > { %v3363_v25 = vadd.f32 %v1228_v16, %v1121_v59  ;;  %2210 = vmatmul.msk.f32.gmra.mxu2 %vm330_vm1, %v2319_v43  ;;  %v3867_v16 = vld [vmem:[#allocation37_spill] sm:$0xff]  ;;  %v2321_v59 = vld [vmem:[%s2391_s24 + $0xa8] sm:$0xff] }
 0x197   : > { %2243 = vmatmul.msk.f32.gmra.mxu3 %vm330_vm1, %v3863_v36  ;;  %v3870_v43 = vld [vmem:[#allocation39_spill] sm:$0xff] }
 0x198   : > { %2276 = vmatmul.msk.f32.gmra.mxu0 %vm330_vm1, %v3865_v61 }
 0x199   : > { %v921_v12 = vpop.f32.mrf.mxu2 }
 0x19a   : > { %v1074_v63 = vpop.f32.mrf.mxu3  ;;  %v969_v40 = vadd.f32 %v921_v12, %v662_v1  ;;  %v664_v6 = vpop.f32.mrf.mxu1 }
 0x19b   : > { %v665_v28 = vadd.f32 %v664_v6, %v3867_v16 }
 0x19c   : > { %v1122_v53 = vadd.f32 %v1074_v63, %v969_v40 }
 0x19d   : > { %2178 = vmatmul.msk.f32.gmra.mxu1 %vm330_vm1, %v3862_v45  ;;  %v1234_v30 = vpop.f32.mrf.mxu0 }
 0x19e   : > { %v3374_v44 = vadd.f32 %v1231_v29, %v1122_v53  ;;  %2211 = vmatmul.msk.f32.gmra.mxu2 %vm330_vm1, %v2320_v32  ;;  %v3869_v29 = vld [vmem:[#allocation28_spill] sm:$0xff] }
 0x19f   : > { %2244 = vmatmul.msk.f32.gmra.mxu3 %vm330_vm1, %v3866_v41  ;;  %v3872_v32 = vld [vmem:[#allocation32_spill] sm:$0xff]  ;;  %v3873_v41 = vld [vmem:[#allocation41_spill] sm:$0xff] }
 0x1a0   : > { %2277 = vmatmul.msk.f32.gmra.mxu0 %vm330_vm1, %v3868_v27 }
 0x1a1   : > { %v924_v60 = vpop.f32.mrf.mxu2 }
 0x1a2   : > { %v1077_v62 = vpop.f32.mrf.mxu3  ;;  %v970_v47 = vadd.f32 %v924_v60, %v665_v28  ;;  %v667_v19 = vpop.f32.mrf.mxu1  ;;  %v3874_v28 = vld [vmem:[#allocation50_spill] sm:$0xff] }
 0x1a3   : > { %v668_v36 = vadd.f32 %v667_v19, %v3870_v43  ;;  %v3876_v43 = vld [vmem:[#allocation43_spill] sm:$0xff] }
 0x1a4   : > { %v1123_v45 = vadd.f32 %v1077_v62, %v970_v47 }
 0x1a5   : > { %2179 = vmatmul.msk.f32.gmra.mxu1 %vm330_vm1, %v3865_v61  ;;  %v1237_v42 = vpop.f32.mrf.mxu0 }
 0x1a6   : > { %v3385_v35 = vadd.f32 %v1234_v30, %v1123_v45  ;;  %2212 = vmatmul.msk.f32.gmra.mxu2 %vm330_vm1, %v2321_v59  ;;  %v2322_v30 = vld [vmem:[%s2391_s24 + $0xb0] sm:$0xff]  ;;  %v2323_v59 = vld [vmem:[%s2391_s24 + $0xc0] sm:$0xff] }
 0x1a7   : > { %2245 = vmatmul.msk.f32.gmra.mxu3 %vm330_vm1, %v3869_v29  ;;  %v3875_v29 = vld [vmem:[#allocation4_spill] sm:$0xff] }
 0x1a8   : > { %2278 = vmatmul.msk.f32.gmra.mxu0 %vm330_vm1, %v3871_v55 }
 0x1a9   : > { %v927_v1 = vpop.f32.mrf.mxu2 }
 0x1aa   : > { %v1080_v12 = vpop.f32.mrf.mxu3  ;;  %v971_v63 = vadd.f32 %v927_v1, %v668_v36  ;;  %v670_v40 = vpop.f32.mrf.mxu1  ;;  %v3877_v1 = vld [vmem:[#allocation53_spill] sm:$0xff] }
 0x1ab   : > { %v671_v16 = vadd.f32 %v670_v40, %v3873_v41  ;;  %v3878_v41 = vld [vmem:[#allocation8_spill] sm:$0xff] }
 0x1ac   : > { %v1124_v61 = vadd.f32 %v1080_v12, %v971_v63 }
 0x1ad   : > { %2180 = vmatmul.msk.f32.gmra.mxu1 %vm330_vm1, %v3868_v27  ;;  %v1240_v6 = vpop.f32.mrf.mxu0 }
 0x1ae   : > { %v3396_v53 = vadd.f32 %v1237_v42, %v1124_v61  ;;  %2213 = vmatmul.msk.f32.gmra.mxu2 %vm330_vm1, %v2322_v30 }
 0x1af   : > { %2246 = vmatmul.msk.f32.gmra.mxu3 %vm330_vm1, %v3872_v32  ;;  %v2324_v32 = vld [vmem:[%s2391_s24 + $0xc8] sm:$0xff] }
 0x1b0   : > { %2279 = vmatmul.msk.f32.gmra.mxu0 %vm330_vm1, %v3874_v28 }
 0x1b1   : > { %v930_v60 = vpop.f32.mrf.mxu2 }
 0x1b2   : > { %v1083_v62 = vpop.f32.mrf.mxu3  ;;  %v972_v47 = vadd.f32 %v930_v60, %v671_v16  ;;  %v673_v19 = vpop.f32.mrf.mxu1  ;;  %v3879_v16 = vld [vmem:[#allocation46_spill] sm:$0xff] }
 0x1b3   : > { %v674_v36 = vadd.f32 %v673_v19, %v3876_v43  ;;  %v3880_v43 = vld [vmem:[#allocation49_spill] sm:$0xff] }
 0x1b4   : > { %v1125_v27 = vadd.f32 %v1083_v62, %v972_v47 }
 0x1b5   : > { %2181 = vmatmul.msk.f32.gmra.mxu1 %vm330_vm1, %v3871_v55  ;;  %v1243_v45 = vpop.f32.mrf.mxu0 }
 0x1b6   : > { %v3407_v42 = vadd.f32 %v1240_v6, %v1125_v27  ;;  %2214 = vmatmul.msk.f32.gmra.mxu2 %vm330_vm1, %v2323_v59 }
 0x1b7   : > { %2247 = vmatmul.msk.f32.gmra.mxu3 %vm330_vm1, %v3875_v29  ;;  %v2325_v29 = vld [vmem:[%s2391_s24 + $0xd8] sm:$0xff] }
 0x1b8   : > { %2280 = vmatmul.msk.f32.gmra.mxu0 %vm330_vm1, %v3877_v1 }
 0x1b9   : > { %v933_v12 = vpop.f32.mrf.mxu2 }
 0x1ba   : > { %v1086_v63 = vpop.f32.mrf.mxu3  ;;  %v973_v40 = vadd.f32 %v933_v12, %v674_v36  ;;  %v676_v61 = vpop.f32.mrf.mxu1 }
 0x1bb   : > { %v677_v60 = vadd.f32 %v676_v61, %v3879_v16 }
 0x1bc   : > { %v1126_v55 = vadd.f32 %v1086_v63, %v973_v40 }
 0x1bd   : > { %2182 = vmatmul.msk.f32.gmra.mxu1 %vm330_vm1, %v3874_v28  ;;  %v1246_v6 = vpop.f32.mrf.mxu0 }
 0x1be   : > { %v3418_v30 = vadd.f32 %v1243_v45, %v1126_v55  ;;  %2215 = vmatmul.msk.f32.gmra.mxu2 %vm330_vm1, %v2324_v32  ;;  %v2326_v32 = vld [vmem:[%s2391_s24 + $0xe0] sm:$0xff] }
 0x1bf   : > { %2248 = vmatmul.msk.f32.gmra.mxu3 %vm330_vm1, %v3878_v41 }
 0x1c0   : > { %2281 = vmatmul.msk.f32.gmra.mxu0 %vm330_vm1, %v3025_v7 }
 0x1c1   : > { %v936_v62 = vpop.f32.mrf.mxu2 }
 0x1c2   : > { %v1089_v47 = vpop.f32.mrf.mxu3  ;;  %v974_v19 = vadd.f32 %v936_v62, %v677_v60  ;;  %v679_v27 = vpop.f32.mrf.mxu1 }
 0x1c3   : > { %v680_v36 = vadd.f32 %v679_v27, %v3880_v43 }
 0x1c4   : > { %v1127_v28 = vadd.f32 %v1089_v47, %v974_v19 }
 0x1c5   : > { %2183 = vmatmul.msk.f32.gmra.mxu1 %vm330_vm1, %v3877_v1  ;;  %v1249_v45 = vpop.f32.mrf.mxu0 }
 0x1c6   : > { %v3429_v59 = vadd.f32 %v1246_v6, %v1127_v28  ;;  %2216 = vmatmul.msk.f32.gmra.mxu2 %vm330_vm1, %v2325_v29  ;;  %v2327_v28 = vld [vmem:[%s2391_s24 + $0xf0] sm:$0xff] }
 0x1c7   : > { %2249 = vmatmul.msk.f32.gmra.mxu3 %vm330_vm1, %v2511_v54  ;;  %v3881_v54 = vld [vmem:[#allocation52_spill] sm:$0xff] }
 0x1c8   : > { %2282 = vmatmul.msk.f32.gmra.mxu0 %vm330_vm1, %v3041_v52 }
 0x1c9   : > { %v939_v12 = vpop.f32.mrf.mxu2 }
 0x1ca   : > { %v1092_v63 = vpop.f32.mrf.mxu3  ;;  %v975_v40 = vadd.f32 %v939_v12, %v680_v36  ;;  %v682_v61 = vpop.f32.mrf.mxu1  ;;  %v2328_v12 = vld [vmem:[%s2391_s24 + $0xf8] sm:$0xff] }
 0x1cb   : > { %v683_v41 = vadd.f32 %v682_v61, %v3881_v54 }
 0x1cc   : > { %v1128_v1 = vadd.f32 %v1092_v63, %v975_v40 }
 0x1cd   : > { %2184 = vmatmul.msk.f32.gmra.mxu1 %vm330_vm1, %v3025_v7  ;;  %v1252_v55 = vpop.f32.mrf.mxu0 }
 0x1ce   : > { %v3440_v6 = vadd.f32 %v1249_v45, %v1128_v1  ;;  %2217 = vmatmul.msk.f32.gmra.mxu2 %vm330_vm1, %v2326_v32 }
 0x1cf   : > { %2250 = vmatmul.msk.f32.gmra.mxu3 %vm330_vm1, %v2547_v2 }
 0x1d0   : > { %2283 = vmatmul.msk.f32.gmra.mxu0 %vm330_vm1, %v3056_v23 }
 0x1d1   : > { %v942_v16 = vpop.f32.mrf.mxu2 }
 0x1d2   : > { %v1095_v60 = vpop.f32.mrf.mxu3  ;;  %v976_v62 = vadd.f32 %v942_v16, %v683_v41  ;;  %v1315_v7 = vpop.f32.mrf.mxu1 }
 0x1d3   : > { %v1411_v2 = vadd.f32 %v1315_v7, %v3029_v18 }
 0x1d4   : > { %v1129_v47 = vadd.f32 %v1095_v60, %v976_v62 }
 0x1d5   : > { %2185 = vmatmul.msk.f32.gmra.mxu1 %vm330_vm1, %v3041_v52  ;;  %v1781_v19 = vpop.f32.mrf.mxu0 }
 0x1d6   : > { %v3451_v27 = vadd.f32 %v1252_v55, %v1129_v47  ;;  %2218 = vmatmul.msk.f32.gmra.mxu2 %vm330_vm1, %v2327_v28 }
 0x1d7   : > { %2251 = vmatmul.msk.f32.gmra.mxu3 %vm330_vm1, %v2599_v48 }
 0x1d8   : > { %2284 = vmatmul.msk.f32.gmra.mxu0 %vm330_vm1, %v3072_v26 }
 0x1d9   : > { %v1468_v45 = vpop.f32.mrf.mxu2 }
 0x1da   : > { %v1625_v29 = vpop.f32.mrf.mxu3  ;;  %v1564_v43 = vadd.f32 %v1468_v45, %v1411_v2  ;;  %v1318_v36 = vpop.f32.mrf.mxu1 }
 0x1db   : > { %v1412_v63 = vadd.f32 %v1318_v36, %v3045_v0 }
 0x1dc   : > { %v1721_v52 = vadd.f32 %v1625_v29, %v1564_v43 }
 0x1dd   : > { %2186 = vmatmul.msk.f32.gmra.mxu1 %vm330_vm1, %v3056_v23  ;;  %v1784_v48 = vpop.f32.mrf.mxu0 }
 0x1de   : > { %v1877_v18 = vadd.f32 %v1781_v19, %v1721_v52  ;;  %2219 = vmatmul.msk.f32.gmra.mxu2 %vm330_vm1, %v2328_v12  ;;  %v3883_v52 = vld [vmem:[#allocation21_spill] sm:$0xff] }
 0x1df   : > { %2252 = vmatmul.msk.f32.gmra.mxu3 %vm330_vm1, %v2644_v58  ;;  %v2329_v58 = vld [vmem:[%s2391_s24 + $0x108] sm:$0xff] }
 0x1e0   : > { %1909 = vst.msk [vmem:[%s3464_s8] sm:$0xff] %vm330_vm1, %v1877_v18  ;;  %2285 = vmatmul.msk.f32.gmra.mxu0 %vm330_vm1, %v3087_v10  ;;  %v3884_v18 = vld [vmem:[#allocation2_spill] sm:$0xff] }
 0x1e1   : > { %v1471_v40 = vpop.f32.mrf.mxu2 }
 0x1e2   : > { %v1628_v61 = vpop.f32.mrf.mxu3  ;;  %v1565_v23 = vadd.f32 %v1471_v40, %v1412_v63  ;;  %v1321_v1 = vpop.f32.mrf.mxu1 }
 0x1e3   : > { %v1413_v0 = vadd.f32 %v1321_v1, %v3060_v50  ;;  %v3882_v50 = vld [vmem:[#allocation54_spill] sm:$0xff] }
 0x1e4   : > { %v1722_v55 = vadd.f32 %v1628_v61, %v1565_v23 }
 0x1e5   : > { %2187 = vmatmul.msk.f32.gmra.mxu1 %vm330_vm1, %v3072_v26  ;;  %v1787_v32 = vpop.f32.mrf.mxu0 }
 0x1e6   : > { %v1878_v54 = vadd.f32 %v1784_v48, %v1722_v55  ;;  %2220 = vmatmul.msk.f32.gmra.mxu2 %vm330_vm1, %v2329_v58  ;;  %v3885_v55 = vld [vmem:[#allocation9_spill] sm:$0xff] }
 0x1e7   : > { %2253 = vmatmul.msk.f32.gmra.mxu3 %vm330_vm1, %v3818_v17  ;;  %v2330_v17 = vld [vmem:[%s2391_s24 + $0x110] sm:$0xff] }
 0x1e8   : > { %1910 = vst.msk [vmem:[%s3464_s8 + $0x8] sm:$0xff] %vm330_vm1, %v1878_v54  ;;  %2286 = vmatmul.msk.f32.gmra.mxu0 %vm330_vm1, %v3103_v57 }
 0x1e9   : > { %v1474_v41 = vpop.f32.mrf.mxu2 }
 0x1ea   : > { %v1631_v16 = vpop.f32.mrf.mxu3  ;;  %v1566_v26 = vadd.f32 %v1474_v41, %v1413_v0  ;;  %v1324_v60 = vpop.f32.mrf.mxu1 }
 0x1eb   : > { %v1414_v19 = vadd.f32 %v1324_v60, %v3882_v50 }
 0x1ec   : > { %v1723_v62 = vadd.f32 %v1631_v16, %v1566_v26 }
 0x1ed   : > { %2188 = vmatmul.msk.f32.gmra.mxu1 %vm330_vm1, %v3087_v10  ;;  %v1790_v7 = vpop.f32.mrf.mxu0 }
 0x1ee   : > { %v1879_v47 = vadd.f32 %v1787_v32, %v1723_v62  ;;  %2221 = vmatmul.msk.f32.gmra.mxu2 %vm330_vm1, %v2330_v17  ;;  %v3886_v32 = vld [vmem:[#allocation29_spill] sm:$0xff]  ;;  %v3888_v17 = vld [vmem:[#allocation3_spill] sm:$0xff] }
 0x1ef   : > { %2254 = vmatmul.msk.f32.gmra.mxu3 %vm330_vm1, %v2735_v13  ;;  %v2331_v13 = vld [vmem:[%s2391_s24 + $0x120] sm:$0xff]  ;;  %v2333_v62 = vld [vmem:[%s2391_s24 + $0x138] sm:$0xff] }
 0x1f0   : > { %1911 = vst.msk [vmem:[%s3464_s8 + $0x10] sm:$0xff] %vm330_vm1, %v1879_v47  ;;  %2287 = vmatmul.msk.f32.gmra.mxu0 %vm330_vm1, %v3118_v51 }
 0x1f1   : > { %v1477_v28 = vpop.f32.mrf.mxu2 }
 0x1f2   : > { %v1634_v2 = vpop.f32.mrf.mxu3  ;;  %v1567_v10 = vadd.f32 %v1477_v28, %v1414_v19  ;;  %v1327_v45 = vpop.f32.mrf.mxu1 }
 0x1f3   : > { %v1415_v48 = vadd.f32 %v1327_v45, %v3883_v52 }
 0x1f4   : > { %v1724_v29 = vadd.f32 %v1634_v2, %v1567_v10 }
 0x1f5   : > { %2189 = vmatmul.msk.f32.gmra.mxu1 %vm330_vm1, %v3103_v57  ;;  %v1793_v43 = vpop.f32.mrf.mxu0 }
 0x1f6   : > { %v1880_v36 = vadd.f32 %v1790_v7, %v1724_v29  ;;  %2222 = vmatmul.msk.f32.gmra.mxu2 %vm330_vm1, %v2331_v13  ;;  %v3887_v7 = vld [vmem:[#allocation25_spill] sm:$0xff] }
 0x1f7   : > { %2255 = vmatmul.msk.f32.gmra.mxu3 %vm330_vm1, %v3824_v34  ;;  %v2332_v34 = vld [vmem:[%s2391_s24 + $0x128] sm:$0xff] }
 0x1f8   : > { %1912 = vst.msk [vmem:[%s3464_s8 + $0x18] sm:$0xff] %vm330_vm1, %v1880_v36  ;;  %2288 = vmatmul.msk.f32.gmra.mxu0 %vm330_vm1, %v3884_v18  ;;  %v3890_v36 = vld [vmem:[#allocation31_spill] sm:$0xff] }
 0x1f9   : > { %v1480_v12 = vpop.f32.mrf.mxu2 }
 0x1fa   : > { %v1637_v63 = vpop.f32.mrf.mxu3  ;;  %v1568_v57 = vadd.f32 %v1480_v12, %v1415_v48  ;;  %v1330_v40 = vpop.f32.mrf.mxu1 }
 0x1fb   : > { %v1416_v54 = vadd.f32 %v1330_v40, %v3886_v32  ;;  %v2335_v40 = vld [vmem:[%s2391_s24 + $0x150] sm:$0xff] }
 0x1fc   : > { %v1725_v61 = vadd.f32 %v1637_v63, %v1568_v57 }
 0x1fd   : > { %2190 = vmatmul.msk.f32.gmra.mxu1 %vm330_vm1, %v3118_v51  ;;  %v1796_v23 = vpop.f32.mrf.mxu0 }
 0x1fe   : > { %v1881_v1 = vadd.f32 %v1793_v43, %v1725_v61  ;;  %2223 = vmatmul.msk.f32.gmra.mxu2 %vm330_vm1, %v2332_v34  ;;  %v3889_v43 = vld [vmem:[#allocation16_spill] sm:$0xff]  ;;  %v3891_v61 = vld [vmem:[#allocation5_spill] sm:$0xff] }
 0x1ff   : > { %2256 = vmatmul.msk.f32.gmra.mxu3 %vm330_vm1, %v3885_v55 }
 0x200   : > { %1913 = vst.msk [vmem:[%s3464_s8 + $0x20] sm:$0xff] %vm330_vm1, %v1881_v1  ;;  %2289 = vmatmul.msk.f32.gmra.mxu0 %vm330_vm1, %v3149_v39  ;;  %v3892_v1 = vld [vmem:[#allocation13_spill] sm:$0xff] }
 0x201   : > { %v1483_v58 = vpop.f32.mrf.mxu2 }
 0x202   : > { %v1640_v0 = vpop.f32.mrf.mxu3  ;;  %v1569_v51 = vadd.f32 %v1483_v58, %v1416_v54  ;;  %v1333_v41 = vpop.f32.mrf.mxu1 }
 0x203   : > { %v1417_v47 = vadd.f32 %v1333_v41, %v3887_v7  ;;  %v3893_v41 = vld [vmem:[#allocation24_spill] sm:$0xff] }
 0x204   : > { %v1726_v16 = vadd.f32 %v1640_v0, %v1569_v51 }
 0x205   : > { %2191 = vmatmul.msk.f32.gmra.mxu1 %vm330_vm1, %v3884_v18  ;;  %v1799_v26 = vpop.f32.mrf.mxu0 }
 0x206   : > { %v1882_v60 = vadd.f32 %v1796_v23, %v1726_v16  ;;  %2224 = vmatmul.msk.f32.gmra.mxu2 %vm330_vm1, %v2333_v62  ;;  %v3894_v16 = vld [vmem:[#allocation10_spill] sm:$0xff] }
 0x207   : > { %2257 = vmatmul.msk.f32.gmra.mxu3 %vm330_vm1, %v3832_v21  ;;  %v2334_v21 = vld [vmem:[%s2391_s24 + $0x140] sm:$0xff] }
 0x208   : > { %1914 = vst.msk [vmem:[%s3464_s8 + $0x28] sm:$0xff] %vm330_vm1, %v1882_v60  ;;  %2290 = vmatmul.msk.f32.gmra.mxu0 %vm330_vm1, %v3888_v17 }
 0x209   : > { %v1486_v50 = vpop.f32.mrf.mxu2 }
 0x20a   : > { %v1643_v19 = vpop.f32.mrf.mxu3  ;;  %v1570_v28 = vadd.f32 %v1486_v50, %v1417_v47  ;;  %v1336_v2 = vpop.f32.mrf.mxu1 }
 0x20b   : > { %v1418_v13 = vadd.f32 %v1336_v2, %v3890_v36  ;;  %v3896_v2 = vld [vmem:[#allocation6_spill] sm:$0xff] }
 0x20c   : > { %v1727_v10 = vadd.f32 %v1643_v19, %v1570_v28  ;;  %v2337_v19 = vld [vmem:[%s2391_s24 + $0x168] sm:$0xff]  ;;  %v3895_v28 = vld [vmem:[#allocation30_spill] sm:$0xff] }
 0x20d   : > { %2192 = vmatmul.msk.f32.gmra.mxu1 %vm330_vm1, %v3149_v39  ;;  %v1802_v45 = vpop.f32.mrf.mxu0 }
 0x20e   : > { %v1883_v29 = vadd.f32 %v1799_v26, %v1727_v10  ;;  %2225 = vmatmul.msk.f32.gmra.mxu2 %vm330_vm1, %v2334_v21 }
 0x20f   : > { %2258 = vmatmul.msk.f32.gmra.mxu3 %vm330_vm1, %v3889_v43 }
 0x210   : > { %1915 = vst.msk [vmem:[%s3464_s8 + $0x30] sm:$0xff] %vm330_vm1, %v1883_v29  ;;  %2291 = vmatmul.msk.f32.gmra.mxu0 %vm330_vm1, %v3180_v20 }
 0x211   : > { %v1489_v52 = vpop.f32.mrf.mxu2 }
 0x212   : > { %v1646_v48 = vpop.f32.mrf.mxu3  ;;  %v1571_v39 = vadd.f32 %v1489_v52, %v1418_v13  ;;  %v1339_v18 = vpop.f32.mrf.mxu1 }
 0x213   : > { %v1419_v23 = vadd.f32 %v1339_v18, %v3891_v61  ;;  %v3898_v18 = vld [vmem:[#allocation11_spill] sm:$0xff] }
 0x214   : > { %v1728_v12 = vadd.f32 %v1646_v48, %v1571_v39  ;;  %v2338_v48 = vld [vmem:[%s2391_s24 + $0x170] sm:$0xff]  ;;  %v3897_v39 = vld [vmem:[#allocation33_spill] sm:$0xff] }
 0x215   : > { %2193 = vmatmul.msk.f32.gmra.mxu1 %vm330_vm1, %v3888_v17  ;;  %v1805_v63 = vpop.f32.mrf.mxu0 }
 0x216   : > { %v1884_v57 = vadd.f32 %v1802_v45, %v1728_v12  ;;  %2226 = vmatmul.msk.f32.gmra.mxu2 %vm330_vm1, %v2335_v40 }
 0x217   : > { %2259 = vmatmul.msk.f32.gmra.mxu3 %vm330_vm1, %v3840_v49  ;;  %v2336_v49 = vld [vmem:[%s2391_s24 + $0x158] sm:$0xff] }
 0x218   : > { %1916 = vst.msk [vmem:[%s3464_s8 + $0x38] sm:$0xff] %vm330_vm1, %v1884_v57  ;;  %2292 = vmatmul.msk.f32.gmra.mxu0 %vm330_vm1, %v3892_v1 }
 0x219   : > { %v1492_v34 = vpop.f32.mrf.mxu2 }
 0x21a   : > { %v1649_v55 = vpop.f32.mrf.mxu3  ;;  %v1572_v32 = vadd.f32 %v1492_v34, %v1419_v23  ;;  %v1342_v54 = vpop.f32.mrf.mxu1 }
 0x21b   : > { %v1420_v26 = vadd.f32 %v1342_v54, %v3894_v16 }
 0x21c   : > { %v1729_v58 = vadd.f32 %v1649_v55, %v1572_v32 }
 0x21d   : > { %2194 = vmatmul.msk.f32.gmra.mxu1 %vm330_vm1, %v3180_v20  ;;  %v1808_v0 = vpop.f32.mrf.mxu0 }
 0x21e   : > { %v1885_v51 = vadd.f32 %v1805_v63, %v1729_v58  ;;  %2227 = vmatmul.msk.f32.gmra.mxu2 %vm330_vm1, %v2336_v49  ;;  %v3899_v63 = vld [vmem:[#allocation14_spill] sm:$0xff]  ;;  %v3900_v58 = vld [vmem:[#allocation17_spill] sm:$0xff] }
 0x21f   : > { %2260 = vmatmul.msk.f32.gmra.mxu3 %vm330_vm1, %v3893_v41  ;;  %v1287_v57 = vrot.slane %v3899_v63, 2 }
 0x220   : > { %1917 = vst.msk [vmem:[%s3464_s8 + $0x40] sm:$0xff] %vm330_vm1, %v1885_v51  ;;  %2293 = vmatmul.msk.f32.gmra.mxu0 %vm330_vm1, %v3211_v3 }
 0x221   : > { %v1495_v60 = vpop.f32.mrf.mxu2 }
 0x222   : > { %v1652_v62 = vpop.f32.mrf.mxu3  ;;  %v1573_v20 = vadd.f32 %v1495_v60, %v1420_v26  ;;  %v1345_v7 = vpop.f32.mrf.mxu1  ;;  %v195_v60 = vld [vmem:[%s2391_s24 + $0x198] sm:$0xff] }
 0x223   : > { %v1421_v10 = vadd.f32 %v1345_v7, %v3896_v2 }
 0x224   : > { %v1730_v47 = vadd.f32 %v1652_v62, %v1573_v20  ;;  %v196_v62 = vld [vmem:[%s2391_s24 + $0x1a0] sm:$0xff] }
 0x225   : > { %2195 = vmatmul.msk.f32.gmra.mxu1 %vm330_vm1, %v3892_v1  ;;  %v1811_v17 = vpop.f32.mrf.mxu0  ;;  %v1754_v2 = vrot.slane %v196_v62, 2 }
 0x226   : > { %v1886_v50 = vadd.f32 %v1808_v0, %v1730_v47  ;;  %2228 = vmatmul.msk.f32.gmra.mxu2 %vm330_vm1, %v2337_v19  ;;  %v1598_v47 = vrot.slane %v196_v62, 1 }
 0x227   : > { %2261 = vmatmul.msk.f32.gmra.mxu3 %vm330_vm1, %v3895_v28  ;;  %v1753_v28 = vrot.slane %v195_v60, 2 }
 0x228   : > { %1918 = vst.msk [vmem:[%s3464_s8 + $0x48] sm:$0xff] %vm330_vm1, %v1886_v50  ;;  %2294 = vmatmul.msk.f32.gmra.mxu0 %vm330_vm1, %v3235_v4 }
 0x229   : > { %v1498_v45 = vpop.f32.mrf.mxu2 }
 0x22a   : > { %v1655_v29 = vpop.f32.mrf.mxu3  ;;  %v1574_v21 = vadd.f32 %v1498_v45, %v1421_v10  ;;  %v1348_v43 = vpop.f32.mrf.mxu1 }
 0x22b   : > { %v1422_v12 = vadd.f32 %v1348_v43, %v3898_v18  ;;  %v1755_v43 = vsel %vm685_vm2, %v1753_v28, %v1754_v2 }
 0x22c   : > { %v1731_v36 = vadd.f32 %v1655_v29, %v1574_v21  ;;  %v197_v21 = vld [vmem:[%s2391_s24 + $0x1a8] sm:$0x3] }
 0x22d   : > { %2196 = vmatmul.msk.f32.gmra.mxu1 %vm330_vm1, %v3211_v3  ;;  %v1814_v13 = vpop.f32.mrf.mxu0  ;;  %v1288_v3 = vrot.slane %v3222_v38, 2  ;;  %v1756_v18 = vrot.slane %v197_v21, 2 }
 0x22e   : > { %v1887_v52 = vadd.f32 %v1811_v17, %v1731_v36  ;;  %2229 = vmatmul.msk.f32.gmra.mxu2 %vm330_vm1, %v2338_v48  ;;  %v3901_v17 = vld [vmem:[#allocation20_spill] sm:$0xff] }
 0x22f   : > { %2262 = vmatmul.msk.f32.gmra.mxu3 %vm330_vm1, %v3897_v39  ;;  %v1289_v32 = vsel %vm685_vm2, %v1287_v57, %v1288_v3 }
 0x230   : > { %1919 = vst.msk [vmem:[%s3464_s8 + $0x50] sm:$0xff] %vm330_vm1, %v1887_v52  ;;  %2295 = vmatmul.msk.f32.gmra.mxu0 %vm330_vm1, %v3257_v46 }
 0x231   : > { %v1501_v40 = vpop.f32.mrf.mxu2 }
 0x232   : > { %v1658_v61 = vpop.f32.mrf.mxu3  ;;  %v1575_v23 = vadd.f32 %v1501_v40, %v1422_v12  ;;  %v1351_v1 = vpop.f32.mrf.mxu1 }
 0x233   : > { %v1423_v0 = vadd.f32 %v1351_v1, %v3900_v58 }
 0x234   : > { %v1732_v34 = vadd.f32 %v1658_v61, %v1575_v23  ;;  %v1757_v61 = vsel %vm685_vm2, %v1754_v2, %v1756_v18 }
 0x235   : > { %2197 = vmatmul.msk.f32.gmra.mxu1 %vm330_vm1, %v3235_v4  ;;  %v1817_v55 = vpop.f32.mrf.mxu0  ;;  %v1290_v4 = vrot.slane %v3249_v22, 2  ;;  %v1597_v22 = vrot.slane %v195_v60, 1 }
 0x236   : > { %v1888_v54 = vadd.f32 %v1814_v13, %v1732_v34  ;;  %2230 = vmatmul.msk.f32.gmra.mxu2 %vm330_vm1, %v3899_v63  ;;  %v1600_v13 = vrot.slane %v197_v21, 1 }
 0x237   : > { %2263 = vmatmul.msk.f32.gmra.mxu3 %vm330_vm1, %v3240_v11  ;;  %v1291_v20 = vsel %vm685_vm2, %v1288_v3, %v1290_v4 }
 0x238   : > { %1920 = vst.msk [vmem:[%s3464_s8 + $0x58] sm:$0xff] %vm330_vm1, %v1888_v54  ;;  %2296 = vmatmul.msk.f32.gmra.mxu0 %vm330_vm1, %v1289_v32  ;;  %v1601_v57 = vsel %vm247_vm0, %v1598_v47, %v1600_v13 }
 0x239   : > { %v1504_v51 = vpop.f32.mrf.mxu2 }
 0x23a   : > { %v1661_v49 = vpop.f32.mrf.mxu3  ;;  %v1576_v41 = vadd.f32 %v1504_v51, %v1423_v0  ;;  %v1354_v16 = vpop.f32.mrf.mxu1 }
 0x23b   : > { %v1424_v50 = vadd.f32 %v1354_v16, %v3901_v17 }
 0x23c   : > { %v1733_v26 = vadd.f32 %v1661_v49, %v1576_v41 }
 0x23d   : > { %2198 = vmatmul.msk.f32.gmra.mxu1 %vm330_vm1, %v3257_v46  ;;  %v1820_v11 = vpop.f32.mrf.mxu0 }
 0x23e   : > { %v1889_v7 = vadd.f32 %v1817_v55, %v1733_v26  ;;  %2231 = vmatmul.msk.f32.gmra.mxu2 %vm330_vm1, %v3222_v38  ;;  %v1599_v38 = vsel %vm247_vm0, %v1597_v22, %v1598_v47 }
 0x23f   : > { %2264 = vmatmul.msk.f32.gmra.mxu3 %vm330_vm1, %v3262_v15 }
 0x240   : > { %1921 = vst.msk [vmem:[%s3464_s8 + $0x60] sm:$0xff] %vm330_vm1, %v1889_v7  ;;  %2297 = vmatmul.msk.f32.gmra.mxu0 %vm330_vm1, %v1291_v20 }
 0x241   : > { %v1507_v46 = vpop.f32.mrf.mxu2 }
 0x242   : > { %v1664_v19 = vpop.f32.mrf.mxu3  ;;  %v1577_v10 = vadd.f32 %v1507_v46, %v1424_v50  ;;  %v1357_v45 = vpop.f32.mrf.mxu1 }
 0x243   : > { %v1425_v52 = vadd.f32 %v1357_v45, %v3264_v8 }
 0x244   : > { %v1734_v29 = vadd.f32 %v1664_v19, %v1577_v10 }
 0x245   : > { %2199 = vmatmul.msk.f32.gmra.mxu1 %vm330_vm1, %v1289_v32  ;;  %v1823_v15 = vpop.f32.mrf.mxu0 }
 0x246   : > { %v1890_v36 = vadd.f32 %v1820_v11, %v1734_v29  ;;  %2232 = vmatmul.msk.f32.gmra.mxu2 %vm330_vm1, %v195_v60 }
 0x247   : > { %2265 = vmatmul.msk.f32.gmra.mxu3 %vm330_vm1, %v1599_v38 }
 0x248   : > { %1922 = vst.msk [vmem:[%s3464_s8 + $0x68] sm:$0xff] %vm330_vm1, %v1890_v36  ;;  %2298 = vmatmul.msk.f32.gmra.mxu0 %vm330_vm1, %v1755_v43 }
 0x249   : > { %v1510_v48 = vpop.f32.mrf.mxu2 }
 0x24a   : > { %v1667_v39 = vpop.f32.mrf.mxu3  ;;  %v1578_v12 = vadd.f32 %v1510_v48, %v1425_v52  ;;  %v1360_v63 = vpop.f32.mrf.mxu1 }
 0x24b   : > { %v1426_v23 = vadd.f32 %v1360_v63, %v3275_v31 }
 0x24c   : > { %v1735_v3 = vadd.f32 %v1667_v39, %v1578_v12 }
 0x24d   : > { %2200 = vmatmul.msk.f32.gmra.mxu1 %vm330_vm1, %v1291_v20  ;;  %v1826_v40 = vpop.f32.mrf.mxu0 }
 0x24e   : > { %v1891_v8 = vadd.f32 %v1823_v15, %v1735_v3  ;;  %2233 = vmatmul.msk.f32.gmra.mxu2 %vm330_vm1, %v196_v62 }
 0x24f   : > { %2266 = vmatmul.msk.f32.gmra.mxu3 %vm330_vm1, %v1601_v57 }
 0x250   : > { %1923 = vst.msk [vmem:[%s3464_s8 + $0x70] sm:$0xff] %vm330_vm1, %v1891_v8  ;;  %2299 = vmatmul.msk.f32.gmra.mxu0 %vm330_vm1, %v1757_v61 }
 0x251   : > { %v1513_v1 = vpop.f32.mrf.mxu2 }
 0x252   : > { %v1670_v34 = vpop.f32.mrf.mxu3  ;;  %v1579_v55 = vadd.f32 %v1513_v1, %v1426_v23  ;;  %v1363_v32 = vpop.f32.mrf.mxu1 }
 0x253   : > { %v1427_v51 = vadd.f32 %v1363_v32, %v3286_v9 }
 0x254   : > { %v1736_v54 = vadd.f32 %v1670_v34, %v1579_v55 }
 0x255   : > { %v1829_v58 = vpop.f32.mrf.mxu0 }
 0x256   : > { %v1892_v0 = vadd.f32 %v1826_v40, %v1736_v54 }
 0x258   : > { %1924 = vst.msk [vmem:[%s3464_s8 + $0x78] sm:$0xff] %vm330_vm1, %v1892_v0 }
 0x259   : > { %v1516_v49 = vpop.f32.mrf.mxu2 }
 0x25a   : > { %v1673_v4 = vpop.f32.mrf.mxu3  ;;  %v1580_v31 = vadd.f32 %v1516_v49, %v1427_v51  ;;  %v1366_v41 = vpop.f32.mrf.mxu1 }
 0x25b   : > { %v1428_v62 = vadd.f32 %v1366_v41, %v3297_v37 }
 0x25c   : > { %v1737_v16 = vadd.f32 %v1673_v4, %v1580_v31 }
 0x25d   : > { %v1832_v26 = vpop.f32.mrf.mxu0 }
 0x25e   : > { %v1893_v60 = vadd.f32 %v1829_v58, %v1737_v16 }
 0x260   : > { %1925 = vst.msk [vmem:[%s3464_s8 + $0x80] sm:$0xff] %vm330_vm1, %v1893_v60 }
 0x261   : > { %v1519_v11 = vpop.f32.mrf.mxu2 }
 0x262   : > { %v1676_v20 = vpop.f32.mrf.mxu3  ;;  %v1581_v7 = vadd.f32 %v1519_v11, %v1428_v62  ;;  %v1369_v22 = vpop.f32.mrf.mxu1 }
 0x263   : > { %v1429_v50 = vadd.f32 %v1369_v22, %v3308_v5 }
 0x264   : > { %v1738_v9 = vadd.f32 %v1676_v20, %v1581_v7 }
 0x265   : > { %v1835_v47 = vpop.f32.mrf.mxu0 }
 0x266   : > { %v1894_v17 = vadd.f32 %v1832_v26, %v1738_v9 }
 0x268   : > { %1926 = vst.msk [vmem:[%s3464_s8 + $0x88] sm:$0xff] %vm330_vm1, %v1894_v17 }
 0x269   : > { %v1522_v46 = vpop.f32.mrf.mxu2 }
 0x26a   : > { %v1679_v19 = vpop.f32.mrf.mxu3  ;;  %v1582_v28 = vadd.f32 %v1522_v46, %v1429_v50  ;;  %v1372_v2 = vpop.f32.mrf.mxu1 }
 0x26b   : > { %v1430_v38 = vadd.f32 %v1372_v2, %v3319_v14 }
 0x26c   : > { %v1739_v37 = vadd.f32 %v1679_v19, %v1582_v28 }
 0x26d   : > { %v1838_v10 = vpop.f32.mrf.mxu0 }
 0x26e   : > { %v1895_v45 = vadd.f32 %v1835_v47, %v1739_v37 }
 0x270   : > { %1927 = vst.msk [vmem:[%s3464_s8 + $0x90] sm:$0xff] %vm330_vm1, %v1895_v45 }
 0x271   : > { %v1525_v29 = vpop.f32.mrf.mxu2 }
 0x272   : > { %v1682_v21 = vpop.f32.mrf.mxu3  ;;  %v1583_v15 = vadd.f32 %v1525_v29, %v1430_v38  ;;  %v1375_v43 = vpop.f32.mrf.mxu1 }
 0x273   : > { %v1431_v52 = vadd.f32 %v1375_v43, %v3330_v33 }
 0x274   : > { %v1740_v5 = vadd.f32 %v1682_v21, %v1583_v15 }
 0x275   : > { %v1841_v36 = vpop.f32.mrf.mxu0 }
 0x276   : > { %v1896_v13 = vadd.f32 %v1838_v10, %v1740_v5 }
 0x278   : > { %1928 = vst.msk [vmem:[%s3464_s8 + $0x98] sm:$0xff] %vm330_vm1, %v1896_v13 }
 0x279   : > { %v1528_v48 = vpop.f32.mrf.mxu2 }
 0x27a   : > { %v1685_v39 = vpop.f32.mrf.mxu3  ;;  %v1584_v18 = vadd.f32 %v1528_v48, %v1431_v52  ;;  %v1378_v12 = vpop.f32.mrf.mxu1 }
 0x27b   : > { %v1432_v3 = vadd.f32 %v1378_v12, %v3341_v24 }
 0x27c   : > { %v1741_v14 = vadd.f32 %v1685_v39, %v1584_v18 }
 0x27d   : > { %v1844_v63 = vpop.f32.mrf.mxu0 }
 0x27e   : > { %v1897_v57 = vadd.f32 %v1841_v36, %v1741_v14 }
 0x280   : > { %1929 = vst.msk [vmem:[%s3464_s8 + $0xa0] sm:$0xff] %vm330_vm1, %v1897_v57 }
 0x281   : > { %v1531_v40 = vpop.f32.mrf.mxu2 }
 0x282   : > { %v1688_v61 = vpop.f32.mrf.mxu3  ;;  %v1585_v8 = vadd.f32 %v1531_v40, %v1432_v3  ;;  %v1381_v23 = vpop.f32.mrf.mxu1 }
 0x283   : > { %v1433_v55 = vadd.f32 %v1381_v23, %v3352_v56 }
 0x284   : > { %v1742_v33 = vadd.f32 %v1688_v61, %v1585_v8 }
 0x285   : > { %v1847_v1 = vpop.f32.mrf.mxu0 }
 0x286   : > { %v1898_v34 = vadd.f32 %v1844_v63, %v1742_v33 }
 0x288   : > { %1930 = vst.msk [vmem:[%s3464_s8 + $0xa8] sm:$0xff] %vm330_vm1, %v1898_v34 }
 0x289   : > { %v1534_v32 = vpop.f32.mrf.mxu2 }
 0x28a   : > { %v1691_v54 = vpop.f32.mrf.mxu3  ;;  %v1586_v58 = vadd.f32 %v1534_v32, %v1433_v55  ;;  %v1384_v0 = vpop.f32.mrf.mxu1 }
 0x28b   : > { %v1434_v4 = vadd.f32 %v1384_v0, %v3363_v25 }
 0x28c   : > { %v1743_v24 = vadd.f32 %v1691_v54, %v1586_v58 }
 0x28d   : > { %v1850_v51 = vpop.f32.mrf.mxu0 }
 0x28e   : > { %v1899_v49 = vadd.f32 %v1847_v1, %v1743_v24 }
 0x290   : > { %1931 = vst.msk [vmem:[%s3464_s8 + $0xb0] sm:$0xff] %vm330_vm1, %v1899_v49 }
 0x291   : > { %v1537_v31 = vpop.f32.mrf.mxu2 }
 0x292   : > { %v1694_v41 = vpop.f32.mrf.mxu3  ;;  %v1587_v16 = vadd.f32 %v1537_v31, %v1434_v4  ;;  %v1387_v26 = vpop.f32.mrf.mxu1 }
 0x293   : > { %v1435_v11 = vadd.f32 %v1387_v26, %v3374_v44 }
 0x294   : > { %v1744_v56 = vadd.f32 %v1694_v41, %v1587_v16 }
 0x295   : > { %v1853_v60 = vpop.f32.mrf.mxu0 }
 0x296   : > { %v1900_v62 = vadd.f32 %v1850_v51, %v1744_v56 }
 0x298   : > { %1932 = vst.msk [vmem:[%s3464_s8 + $0xb8] sm:$0xff] %vm330_vm1, %v1900_v62 }
 0x299   : > { %v1540_v20 = vpop.f32.mrf.mxu2 }
 0x29a   : > { %v1697_v7 = vpop.f32.mrf.mxu3  ;;  %v1588_v22 = vadd.f32 %v1540_v20, %v1435_v11  ;;  %v1390_v9 = vpop.f32.mrf.mxu1 }
 0x29b   : > { %v1436_v50 = vadd.f32 %v1390_v9, %v3385_v35 }
 0x29c   : > { %v1745_v25 = vadd.f32 %v1697_v7, %v1588_v22 }
 0x29d   : > { %v1856_v47 = vpop.f32.mrf.mxu0 }
 0x29e   : > { %v1901_v17 = vadd.f32 %v1853_v60, %v1745_v25 }
 0x2a0   : > { %1933 = vst.msk [vmem:[%s3464_s8 + $0xc0] sm:$0xff] %vm330_vm1, %v1901_v17 }
 0x2a1   : > { %v1543_v46 = vpop.f32.mrf.mxu2 }
 0x2a2   : > { %v1700_v19 = vpop.f32.mrf.mxu3  ;;  %v1589_v28 = vadd.f32 %v1543_v46, %v1436_v50  ;;  %v1393_v2 = vpop.f32.mrf.mxu1 }
 0x2a3   : > { %v1437_v45 = vadd.f32 %v1393_v2, %v3396_v53 }
 0x2a4   : > { %v1746_v44 = vadd.f32 %v1700_v19, %v1589_v28 }
 0x2a5   : > { %v1859_v37 = vpop.f32.mrf.mxu0 }
 0x2a6   : > { %v1902_v10 = vadd.f32 %v1856_v47, %v1746_v44 }
 0x2a8   : > { %1934 = vst.msk [vmem:[%s3464_s8 + $0xc8] sm:$0xff] %vm330_vm1, %v1902_v10 }
 0x2a9   : > { %v1546_v38 = vpop.f32.mrf.mxu2 }
 0x2aa   : > { %v1703_v29 = vpop.f32.mrf.mxu3  ;;  %v1590_v21 = vadd.f32 %v1546_v38, %v1437_v45  ;;  %v1396_v15 = vpop.f32.mrf.mxu1 }
 0x2ab   : > { %v1438_v36 = vadd.f32 %v1396_v15, %v3407_v42 }
 0x2ac   : > { %v1747_v35 = vadd.f32 %v1703_v29, %v1590_v21 }
 0x2ad   : > { %v1862_v43 = vpop.f32.mrf.mxu0 }
 0x2ae   : > { %v1903_v5 = vadd.f32 %v1859_v37, %v1747_v35 }
 0x2b0   : > { %1935 = vst.msk [vmem:[%s3464_s8 + $0xd0] sm:$0xff] %vm330_vm1, %v1903_v5 }
 0x2b1   : > { %v1549_v13 = vpop.f32.mrf.mxu2 }
 0x2b2   : > { %v1706_v52 = vpop.f32.mrf.mxu3  ;;  %v1591_v48 = vadd.f32 %v1549_v13, %v1438_v36  ;;  %v1399_v39 = vpop.f32.mrf.mxu1 }
 0x2b3   : > { %v1439_v14 = vadd.f32 %v1399_v39, %v3418_v30 }
 0x2b4   : > { %v1748_v53 = vadd.f32 %v1706_v52, %v1591_v48 }
 0x2b5   : > { %v1865_v18 = vpop.f32.mrf.mxu0 }
 0x2b6   : > { %v1904_v12 = vadd.f32 %v1862_v43, %v1748_v53 }
 0x2b8   : > { %1936 = vst.msk [vmem:[%s3464_s8 + $0xd8] sm:$0xff] %vm330_vm1, %v1904_v12 }
 0x2b9   : > { %v1552_v63 = vpop.f32.mrf.mxu2 }
 0x2ba   : > { %v1709_v57 = vpop.f32.mrf.mxu3  ;;  %v1592_v3 = vadd.f32 %v1552_v63, %v1439_v14  ;;  %v1402_v40 = vpop.f32.mrf.mxu1 }
 0x2bb   : > { %v1440_v23 = vadd.f32 %v1402_v40, %v3429_v59 }
 0x2bc   : > { %v1749_v42 = vadd.f32 %v1709_v57, %v1592_v3 }
 0x2bd   : > { %v1868_v8 = vpop.f32.mrf.mxu0 }
 0x2be   : > { %v1905_v61 = vadd.f32 %v1865_v18, %v1749_v42 }
 0x2c0   : > { %1937 = vst.msk [vmem:[%s3464_s8 + $0xe0] sm:$0xff] %vm330_vm1, %v1905_v61 }
 0x2c1   : > { %v1555_v33 = vpop.f32.mrf.mxu2 }
 0x2c2   : > { %v1712_v1 = vpop.f32.mrf.mxu3  ;;  %v1593_v34 = vadd.f32 %v1555_v33, %v1440_v23  ;;  %v1405_v55 = vpop.f32.mrf.mxu1 }
 0x2c3   : > { %v1441_v54 = vadd.f32 %v1405_v55, %v3440_v6 }
 0x2c4   : > { %v1750_v30 = vadd.f32 %v1712_v1, %v1593_v34 }
 0x2c5   : > { %v1871_v58 = vpop.f32.mrf.mxu0 }
 0x2c6   : > { %v1906_v32 = vadd.f32 %v1868_v8, %v1750_v30 }
 0x2c8   : > { %1938 = vst.msk [vmem:[%s3464_s8 + $0xe8] sm:$0xff] %vm330_vm1, %v1906_v32 }
 0x2c9   : > { %v1558_v0 = vpop.f32.mrf.mxu2 }
 0x2ca   : > { %v1715_v24 = vpop.f32.mrf.mxu3  ;;  %v1594_v51 = vadd.f32 %v1558_v0, %v1441_v54  ;;  %v1408_v59 = vpop.f32.mrf.mxu1 }
 0x2cb   : > { %v1442_v31 = vadd.f32 %v1408_v59, %v3451_v27 }
 0x2cc   : > { %v1751_v49 = vadd.f32 %v1715_v24, %v1594_v51 }
 0x2cd   : > { %v1874_v56 = vpop.f32.mrf.mxu0 }
 0x2ce   : > { %v1907_v4 = vadd.f32 %v1871_v58, %v1751_v49 }
 0x2d0   : > { %1939 = vst.msk [vmem:[%s3464_s8 + $0xf0] sm:$0xff] %vm330_vm1, %v1907_v4 }
 0x2d1   : > { %v1561_v41 = vpop.f32.mrf.mxu2 }
 0x2d2   : > { %v1718_v16 = vpop.f32.mrf.mxu3  ;;  %v1595_v26 = vadd.f32 %v1561_v41, %v1442_v31 }
 0x2d4   : > { %v1752_v60 = vadd.f32 %v1718_v16, %v1595_v26 }
 0x2d6   : > { %v1908_v6 = vadd.f32 %v1874_v56, %v1752_v60 }
 0x2d8   : > { %1940 = vst.msk [vmem:[%s3464_s8 + $0xf8] sm:$0xff] %vm330_vm1, %v1908_v6 }
 0x2d9 PF: > { %s12_s9 = sadd.s32 1, %s2345_s9  }
 0x2da   : > { %p9_p4 = scmp.ge.s32.totalorder %s12_s9, 4  }
 0x2dc   :  { %11 = sbr.rel (!%p9_p4) target bundleno = 1 (0x1), region = 66 }

// kernel: bottleneck_forward.6
= control target key start
LH: loop header
LB: loop body
LE: loop exit
PB: predicated region body
PF: predicated region fallthrough
CT: control target
= control target key end

     0   :  { %vm83_vm0 = vcmask 1043456   ;;  %vm34_vm1 = vcmask 31744   ;;  %vm192_vm2 = vcmask 261120   ;;  %s415_s1 = inlined_call_operand.vmem [shape: f32[4,32], index: 1, kind: input, shape index: {}]   ;;  %s416_s0 = inlined_call_operand.vmem [shape: f32[128,4], index: 0, kind: input, shape index: {}]   ;;  %s417_s2 = inlined_call_operand.vmem [shape: f32[1,32], index: 2, kind: input, shape index: {}]   ;;  %s418_s3 = inlined_call_operand.vmem [shape: f32[1,32], index: 3, kind: input, shape index: {}]   ;;  %s419_s4 = inlined_call_operand.vmem [shape: f32[128,32], index: 4, kind: output, shape index: {}]  }
   0x1   :  { %v33_v0 = vld [vmem:[%s415_s1] sm:$0xf]  ;;  %v26_v5 = vld [vmem:[%s416_s0 + $0x48] sm:$0xff]  ;;  %v27_v9 = vld [vmem:[%s416_s0 + $0x50] sm:$0xff] }
   0x2   :  { %v25_v1 = vld [vmem:[%s416_s0 + $0x40] sm:$0xff]  ;;  %231 = vmatpush.msk.msra.mxu2 %vm83_vm0, %v33_v0  ;;  %232 = vmatpush.msk.msra.mxu3 %vm83_vm0, %v33_v0  ;;  %v30_v6 = vld [vmem:[%s416_s0 + $0x68] sm:$0xff]  ;;  %v31_v10 = vld [vmem:[%s416_s0 + $0x70] sm:$0xff] }
   0x3   :  { %v29_v2 = vld [vmem:[%s416_s0 + $0x60] sm:$0xff]  ;;  %222 = vmatmul.msk.f32.vlgmr.msra.gmra.mxu2 %vm34_vm1, %v25_v1  ;;  %213 = vmatpush.msk.msra.mxu0 %vm83_vm0, %v33_v0  ;;  %v18_v7 = vld [vmem:[%s416_s0 + $0x8] sm:$0xff]  ;;  %v19_v11 = vld [vmem:[%s416_s0 + $0x10] sm:$0xff] }
   0x4   :  { %v17_v3 = vld [vmem:[%s416_s0] sm:$0xff]  ;;  %226 = vmatmul.msk.f32.vlgmr.msra.gmra.mxu3 %vm34_vm1, %v29_v2  ;;  %230 = vmatpush.msk.msra.mxu1 %vm83_vm0, %v33_v0  ;;  %v22_v8 = vld [vmem:[%s416_s0 + $0x28] sm:$0xff]  ;;  %v23_v12 = vld [vmem:[%s416_s0 + $0x30] sm:$0xff] }
   0x5   :  { %v21_v4 = vld [vmem:[%s416_s0 + $0x20] sm:$0xff]  ;;  %214 = vmatmul.msk.f32.vlgmr.msra.gmra.mxu0 %vm34_vm1, %v17_v3  ;;  %v28_v13 = vld [vmem:[%s416_s0 + $0x58] sm:$0xff] }
   0x6   :  { %218 = vmatmul.msk.f32.vlgmr.msra.gmra.mxu1 %vm34_vm1, %v21_v4  ;;  %v32_v14 = vld [vmem:[%s416_s0 + $0x78] sm:$0xff]  ;;  %v233_v17 = vld [vmem:[%s417_s2] ss:$0 sm:$0xff] }
   0x7   :  { %v20_v15 = vld [vmem:[%s416_s0 + $0x18] sm:$0xff]  ;;  %v333_v18 = vld [vmem:[%s418_s3] ss:$0 sm:$0xff] }
   0x8   :  { %v24_v16 = vld [vmem:[%s416_s0 + $0x38] sm:$0xff] }
   0xb   :  { %223 = vmatmul.msk.f32.gmra.mxu2 %vm34_vm1, %v26_v5 }
   0xc   :  { %227 = vmatmul.msk.f32.gmra.mxu3 %vm34_vm1, %v30_v6 }
   0xd   :  { %215 = vmatmul.msk.f32.gmra.mxu0 %vm34_vm1, %v18_v7 }
   0xe   :  { %219 = vmatmul.msk.f32.gmra.mxu1 %vm34_vm1, %v22_v8 }
  0x13   :  { %224 = vmatmul.msk.f32.gmra.mxu2 %vm34_vm1, %v27_v9 }
  0x14   :  { %228 = vmatmul.msk.f32.gmra.mxu3 %vm34_vm1, %v31_v10 }
  0x15   :  { %216 = vmatmul.msk.f32.gmra.mxu0 %vm34_vm1, %v19_v11 }
  0x16   :  { %220 = vmatmul.msk.f32.gmra.mxu1 %vm34_vm1, %v23_v12 }
  0x1b   :  { %225 = vmatmul.msk.f32.gmra.mxu2 %vm34_vm1, %v28_v13 }
  0x1c   :  { %229 = vmatmul.msk.f32.gmra.mxu3 %vm34_vm1, %v32_v14 }
  0x1d   :  { %217 = vmatmul.msk.f32.gmra.mxu0 %vm34_vm1, %v20_v15 }
  0x1e   :  { %221 = vmatmul.msk.f32.gmra.mxu1 %vm34_vm1, %v24_v16 }
  0x82   :  { %v104_v19 = vpop.f32.mrf.mxu0 }
  0x83   :  { %v116_v20 = vpop.f32.mrf.mxu1  ;;  %v156_v21 = vmul.f32 %v233_v17, %v104_v19 }
  0x84   :  { %v160_v22 = vmul.f32 %v233_v17, %v116_v20 }
  0x85   :  { %v176_v23 = vadd.f32 %v333_v18, %v156_v21 }
  0x86   :  { %v180_v24 = vadd.f32 %v333_v18, %v160_v22  ;;  %v128_v25 = vpop.f32.mrf.mxu2 }
  0x87   :  { %v140_v26 = vpop.f32.mrf.mxu3  ;;  %193 = vst.msk [vmem:[%s419_s4] sm:$0xff] %vm192_vm2, %v176_v23  ;;  %v164_v27 = vmul.f32 %v233_v17, %v128_v25 }
  0x88   :  { %v168_v28 = vmul.f32 %v233_v17, %v140_v26  ;;  %197 = vst.msk [vmem:[%s419_s4 + $0x20] sm:$0xff] %vm192_vm2, %v180_v24 }
  0x89   :  { %v184_v29 = vadd.f32 %v333_v18, %v164_v27 }
  0x8a   :  { %v188_v30 = vadd.f32 %v333_v18, %v168_v28  ;;  %v107_v31 = vpop.f32.mrf.mxu0 }
  0x8b   :  { %v119_v32 = vpop.f32.mrf.mxu1  ;;  %201 = vst.msk [vmem:[%s419_s4 + $0x40] sm:$0xff] %vm192_vm2, %v184_v29  ;;  %v157_v33 = vmul.f32 %v233_v17, %v107_v31 }
  0x8c   :  { %v161_v34 = vmul.f32 %v233_v17, %v119_v32  ;;  %205 = vst.msk [vmem:[%s419_s4 + $0x60] sm:$0xff] %vm192_vm2, %v188_v30 }
  0x8d   :  { %v177_v35 = vadd.f32 %v333_v18, %v157_v33 }
  0x8e   :  { %v181_v36 = vadd.f32 %v333_v18, %v161_v34  ;;  %v131_v37 = vpop.f32.mrf.mxu2 }
  0x8f   :  { %v143_v38 = vpop.f32.mrf.mxu3  ;;  %194 = vst.msk [vmem:[%s419_s4 + $0x8] sm:$0xff] %vm192_vm2, %v177_v35  ;;  %v165_v39 = vmul.f32 %v233_v17, %v131_v37 }
  0x90   :  { %v169_v40 = vmul.f32 %v233_v17, %v143_v38  ;;  %198 = vst.msk [vmem:[%s419_s4 + $0x28] sm:$0xff] %vm192_vm2, %v181_v36 }
  0x91   :  { %v185_v41 = vadd.f32 %v333_v18, %v165_v39 }
  0x92   :  { %v189_v42 = vadd.f32 %v333_v18, %v169_v40  ;;  %v110_v43 = vpop.f32.mrf.mxu0 }
  0x93   :  { %v122_v44 = vpop.f32.mrf.mxu1  ;;  %202 = vst.msk [vmem:[%s419_s4 + $0x48] sm:$0xff] %vm192_vm2, %v185_v41  ;;  %v158_v45 = vmul.f32 %v233_v17, %v110_v43 }
  0x94   :  { %v162_v46 = vmul.f32 %v233_v17, %v122_v44  ;;  %206 = vst.msk [vmem:[%s419_s4 + $0x68] sm:$0xff] %vm192_vm2, %v189_v42 }
  0x95   :  { %v178_v47 = vadd.f32 %v333_v18, %v158_v45 }
  0x96   :  { %v182_v48 = vadd.f32 %v333_v18, %v162_v46  ;;  %v134_v49 = vpop.f32.mrf.mxu2 }
  0x97   :  { %v146_v50 = vpop.f32.mrf.mxu3  ;;  %195 = vst.msk [vmem:[%s419_s4 + $0x10] sm:$0xff] %vm192_vm2, %v178_v47  ;;  %v166_v51 = vmul.f32 %v233_v17, %v134_v49 }
  0x98   :  { %v170_v52 = vmul.f32 %v233_v17, %v146_v50  ;;  %199 = vst.msk [vmem:[%s419_s4 + $0x30] sm:$0xff] %vm192_vm2, %v182_v48 }
  0x99   :  { %v186_v53 = vadd.f32 %v333_v18, %v166_v51 }
  0x9a   :  { %v190_v54 = vadd.f32 %v333_v18, %v170_v52  ;;  %v113_v55 = vpop.f32.mrf.mxu0 }
  0x9b   :  { %v125_v56 = vpop.f32.mrf.mxu1  ;;  %203 = vst.msk [vmem:[%s419_s4 + $0x50] sm:$0xff] %vm192_vm2, %v186_v53  ;;  %v159_v57 = vmul.f32 %v233_v17, %v113_v55 }
  0x9c   :  { %v163_v58 = vmul.f32 %v233_v17, %v125_v56  ;;  %207 = vst.msk [vmem:[%s419_s4 + $0x70] sm:$0xff] %vm192_vm2, %v190_v54 }
  0x9d   :  { %v179_v59 = vadd.f32 %v333_v18, %v159_v57 }
  0x9e   :  { %v183_v60 = vadd.f32 %v333_v18, %v163_v58  ;;  %v137_v61 = vpop.f32.mrf.mxu2 }
  0x9f   :  { %v149_v62 = vpop.f32.mrf.mxu3  ;;  %196 = vst.msk [vmem:[%s419_s4 + $0x18] sm:$0xff] %vm192_vm2, %v179_v59  ;;  %v167_v63 = vmul.f32 %v233_v17, %v137_v61 }
  0xa0   :  { %v171_v0 = vmul.f32 %v233_v17, %v149_v62  ;;  %200 = vst.msk [vmem:[%s419_s4 + $0x38] sm:$0xff] %vm192_vm2, %v183_v60 }
  0xa1   :  { %v187_v1 = vadd.f32 %v333_v18, %v167_v63 }
  0xa2   :  { %v191_v2 = vadd.f32 %v333_v18, %v171_v0 }
  0xa3   :  { %204 = vst.msk [vmem:[%s419_s4 + $0x58] sm:$0xff] %vm192_vm2, %v187_v1 }
  0xa4   :  { %208 = vst.msk [vmem:[%s419_s4 + $0x78] sm:$0xff] %vm192_vm2, %v191_v2 }

// kernel: bottleneck_forward.7
= control target key start
LH: loop header
LB: loop body
LE: loop exit
PB: predicated region body
PF: predicated region fallthrough
CT: control target
= control target key end

     0   :  { %12 = vsyncpa [#allocation3], 0  ;;  %s1102_s0 = inlined_call_operand.vmem [shape: f32[2,8,2,8,16], index: 0, kind: input, shape index: {}]   ;;  %s1103_s1 = inlined_call_operand.vmem [shape: f32[2,16], index: 1, kind: input, shape index: {}]   ;;  %s1104_s2 = inlined_call_operand.vmem [shape: f32[2,16], index: 2, kind: input, shape index: {}]   ;;  %s1105_s3 = inlined_call_operand.vmem [shape: f32[2,16,32], index: 3, kind: input, shape index: {}]   ;;  %s1106_s4 = inlined_call_operand.vmem [shape: f32[1,32], index: 4, kind: input, shape index: {}]   ;;  %s1107_s5 = inlined_call_operand.vmem [shape: f32[1,32], index: 5, kind: input, shape index: {}]   ;;  %s1108_s6 = inlined_call_operand.vmem [shape: f32[2,64,32], index: 6, kind: input, shape index: {}]   ;;  %s1109_s7 = inlined_call_operand.hbm [shape: f32[2,64,32], index: 7, kind: output, shape index: {}]  }
   0x1   :  { %14 = vsyncpa [#allocation3 + $0x1], 0  ;;  %s853_s24 = smov 0   ;;  %s855_s25 = smov 0  }
   0x2   :  { %s857_s26 = smov 0   ;;  %s859_s27 = smov 0  }
   0x3 LB: > { %s874_s28 = sadd.s32 4294967295, %s809_s27   ;;  %s653_s29 = sadd.s32 4294967294, %s809_s27   ;;  %s809_s27 = sphi %s859_s27, %s1115_s27   ;;  %s805_s26 = sphi %s857_s26, %s1114_s26   ;;  %s801_s25 = sphi %s855_s25, %s1113_s25   ;;  %s797_s24 = sphi %s853_s24, %s1112_s24  }
   0x4   : > { %s878_s30 = sadd.s32 1, %s809_s27   ;;  %s184_s8 = sadd.s32 1, %s805_s26 }
   0x5   : > { %s181_s9 = ssub.s32 %s809_s27, %s878_s30  ;;  %p194_p0 = scmp.ne.s32.totalorder %s805_s26, %s801_s25 }
   0x6   : > { %p182_p1 = scmp.eq.s32.totalorder %s181_s9, 0  ;;  %p195_p2 = scmp.eq.s32.totalorder %s874_s28, 1 }
   0x7   : > { %p200_p3 = scmp.ne.s32.totalorder %s801_s25, %s797_s24  ;;  %p201_p4 = scmp.eq.s32.totalorder %s653_s29, 1 }
   0x8   : > { %s889_s10 = scalar_select %p182_p1, %s805_s26, %s184_s8  }
   0x9   : > { %p891_p5 = por %p195_p2, %p194_p0  ;;  %p895_p6 = por %p201_p4, %p200_p3 }
   0xa   : > { %p656_p7 = scmp.ge.s32.totalorder %s809_s27, 1  ;;  %p250_p8 = scmp.lt.s32.totalorder %s809_s27, 3 }
   0xc   : > { %p251_p9 = pnand %p656_p7, %p250_p8 }
   0xd   : > { %p287_p10 = scmp.lt.s32.totalorder (!%p251_p9), %s874_s28, 1  ;;  %s695_s17 = sshll.u32 (!%p251_p9), %s874_s28, 6 }
   0xe   : > { %254 = sbr.rel (%p251_p9) target bundleno = 200 (0xc8), region = 48  ;;  %s767_s14 = scalar_lea.hbm (!%p251_p9), %s1109_s7, 128 }
  0x13   : > { %v671_v0 = vld [vmem:[%s1105_s3 + $0x18] sm:$0xff]  ;;  %v334_v1 = vld [vmem:[%s1105_s3 + $0x8] sm:$0xff]  ;;  %v670_v2 = vld [vmem:[%s1105_s3 + $0x10] sm:$0xff]  ;;  %s915_s21 = scalar_select %p287_p10, %s874_s28, 1  ;;  %vm375_vm0 = vcmask 130048   ;;  %vm554_vm1 = vcmask 261120  }
  0x14   : > { %696 = vmatpush.msra.mxu2 %v671_v0  ;;  %698 = vmatpush.msra.mxu3 %v334_v1  ;;  %v333_v3 = vld [vmem:[%s1105_s3] sm:$0xff] }
  0x15   : > { %v920_v4 = vld [vmem:[%s1103_s1 + $0x1] ss:$0 sm:$0xff]  ;;  %414 = vmatpush.msra.mxu0 %v671_v0  ;;  %479 = vmatpush.msra.mxu1 %v334_v1  ;;  %v925_v5 = vld [vmem:[%s1103_s1] ss:$0 sm:$0xff]  ;;  %s693_s9 = sshll.u32 %s915_s21, 7  ;;  %s694_s20 = sshll.u32 %s915_s21, 6 }
  0x16   : > { %697 = vmatpush.msra.mxu2 %v670_v2  ;;  %699 = vmatpush.msra.mxu3 %v333_v3  ;;  %s931_s15 = scalar_lea.vmem %s1102_s0, %s693_s9  ;;  %v936_v6 = vld [vmem:[%s1104_s2 + $0x1] ss:$0 sm:$0xff]  ;;  %v941_v7 = vld [vmem:[%s1104_s2] ss:$0 sm:$0xff]  ;;  %s1016_s9 = scalar_lea.vmem %s1108_s6, %s694_s20 }
  0x17   : > { %415 = vmatpush.msra.mxu0 %v670_v2  ;;  %480 = vmatpush.msra.mxu1 %v333_v3  ;;  %v666_v8 = vld [vmem:[%s931_s15 + $0x48] sm:$0xff]  ;;  %v301_v9 = vld [vmem:[%s931_s15 + $0x40] sm:$0xff]  ;;  %v667_v15 = vld [vmem:[%s931_s15 + $0x58] sm:$0xff]  ;;  %s284_s21 = sand.u32 1, %s801_s25   ;;  %s575_s20 = scalar_lea.hbm %s1109_s7, %s695_s17 }
  0x18   : > { %v662_v10 = vld [vmem:[%s931_s15 + $0x8] sm:$0xff]  ;;  %v350_v11 = vmul.f32 %v920_v4, %v666_v8  ;;  %v311_v12 = vmul.f32 %v925_v5, %v301_v9  ;;  %v297_v14 = vld [vmem:[%s931_s15] sm:$0xff]  ;;  %v302_v16 = vld [vmem:[%s931_s15 + $0x50] sm:$0xff]  ;;  %v351_v18 = vmul.f32 %v920_v4, %v667_v15  ;;  %s578_s22 = sshll.u32 %s575_s20, 4  ;;  %s564_s23 = scalar_lea.sflag [#allocation3], %s284_s21  ;;  %s579_s22 = int_to_ptr.hbm [resolvable:$true] %s578_s22 }
  0x19   : > { %v346_v13 = vmul.f32 %v920_v4, %v662_v10  ;;  %v307_v17 = vmul.f32 %v925_v5, %v297_v14  ;;  %v663_v19 = vld [vmem:[%s931_s15 + $0x18] sm:$0xff]  ;;  %v298_v20 = vld [vmem:[%s931_s15 + $0x10] sm:$0xff]  ;;  %v312_v24 = vmul.f32 %v925_v5, %v302_v16  ;;  %v668_v36 = vld [vmem:[%s931_s15 + $0x68] sm:$0xff]  ;;  %s761_s29 = sshra.s32 %s579_s22, 4  ;;  %s762_s29 = int_to_ptr.hbm [resolvable:$true] %s761_s29 }
  0x1a   : > { %v360_v21 = vadd.f32 %v936_v6, %v350_v11  ;;  %v321_v22 = vadd.f32 %v941_v7, %v311_v12  ;;  %v347_v26 = vmul.f32 %v920_v4, %v663_v19  ;;  %v308_v27 = vmul.f32 %v925_v5, %v298_v20  ;;  %v303_v37 = vld [vmem:[%s931_s15 + $0x60] sm:$0xff]  ;;  %v664_v38 = vld [vmem:[%s931_s15 + $0x28] sm:$0xff]  ;;  %v669_v52 = vld [vmem:[%s931_s15 + $0x78] sm:$0xff]  ;;  %s763_s8 = scalar_lea.hbm %s762_s29, 64  ;;  %p768_p0 = scmp.lt.s32.totalorder %s762_s29, %s1109_s7 }
  0x1b   : > { %v356_v23 = vadd.f32 %v936_v6, %v346_v13  ;;  %v317_v25 = vadd.f32 %v941_v7, %v307_v17  ;;  %v361_v32 = vadd.f32 %v936_v6, %v351_v18  ;;  %v322_v33 = vadd.f32 %v941_v7, %v312_v24  ;;  %v299_v39 = vld [vmem:[%s931_s15 + $0x20] sm:$0xff]  ;;  %v304_v53 = vld [vmem:[%s931_s15 + $0x70] sm:$0xff]  ;;  %v665_v54 = vld [vmem:[%s931_s15 + $0x38] sm:$0xff]  ;;  %p764_p11 = scmp.ne.s32.totalorder %s762_s29, %s763_s8  ;;  %p769_p1 = scmp.lt.s32.totalorder %s767_s14, %s763_s8 }
  0x1c   : > { %v368_v28 = vmax.f32 %v360_v21, 0.0  ;;  %v329_v29 = vmax.f32 %v321_v22, 0.0  ;;  %v357_v34 = vadd.f32 %v936_v6, %v347_v26  ;;  %v318_v35 = vadd.f32 %v941_v7, %v308_v27  ;;  %v300_v55 = vld [vmem:[%s931_s15 + $0x30] sm:$0xff]  ;;  %v1021_v12 = vld [vmem:[%s1107_s5] ss:$0 sm:$0xff]  ;;  %s657_s15 = sshll.u32 %s284_s21, 6 }
  0x1d   : > { %v364_v30 = vmax.f32 %v356_v23, 0.0  ;;  %v325_v31 = vmax.f32 %v317_v25, 0.0  ;;  %v369_v40 = vmax.f32 %v361_v32, 0.0  ;;  %v330_v41 = vmax.f32 %v322_v33, 0.0  ;;  %v530_v14 = vld [vmem:[%s1016_s9] sm:$0xff]  ;;  %s1032_s16 = scalar_lea.vmem [#allocation2], %s657_s15  ;;  %p765_p12 = pnand %p764_p11, %p891_p5 }
  0x1e   : > { %676 = vmatmul.msk.f32.vlgmr.msra.gmra.mxu2 %vm375_vm0, %v368_v28  ;;  %684 = vmatmul.msk.f32.vlgmr.msra.gmra.mxu3 %vm375_vm0, %v329_v29  ;;  %v352_v42 = vmul.f32 %v920_v4, %v668_v36  ;;  %v313_v43 = vmul.f32 %v925_v5, %v303_v37  ;;  %v365_v44 = vmax.f32 %v357_v34, 0.0  ;;  %v326_v45 = vmax.f32 %v318_v35, 0.0  ;;  %v534_v24 = vld [vmem:[%s1016_s9 + $0x20] sm:$0xff]  ;;  %v531_v29 = vld [vmem:[%s1016_s9 + $0x8] sm:$0xff]  ;;  %s576_s28 = sshll.u32 %s1032_s16, 4  ;;  %p770_p2 = por %p769_p1, %p768_p0  ;;  %s577_s28 = int_to_ptr.vmem [resolvable:$true] %s576_s28 }
  0x1f   : > { %672 = vmatmul.msk.f32.vlgmr.msra.gmra.mxu0 %vm375_vm0, %v364_v30  ;;  %680 = vmatmul.msk.f32.vlgmr.msra.gmra.mxu1 %vm375_vm0, %v325_v31  ;;  %v348_v46 = vmul.f32 %v920_v4, %v664_v38  ;;  %v309_v47 = vmul.f32 %v925_v5, %v299_v39  ;;  %v353_v58 = vmul.f32 %v920_v4, %v669_v52  ;;  %p766_p13 = pneg %p765_p12 }
  0x20   : > { %v362_v48 = vadd.f32 %v936_v6, %v352_v42  ;;  %v323_v49 = vadd.f32 %v941_v7, %v313_v43  ;;  %v314_v59 = vmul.f32 %v925_v5, %v304_v53  ;;  %v349_v62 = vmul.f32 %v920_v4, %v665_v54 }
  0x21   : > { %v358_v50 = vadd.f32 %v936_v6, %v348_v46  ;;  %v319_v51 = vadd.f32 %v941_v7, %v309_v47  ;;  %v310_v63 = vmul.f32 %v925_v5, %v300_v55  ;;  %v363_v0 = vadd.f32 %v936_v6, %v353_v58  ;;  %p771_p3 = pnand %p770_p2, %p766_p13 }
  0x22   : > { %v370_v56 = vmax.f32 %v362_v48, 0.0  ;;  %v331_v57 = vmax.f32 %v323_v49, 0.0  ;;  %v324_v1 = vadd.f32 %v941_v7, %v314_v59  ;;  %v359_v2 = vadd.f32 %v936_v6, %v349_v62  ;;  %v1011_v6 = vld [vmem:[%s1106_s4] ss:$0 sm:$0xff] }
  0x23   : > { %v366_v60 = vmax.f32 %v358_v50, 0.0  ;;  %v327_v61 = vmax.f32 %v319_v51, 0.0  ;;  %v320_v3 = vadd.f32 %v941_v7, %v310_v63  ;;  %v371_v4 = vmax.f32 %v363_v0, 0.0 }
  0x24   : > { %v332_v5 = vmax.f32 %v324_v1, 0.0  ;;  %v367_v8 = vmax.f32 %v359_v2, 0.0 }
  0x25   : > { %v328_v9 = vmax.f32 %v320_v3, 0.0 }
  0x26   : > { %677 = vmatmul.msk.f32.gmra.mxu2 %vm375_vm0, %v369_v40  ;;  %685 = vmatmul.msk.f32.gmra.mxu3 %vm375_vm0, %v330_v41  ;;  %v535_v40 = vld [vmem:[%s1016_s9 + $0x28] sm:$0xff] }
  0x27   : > { %673 = vmatmul.msk.f32.gmra.mxu0 %vm375_vm0, %v365_v44  ;;  %681 = vmatmul.msk.f32.gmra.mxu1 %vm375_vm0, %v326_v45  ;;  %v532_v45 = vld [vmem:[%s1016_s9 + $0x10] sm:$0xff] }
  0x2e   : > { %678 = vmatmul.msk.f32.gmra.mxu2 %vm375_vm0, %v370_v56  ;;  %686 = vmatmul.msk.f32.gmra.mxu3 %vm375_vm0, %v331_v57  ;;  %v536_v56 = vld [vmem:[%s1016_s9 + $0x30] sm:$0xff] }
  0x2f   : > { %674 = vmatmul.msk.f32.gmra.mxu0 %vm375_vm0, %v366_v60  ;;  %682 = vmatmul.msk.f32.gmra.mxu1 %vm375_vm0, %v327_v61  ;;  %v533_v61 = vld [vmem:[%s1016_s9 + $0x18] sm:$0xff] }
  0x36   : > { %679 = vmatmul.msk.f32.gmra.mxu2 %vm375_vm0, %v371_v4  ;;  %687 = vmatmul.msk.f32.gmra.mxu3 %vm375_vm0, %v332_v5 }
  0x37   : > { %675 = vmatmul.msk.f32.gmra.mxu0 %vm375_vm0, %v367_v8  ;;  %683 = vmatmul.msk.f32.gmra.mxu1 %vm375_vm0, %v328_v9  ;;  %v537_v8 = vld [vmem:[%s1016_s9 + $0x38] sm:$0xff] }
  0x9c   : > { %v417_v7 = vpop.f32.mrf.mxu0  ;;  %v482_v10 = vpop.f32.mrf.mxu1 }
  0x9d   : > { %v483_v11 = vadd.f32 %v482_v10, %v417_v7 }
  0x9f   : > { %v510_v13 = vmul.f32 %v1011_v6, %v483_v11 }
  0xa1   : > { %v429_v15 = vpop.f32.mrf.mxu2  ;;  %v522_v16 = vadd.f32 %v1021_v12, %v510_v13  ;;  %v494_v17 = vpop.f32.mrf.mxu3 }
  0xa2   : > { %v495_v18 = vadd.f32 %v494_v17, %v429_v15 }
  0xa3   : > { %v538_v19 = vadd.f32 %v530_v14, %v522_v16 }
  0xa4   : > { %v514_v20 = vmul.f32 %v1011_v6, %v495_v18  ;;  %v420_v21 = vpop.f32.mrf.mxu0  ;;  %v485_v22 = vpop.f32.mrf.mxu1 }
  0xa5   : > { %v546_v23 = vmax.f32 %v538_v19, 0.0  ;;  %v486_v25 = vadd.f32 %v485_v22, %v420_v21 }
  0xa6   : > { %v526_v26 = vadd.f32 %v1021_v12, %v514_v20 }
  0xa7   : > { %555 = vst.msk [vmem:[%s1032_s16] sm:$0xff] %vm554_vm1, %v546_v23  ;;  %v511_v27 = vmul.f32 %v1011_v6, %v486_v25 }
  0xa8   : > { %v542_v28 = vadd.f32 %v534_v24, %v526_v26 }
  0xa9   : > { %v432_v30 = vpop.f32.mrf.mxu2  ;;  %v523_v31 = vadd.f32 %v1021_v12, %v511_v27  ;;  %v497_v32 = vpop.f32.mrf.mxu3 }
  0xaa   : > { %v550_v33 = vmax.f32 %v542_v28, 0.0  ;;  %v498_v34 = vadd.f32 %v497_v32, %v432_v30 }
  0xab   : > { %v539_v35 = vadd.f32 %v531_v29, %v523_v31 }
  0xac   : > { %559 = vst.msk [vmem:[%s1032_s16 + $0x20] sm:$0xff] %vm554_vm1, %v550_v33  ;;  %v515_v36 = vmul.f32 %v1011_v6, %v498_v34  ;;  %v423_v37 = vpop.f32.mrf.mxu0  ;;  %v488_v38 = vpop.f32.mrf.mxu1 }
  0xad   : > { %v547_v39 = vmax.f32 %v539_v35, 0.0  ;;  %v489_v41 = vadd.f32 %v488_v38, %v423_v37 }
  0xae   : > { %v527_v42 = vadd.f32 %v1021_v12, %v515_v36 }
  0xaf   : > { %556 = vst.msk [vmem:[%s1032_s16 + $0x8] sm:$0xff] %vm554_vm1, %v547_v39  ;;  %v512_v43 = vmul.f32 %v1011_v6, %v489_v41 }
  0xb0   : > { %v543_v44 = vadd.f32 %v535_v40, %v527_v42 }
  0xb1   : > { %v435_v46 = vpop.f32.mrf.mxu2  ;;  %v524_v47 = vadd.f32 %v1021_v12, %v512_v43  ;;  %v500_v48 = vpop.f32.mrf.mxu3 }
  0xb2   : > { %v551_v49 = vmax.f32 %v543_v44, 0.0  ;;  %v501_v50 = vadd.f32 %v500_v48, %v435_v46 }
  0xb3   : > { %v540_v51 = vadd.f32 %v532_v45, %v524_v47 }
  0xb4   : > { %560 = vst.msk [vmem:[%s1032_s16 + $0x28] sm:$0xff] %vm554_vm1, %v551_v49  ;;  %v516_v52 = vmul.f32 %v1011_v6, %v501_v50  ;;  %v426_v53 = vpop.f32.mrf.mxu0  ;;  %v491_v54 = vpop.f32.mrf.mxu1 }
  0xb5   : > { %v548_v55 = vmax.f32 %v540_v51, 0.0  ;;  %v492_v57 = vadd.f32 %v491_v54, %v426_v53 }
  0xb6   : > { %v528_v58 = vadd.f32 %v1021_v12, %v516_v52 }
  0xb7   : > { %557 = vst.msk [vmem:[%s1032_s16 + $0x10] sm:$0xff] %vm554_vm1, %v548_v55  ;;  %v513_v59 = vmul.f32 %v1011_v6, %v492_v57 }
  0xb8   : > { %v544_v60 = vadd.f32 %v536_v56, %v528_v58 }
  0xb9   : > { %v438_v62 = vpop.f32.mrf.mxu2  ;;  %v525_v63 = vadd.f32 %v1021_v12, %v513_v59  ;;  %v503_v0 = vpop.f32.mrf.mxu3 }
  0xba   : > { %v552_v1 = vmax.f32 %v544_v60, 0.0  ;;  %v504_v2 = vadd.f32 %v503_v0, %v438_v62 }
  0xbb   : > { %v541_v3 = vadd.f32 %v533_v61, %v525_v63 }
  0xbc   : > { %561 = vst.msk [vmem:[%s1032_s16 + $0x30] sm:$0xff] %vm554_vm1, %v552_v1  ;;  %v517_v4 = vmul.f32 %v1011_v6, %v504_v2 }
  0xbd   : > { %v549_v5 = vmax.f32 %v541_v3, 0.0 }
  0xbe   : > { %v529_v9 = vadd.f32 %v1021_v12, %v517_v4 }
  0xbf   : > { %558 = vst.msk [vmem:[%s1032_s16 + $0x18] sm:$0xff] %vm554_vm1, %v549_v5 }
  0xc0   : > { %v545_v7 = vadd.f32 %v537_v8, %v529_v9 }
  0xc2   : > { %v553_v10 = vmax.f32 %v545_v7, 0.0 }
  0xc4   : > { %562 = vst.msk [vmem:[%s1032_s16 + $0x38] sm:$0xff] %vm554_vm1, %v553_v10 }
  0xc5   : > { %774 = shalt.err (!%p771_p3)
}
  0xc6   : > { %s811_s21 = smov 128   ;;  %s812_s16 = smov 8  }
  0xc7   : > { %700 = dma.vmem_to_hbm [thread:$0]  (%p891_p5), %s577_s28, 1024, %s579_s22, %s564_s23, %s811_s21, %s811_s21, %s812_s16  }
  0xc8 PF: > { %p706_p4 = scmp.ge.s32.totalorder %s809_s27, 2  ;;  %s593_s18 = sand.u32 1, %s797_s24  }
  0xc9   : > { %s594_s19 = scalar_lea.sflag [#allocation3], %s593_s18 }
  0xca   : > { %p703_p7 = pnand %p706_p4, %p895_p6 }
  0xcc   : > { %p704_p8 = pneg %p703_p7 }
  0xce   : > { %792 = dma.done.wait (%p704_p8), %s594_s19, 1024  }
  0xcf   : > { %794 = vsyncadd (%p704_p8), %s594_s19, 4294966272  ;;  %p17_p9 = scmp.ge.s32.totalorder %s878_s30, 4   ;;  %s1112_s24 = smov %s801_s25 }
  0xd0   : > { %s1113_s25 = smov %s805_s26  ;;  %s1114_s26 = smov %s889_s10 }
  0xd1   : > { %s1115_s27 = smov %s878_s30  ;;  %19 = sbr.rel (!%p17_p9) target bundleno = 3 (0x3), region = 88 }
  0xd6   :  { %600 = vsyncpa [#allocation3], 1 }
  0xd7   :  { %602 = vsyncpa [#allocation3 + $0x1], 1 }

</bundles_post_ra>
